<compile_context>
chip_gen: v5e
topology: v5e:2x2
jax: 0.10.0
libtpu: 0.0.40
codegen_flags: <defaults>
</compile_context>

<pallas_src>
import functools

import numpy as np
import jax
import jax.numpy as jnp
from jax.experimental import pallas as pl
from jax.experimental.pallas import tpu as pltpu

# MXU operand dtype (bf16 in, f32 accumulate). Element-wise math stays f32.
DOT_DTYPE = jnp.bfloat16
# Explicit scoped-VMEM budget: above the 16/32 MiB defaults, still leaves
# headroom under v7x's 64 MiB physical VMEM.
VMEM_LIMIT_BYTES = 48 * 1024 * 1024


# --------------------------------------------------------------------------
# Kernel 1: KernelPredictor — lane-dense matmul, M-row parallel grid.
# --------------------------------------------------------------------------

def _kp_kernel(c_ref, wk_ref, bk_ref, wb_ref, bb_ref, ok_ref, ob_ref):
    c = c_ref[...]
    # Predicted LVC weights stored in bf16 (they are consumed as bf16 MXU
    # operands anyway — same rounding as the reference's cast-at-use).
    ok_ref[...] = (jnp.dot(c, wk_ref[...], preferred_element_type=jnp.float32)
                   + bk_ref[...]).astype(ok_ref.dtype)
    # Predicted LVC biases stay f32 (added post-accumulation).
    ob_ref[...] = (jnp.dot(c, wb_ref[...], preferred_element_type=jnp.float32)
                   + bb_ref[...])


def kernel_predictor(c, packed):
    """c: (B, Ccond, L) f32.

    Returns:
      kpk: (B*L, NL*C*ks*C) bf16 — LVC im2col weights, columns ordered
           (layer, cout, tap*C + cin).
      kpb: (B*L, NL*C)      f32  — LVC biases, columns ordered (layer, cout).
    """
    B, Ccond, L = c.shape
    Dk = packed["kp_wk_t"].shape[1]
    Db = packed["kp_wb_t"].shape[1]
    M = B * L
    # (B, Ccond, L) -> (B*L, Ccond): matmul N dim (lanes) is Dk/Db, so both
    # the MXU and the HBM stores are lane-dense.
    c2 = jnp.transpose(c, (0, 2, 1)).reshape(M, Ccond).astype(DOT_DTYPE)
    tm = M if M <= 256 else 256        # M-row tiles -> DMA/compute overlap +
    grid = (pl.cdiv(M, tm),)           # megacore split on v7x at large B*L.
    return pl.pallas_call(
        _kp_kernel,
        out_shape=(jax.ShapeDtypeStruct((M, Dk), DOT_DTYPE),
                   jax.ShapeDtypeStruct((M, Db), jnp.float32)),
        grid=grid,
        in_specs=[
            pl.BlockSpec((tm, Ccond), lambda i: (i, 0)),
            pl.BlockSpec((Ccond, Dk), lambda i: (0, 0)),
            pl.BlockSpec((1, Dk), lambda i: (0, 0)),
            pl.BlockSpec((Ccond, Db), lambda i: (0, 0)),
            pl.BlockSpec((1, Db), lambda i: (0, 0)),
        ],
        out_specs=(pl.BlockSpec((tm, Dk), lambda i: (i, 0)),
                   pl.BlockSpec((tm, Db), lambda i: (i, 0))),
        compiler_params=pltpu.CompilerParams(
            dimension_semantics=("parallel",),
            vmem_limit_bytes=VMEM_LIMIT_BYTES),
    )(c2, packed["kp_wk_t"], packed["kp_bk"], packed["kp_wb_t"], packed["kp_bb"])


# --------------------------------------------------------------------------
# Kernel 2: fused branch (preconv + LVC blocks + dilated convs + postconv)
# --------------------------------------------------------------------------

def _branch_kernel(x_ref, kpk_ref, kpb_ref, pre_w_ref, pre_b_ref,
                   blk_w_ref, blk_b_ref, post_w_ref, post_b_ref,
                   o_ref, pad_ref, im_ref, *,
                   C, T, L, hop, ks, conv_size, dilations, maxpad,
                   lrelu_slope, block_slope):
    """One batch element, entirely in VMEM.

    pad_ref: (C, T + 2*maxpad) f32 zero-halo scratch (in-kernel "same" pad).
             INVARIANT: the halo columns [0, maxpad) and [maxpad+T, end) are
             never written below — only zeroed here.  Do not break this.
    im_ref : (ks*C, T) bf16 im2col scratch for the LVC contraction only.
    """
    # Zero ONLY the halo columns — the data region is always fully rewritten
    # (preconv output / per-segment LVC writes) before it is read.
    if maxpad > 0:
        pad_ref[:, :maxpad] = jnp.zeros((C, maxpad), jnp.float32)
        pad_ref[:, maxpad + T:] = jnp.zeros((C, maxpad), jnp.float32)

    # ---- preconv (1x1, Cin=1) + LeakyReLU: pure VPU, f32 -------------------
    h = pre_w_ref[...] * x_ref[0] + pre_b_ref[...]          # (C,1)*(1,T)->(C,T)
    h = jnp.where(h > 0, h, lrelu_slope * h)

    for lyr, dil in enumerate(dilations):
        # ---- location-variable convolution (weights predicted from c) -----
        p_lvc = (ks - 1) // 2
        pad_ref[:, maxpad:maxpad + T] = h
        base = maxpad - p_lvc
        for k in range(ks):                      # bf16 im2col, K = ks*C
            im_ref[k * C:(k + 1) * C, :] = (
                pad_ref[:, base + k: base + k + T].astype(im_ref.dtype))

        # TODO(synk): at production hop (multiple of 128) fuse these L small
        # dots into one batched contraction; at toy hop the unrolled loop is
        # the safe lowering.
        for l in range(L):
            wk = kpk_ref[0, l, lyr]              # (C, ks*C) bf16, no cast
            seg = jnp.dot(wk, im_ref[:, l * hop:(l + 1) * hop],
                          preferred_element_type=jnp.float32)   # (C, hop)
            seg = seg + kpb_ref[0, l, lyr]       # predicted bias (C,1) f32
            seg = jnp.where(seg > 0, seg, block_slope * seg)
            # Activated segment goes straight back into the padded scratch:
            # it becomes the dilated-conv input below (no concatenate).
            pad_ref[:, maxpad + l * hop: maxpad + (l + 1) * hop] = seg

        # ---- weight-normed dilated Conv1d ("same") + LeakyReLU ------------
        # Tap-accumulated dots straight from pad_ref (no im2col staging: the
        # bigger-K matmul does not pay for the extra VMEM store+reload).
        p_dil = dil * (conv_size - 1) // 2
        base = maxpad - p_dil
        y = None
        for k in range(conv_size):
            d = jnp.dot(blk_w_ref[lyr, k],       # (C, C) bf16
                        pad_ref[:, base + k * dil: base + k * dil + T]
                        .astype(DOT_DTYPE),
                        preferred_element_type=jnp.float32)     # (C, T)
            y = d if y is None else y + d
        y = y + blk_b_ref[lyr]                   # (C, 1) f32
        h = jnp.where(y > 0, y, block_slope * y)

    # ---- postconv (1x1, C -> 1): broadcast-mul + sublane reduce (VPU/XLU)
    # instead of an M=1 MXU dot.
    out = jnp.sum(post_w_ref[...] * h, axis=0, keepdims=True) + post_b_ref[...]
    o_ref[0] = out


def lvc_branch(x, kpk5, kpb5, params, *, dilations, ks, conv_size,
               lrelu_slope, block_slope):
    """x: (B,1,T); kpk5: (B,L,NL,C,ks*C) bf16; kpb5: (B,L,NL,C,1) f32."""
    B, _, T = x.shape
    _, L, NL, C, _ = kpk5.shape
    hop = T // L
    maxpad = max([(ks - 1) // 2] + [d * (conv_size - 1) // 2 for d in dilations])

    kern = functools.partial(
        _branch_kernel, C=C, T=T, L=L, hop=hop, ks=ks, conv_size=conv_size,
        dilations=tuple(dilations), maxpad=maxpad,
        lrelu_slope=lrelu_slope, block_slope=block_slope)

    # TODO(synk): for very long T on v7x (64 MiB VMEM) add a halo'd time-tile
    # grid axis (also fixes megacore balance at B=1); not needed at these sizes.
    return pl.pallas_call(
        kern,
        out_shape=jax.ShapeDtypeStruct((B, 1, T), jnp.float32),
        grid=(B,),
        in_specs=[
            pl.BlockSpec((1, 1, T), lambda i: (i, 0, 0)),
            pl.BlockSpec((1, L, NL, C, ks * C), lambda i: (i, 0, 0, 0, 0)),
            pl.BlockSpec((1, L, NL, C, 1), lambda i: (i, 0, 0, 0, 0)),
            pl.BlockSpec((C, 1), lambda i: (0, 0)),
            pl.BlockSpec((C, 1), lambda i: (0, 0)),
            pl.BlockSpec((NL, conv_size, C, C), lambda i: (0, 0, 0, 0)),
            pl.BlockSpec((NL, C, 1), lambda i: (0, 0, 0)),
            pl.BlockSpec((C, 1), lambda i: (0, 0)),
            pl.BlockSpec((1, 1), lambda i: (0, 0)),
        ],
        out_specs=pl.BlockSpec((1, 1, T), lambda i: (i, 0, 0)),
        scratch_shapes=[
            pltpu.VMEM((C, T + 2 * maxpad), jnp.float32),
            pltpu.VMEM((ks * C, T), DOT_DTYPE),
        ],
        compiler_params=pltpu.CompilerParams(
            dimension_semantics=("parallel",),
            vmem_limit_bytes=VMEM_LIMIT_BYTES),
    )(x, kpk5, kpb5, params["pre_w"], params["pre_b"], params["blk_w"],
      params["blk_b"], params["post_w"], params["post_b"])


def discriminator_branch(x, c, packed, *, hidden_dim, dilations, ks, conv_size,
                         lrelu_slope, block_slope):
    """TDiscriminator / FDiscriminator forward (they share this structure)."""
    B = x.shape[0]
    L = c.shape[-1]
    C = hidden_dim
    NL = len(dilations)
    kpk, kpb = kernel_predictor(c, packed)
    # Pure row-major reshapes — no HBM transpose between the two kernels.
    kpk5 = kpk.reshape(B, L, NL, C, ks * C)
    kpb5 = kpb.reshape(B, L, NL, C, 1)
    return lvc_branch(x, kpk5, kpb5, packed, dilations=dilations, ks=ks,
                      conv_size=conv_size, lrelu_slope=lrelu_slope,
                      block_slope=block_slope)


# --------------------------------------------------------------------------
# Deterministic parameters (weight_norm reparametrization applied) + packing
# --------------------------------------------------------------------------

def weight_norm_conv1d(key, cout, cin, ksize):
    kv, kg, kb = jax.random.split(key, 3)
    v = jax.random.normal(kv, (cout, cin, ksize), jnp.float32) / np.sqrt(cin * ksize)
    g = jnp.abs(jax.random.normal(kg, (cout,), jnp.float32)) + 0.5
    norm = jnp.sqrt(jnp.sum(v * v, axis=(1, 2), keepdims=True))
    w = g[:, None, None] * v / norm
    b = 0.1 * jax.random.normal(kb, (cout,), jnp.float32)
    return w, b


def make_branch_params(key, cond_channels, hidden_dim, n_layers, ks, conv_size):
    keys = jax.random.split(key, 4 + n_layers)
    C = hidden_dim
    kp_k_w, kp_k_b = weight_norm_conv1d(keys[0], C * C * ks * n_layers, cond_channels, 1)
    kp_b_w, kp_b_b = weight_norm_conv1d(keys[1], C * n_layers, cond_channels, 1)
    pre_w, pre_b = weight_norm_conv1d(keys[2], C, 1, 1)
    post_w, post_b = weight_norm_conv1d(keys[3], 1, C, 1)
    block_w, block_b = [], []
    for i in range(n_layers):
        w, b = weight_norm_conv1d(keys[4 + i], C, C, conv_size)
        block_w.append(w)
        block_b.append(b)
    return dict(
        kp_kernel_w=kp_k_w[..., 0], kp_kernel_b=kp_k_b,
        kp_bias_w=kp_b_w[..., 0], kp_bias_b=kp_b_b,
        pre_w=pre_w[..., 0], pre_b=pre_b,
        post_w=post_w[..., 0], post_b=post_b,
        block_w=block_w, block_b=block_b,
    )


def pack_branch_params(p, *, hidden_dim, n_layers, ks, conv_size):
    """Repack torch-layout weights into the layouts the Pallas kernels consume."""
    C = hidden_dim
    Ccond = p["kp_kernel_w"].shape[1]

    # kernel_conv rows are ordered (layer, cin, cout, tap) -> reorder to
    # (layer, cout, tap*C + cin) so a predictor output row is directly the
    # per-segment im2col LVC weight matrix.
    wk = (p["kp_kernel_w"].reshape(n_layers, C, C, ks, Ccond)
          .transpose(0, 2, 3, 1, 4).reshape(n_layers * C * ks * C, Ccond))
    bk = (p["kp_kernel_b"].reshape(n_layers, C, C, ks)
          .transpose(0, 2, 3, 1).reshape(1, n_layers * C * ks * C))
    # bias_conv rows are already ordered (layer, cout).
    wb = p["kp_bias_w"].reshape(n_layers * C, Ccond)
    bb = p["kp_bias_b"].reshape(1, n_layers * C)

    # Dilated-conv weights as per-tap (Cout, Cin) matrices, pre-cast to bf16
    # (same rounding as the reference's cast-at-use).
    blk_w = jnp.stack([w.transpose(2, 0, 1) for w in p["block_w"]],
                      axis=0).astype(DOT_DTYPE)              # (NL, K, Cout, Cin)
    blk_b = jnp.stack([b.reshape(C, 1) for b in p["block_b"]], axis=0)

    return dict(
        kp_wk_t=jnp.transpose(wk).astype(DOT_DTYPE),         # (Ccond, NL*C*ks*C)
        kp_bk=bk,                                            # (1, NL*C*ks*C) f32
        kp_wb_t=jnp.transpose(wb).astype(DOT_DTYPE),         # (Ccond, NL*C)
        kp_bb=bb,                                            # (1, NL*C) f32
        pre_w=p["pre_w"].reshape(C, 1), pre_b=p["pre_b"].reshape(C, 1),
        blk_w=blk_w, blk_b=blk_b,
        post_w=p["post_w"].reshape(C, 1), post_b=p["post_b"].reshape(1, 1),
    )


# --------------------------------------------------------------------------
# Pure-JAX reference (mirrors the PyTorch forward and the kernel's bf16
# dot-operand policy) for correctness checking
# --------------------------------------------------------------------------

def ref_kp(c, w, b):
    y = jnp.einsum("oc,bcl->bol", w.astype(DOT_DTYPE), c.astype(DOT_DTYPE),
                   preferred_element_type=jnp.float32)
    return y + b[None, :, None]


def ref_pre(x, w, b, slope):
    y = w[None, :, :] * x + b[None, :, None]
    return jnp.where(y > 0, y, slope * y)


def ref_lvc_block(x, kernel, bias, w_dil, b_dil, dilation, conv_size, slope):
    B, Cin, T = x.shape
    _, _, Cout, ks, L = kernel.shape
    hop = T // L
    pad = (ks - 1) // 2
    xp = jnp.pad(x, ((0, 0), (0, 0), (pad, pad)))
    idx = (jnp.arange(L)[:, None, None] * hop
           + jnp.arange(hop)[None, :, None]
           + jnp.arange(ks)[None, None, :])
    xw = xp[:, :, idx]                                   # (B, Cin, L, hop, ks)
    o = jnp.einsum("bilsk,biokl->bols",
                   xw.astype(DOT_DTYPE), kernel.astype(DOT_DTYPE),
                   preferred_element_type=jnp.float32)
    o = o + bias[:, :, :, None]
    o = o.reshape(B, Cout, T)
    o = jnp.where(o > 0, o, slope * o)
    pd = dilation * (conv_size - 1) // 2
    op = jnp.pad(o, ((0, 0), (0, 0), (pd, pd)))
    y = jnp.zeros((B, Cout, T), jnp.float32)
    for k in range(conv_size):
        y = y + jnp.einsum("oi,bit->bot",
                           w_dil[:, :, k].astype(DOT_DTYPE),
                           op[:, :, k * dilation: k * dilation + T].astype(DOT_DTYPE),
                           preferred_element_type=jnp.float32)
    y = y + b_dil[None, :, None]
    return jnp.where(y > 0, y, slope * y)


def ref_post(h, w, b):
    # f32 on both sides (the kernel does the 1x1 postconv on the VPU in f32).
    return jnp.einsum("oc,bct->bot", w, h) + b[None, :, None]


def ref_branch(x, c, p, *, hidden_dim, dilations, ks, conv_size,
               lrelu_slope, block_slope):
    B = x.shape[0]
    L = c.shape[-1]
    C = hidden_dim
    n = len(dilations)
    k_flat = ref_kp(c, p["kp_kernel_w"], p["kp_kernel_b"])
    b_flat = ref_kp(c, p["kp_bias_w"], p["kp_bias_b"])
    kernels = k_flat.reshape(B, n, C, C, ks, L)          # matches torch .view
    biases = b_flat.reshape(B, n, C, L)
    h = ref_pre(x, p["pre_w"], p["pre_b"], lrelu_slope)
    for i, dil in enumerate(dilations):
        h = ref_lvc_block(h, kernels[:, i], biases[:, i],
                          p["block_w"][i], p["block_b"][i],
                          dil, conv_size, block_slope)
    return ref_post(h, p["post_w"], p["post_b"])


# --------------------------------------------------------------------------

if __name__ == "__main__":
    # Small synthetic hyper-parameters (stand-ins for hp.*)
    B, T = 2, 32
    hidden_dim = 16
    dilations = (1, 2)
    ker_size = 3          # hp.*.ker_size (LVC kernel size)
    conv_size = 3         # hp.*.conv_size
    lrelu_slope = 0.2     # hp.*.lReLU_slope (applied after preconv)
    # NOTE: the reference PyTorch builds LVC_ConvBlock(dilation, conv_size,
    # hidden_dim, ker_size); the 4th positional parameter is lReLU_slope, so
    # inside the blocks the LeakyReLU slope equals float(ker_size).  Kept
    # as-is to match the module's actual forward semantics.
    block_slope = float(ker_size)
    n_mel = 8             # hp.audio.n_mel_channels (FDiscriminator conditioning)
    td_cond = 512         # TDiscriminator conditioning channels (hard-coded)
    Lt = Lf = 4           # conditioning lengths -> hop = T // L = 8

    root = jax.random.PRNGKey(0)
    k_td, k_fd, kx, ktc, kfc = jax.random.split(root, 5)
    td_params = make_branch_params(k_td, td_cond, hidden_dim, len(dilations),
                                   ker_size, conv_size)
    fd_params = make_branch_params(k_fd, n_mel, hidden_dim, len(dilations),
                                   ker_size, conv_size)
    pack = functools.partial(pack_branch_params, hidden_dim=hidden_dim,
                             n_layers=len(dilations), ks=ker_size,
                             conv_size=conv_size)
    td_packed = pack(td_params)
    fd_packed = pack(fd_params)

    x = 0.5 * jax.random.normal(kx, (B, 1, T), jnp.float32)
    t_c = 0.1 * jax.random.normal(ktc, (B, td_cond, Lt), jnp.float32)
    f_c = 0.1 * jax.random.normal(kfc, (B, n_mel, Lf), jnp.float32)

    common = dict(hidden_dim=hidden_dim, dilations=dilations, ks=ker_size,
                  conv_size=conv_size, lrelu_slope=lrelu_slope,
                  block_slope=block_slope)

    # Discriminator.forward(x, t_c, f_c) -> (TD(x, t_c), FD(x, f_c))
    @jax.jit
    def discriminator_forward(x, t_c, f_c, td_p, fd_p):
        return (discriminator_branch(x, t_c, td_p, **common),
                discriminator_branch(x, f_c, fd_p, **common))

    td_out, fd_out = discriminator_forward(x, t_c, f_c, td_packed, fd_packed)
    jax.block_until_ready((td_out, fd_out))

    assert td_out.shape == (B, 1, T) and fd_out.shape == (B, 1, T)

    td_ref = ref_branch(x, t_c, td_params, **common)
    fd_ref = ref_branch(x, f_c, fd_params, **common)
    np.testing.assert_allclose(np.asarray(td_out), np.asarray(td_ref),
                               rtol=5e-3, atol=1e-2)
    np.testing.assert_allclose(np.asarray(fd_out), np.asarray(fd_ref),
                               rtol=5e-3, atol=1e-2)

    print("KERNEL_OK")
</pallas_src>

<mosaic_0001>
module attributes {stable_mosaic.version = 11 : i64} {
  func.func @_kp_kernel(%arg0: i32, %arg1: memref<8x512xbf16, #tpu.memory_space<vmem>>, %arg2: memref<512x1536xbf16, #tpu.memory_space<vmem>>, %arg3: memref<1x1536xf32, #tpu.memory_space<vmem>>, %arg4: memref<512x32xbf16, #tpu.memory_space<vmem>>, %arg5: memref<1x32xf32, #tpu.memory_space<vmem>>, %arg6: memref<8x1536xbf16, #tpu.memory_space<vmem>>, %arg7: memref<8x32xf32, #tpu.memory_space<vmem>>) attributes {dimension_semantics = [#tpu.dimension_semantics<parallel>], iteration_bounds = array<i64: 1>, scalar_prefetch = 0 : i64, scratch_operands = 0 : i64, tpu.core_type = #tpu.core_type<tc>, window_params = [{transform_indices = @transform_0, window_bounds = array<i64: 8, 512>}, {pipeline_mode = #tpu.pipeline_mode<synchronous>, transform_indices = @transform_1, window_bounds = array<i64: 512, 1536>}, {pipeline_mode = #tpu.pipeline_mode<synchronous>, transform_indices = @transform_2, window_bounds = array<i64: 1, 1536>}, {pipeline_mode = #tpu.pipeline_mode<synchronous>, transform_indices = @transform_3, window_bounds = array<i64: 512, 32>}, {pipeline_mode = #tpu.pipeline_mode<synchronous>, transform_indices = @transform_4, window_bounds = array<i64: 1, 32>}, {transform_indices = @transform_5, window_bounds = array<i64: 8, 1536>}, {transform_indices = @transform_6, window_bounds = array<i64: 8, 32>}]} {
    %c0 = arith.constant 0 : index
    %c0_0 = arith.constant 0 : index
    %0 = vector.load %arg1[%c0, %c0_0] : memref<8x512xbf16, #tpu.memory_space<vmem>>, vector<8x512xbf16>
    %c0_1 = arith.constant 0 : index
    %c0_2 = arith.constant 0 : index
    %1 = vector.load %arg2[%c0_1, %c0_2] : memref<512x1536xbf16, #tpu.memory_space<vmem>>, vector<512x1536xbf16>
    %cst = arith.constant dense<0.000000e+00> : vector<8x1536xf32>
    %2 = tpu.matmul %0, %1, %cst {dimension_numbers = #tpu.dot_dimension_numbers<[1], [0], [0], [1], [0, 0, 1, 1], [], []>} : vector<8x512xbf16>, vector<512x1536xbf16>, vector<8x1536xf32> -> vector<8x1536xf32>
    %c0_3 = arith.constant 0 : index
    %c0_4 = arith.constant 0 : index
    %3 = vector.load %arg3[%c0_3, %c0_4] : memref<1x1536xf32, #tpu.memory_space<vmem>>, vector<1x1536xf32>
    %4 = vector.broadcast %3 : vector<1x1536xf32> to vector<8x1536xf32>
    %5 = arith.addf %2, %4 : vector<8x1536xf32>
    %6 = arith.truncf %5 : vector<8x1536xf32> to vector<8x1536xbf16>
    %c0_5 = arith.constant 0 : index
    %c0_6 = arith.constant 0 : index
    %7 = vector.load %arg6[%c0_5, %c0_6] : memref<8x1536xbf16, #tpu.memory_space<vmem>>, vector<8x1536xbf16>
    tpu.vector_store %arg6[%c0_5, %c0_6], %6 {strides = array<i32>} : memref<8x1536xbf16, #tpu.memory_space<vmem>>, vector<8x1536xbf16>,
    %c0_7 = arith.constant 0 : index
    %c0_8 = arith.constant 0 : index
    %8 = vector.load %arg4[%c0_7, %c0_8] : memref<512x32xbf16, #tpu.memory_space<vmem>>, vector<512x32xbf16>
    %cst_9 = arith.constant dense<0.000000e+00> : vector<8x32xf32>
    %9 = tpu.matmul %0, %8, %cst_9 {dimension_numbers = #tpu.dot_dimension_numbers<[1], [0], [0], [1], [0, 0, 1, 1], [], []>} : vector<8x512xbf16>, vector<512x32xbf16>, vector<8x32xf32> -> vector<8x32xf32>
    %c0_10 = arith.constant 0 : index
    %c0_11 = arith.constant 0 : index
    %10 = vector.load %arg5[%c0_10, %c0_11] : memref<1x32xf32, #tpu.memory_space<vmem>>, vector<1x32xf32>
    %11 = vector.broadcast %10 : vector<1x32xf32> to vector<8x32xf32>
    %12 = arith.addf %9, %11 : vector<8x32xf32>
    %c0_12 = arith.constant 0 : index
    %c0_13 = arith.constant 0 : index
    %13 = vector.load %arg7[%c0_12, %c0_13] : memref<8x32xf32, #tpu.memory_space<vmem>>, vector<8x32xf32>
    tpu.vector_store %arg7[%c0_12, %c0_13], %12 {strides = array<i32>} : memref<8x32xf32, #tpu.memory_space<vmem>>, vector<8x32xf32>,
    return
  }
  func.func @transform_0(%arg0: i32) -> (i32, i32) {
    %c0_i32 = arith.constant 0 : i32
    %c0_i32_0 = arith.constant 0 : i32
    return %arg0, %c0_i32 : i32, i32
  }
  func.func @transform_1(%arg0: i32) -> (i32, i32) {
    %c0_i32 = arith.constant 0 : i32
    %c0_i32_0 = arith.constant 0 : i32
    %c0_i32_1 = arith.constant 0 : i32
    return %c0_i32, %c0_i32_0 : i32, i32
  }
  func.func @transform_2(%arg0: i32) -> (i32, i32) {
    %c0_i32 = arith.constant 0 : i32
    %c0_i32_0 = arith.constant 0 : i32
    %c0_i32_1 = arith.constant 0 : i32
    return %c0_i32, %c0_i32_0 : i32, i32
  }
  func.func @transform_3(%arg0: i32) -> (i32, i32) {
    %c0_i32 = arith.constant 0 : i32
    %c0_i32_0 = arith.constant 0 : i32
    %c0_i32_1 = arith.constant 0 : i32
    return %c0_i32, %c0_i32_0 : i32, i32
  }
  func.func @transform_4(%arg0: i32) -> (i32, i32) {
    %c0_i32 = arith.constant 0 : i32
    %c0_i32_0 = arith.constant 0 : i32
    %c0_i32_1 = arith.constant 0 : i32
    return %c0_i32, %c0_i32_0 : i32, i32
  }
  func.func @transform_5(%arg0: i32) -> (i32, i32) {
    %c0_i32 = arith.constant 0 : i32
    %c0_i32_0 = arith.constant 0 : i32
    return %arg0, %c0_i32 : i32, i32
  }
  func.func @transform_6(%arg0: i32) -> (i32, i32) {
    %c0_i32 = arith.constant 0 : i32
    %c0_i32_0 = arith.constant 0 : i32
    return %arg0, %c0_i32 : i32, i32
  }
}

module attributes {stable_mosaic.version = 11 : i64} {
  func.func @_branch_kernel(%arg0: i32, %arg1: memref<1x1x32xf32, #tpu.memory_space<vmem>>, %arg2: memref<1x4x2x16x48xbf16, #tpu.memory_space<vmem>>, %arg3: memref<1x4x2x16x1xf32, #tpu.memory_space<vmem>>, %arg4: memref<16x1xf32, #tpu.memory_space<vmem>>, %arg5: memref<16x1xf32, #tpu.memory_space<vmem>>, %arg6: memref<2x3x16x16xbf16, #tpu.memory_space<vmem>>, %arg7: memref<2x16x1xf32, #tpu.memory_space<vmem>>, %arg8: memref<16x1xf32, #tpu.memory_space<vmem>>, %arg9: memref<1x1xf32, #tpu.memory_space<vmem>>, %arg10: memref<1x1x32xf32, #tpu.memory_space<vmem>>, %arg11: memref<16x36xf32, #tpu.memory_space<vmem>>, %arg12: memref<48x32xbf16, #tpu.memory_space<vmem>>) attributes {dimension_semantics = [#tpu.dimension_semantics<parallel>], iteration_bounds = array<i64: 2>, scalar_prefetch = 0 : i64, scratch_operands = 2 : i64, tpu.core_type = #tpu.core_type<tc>, window_params = [{transform_indices = @transform_0, window_bounds = array<i64: 1, 1, 32>}, {transform_indices = @transform_1, window_bounds = array<i64: 1, 4, 2, 16, 48>}, {transform_indices = @transform_2, window_bounds = array<i64: 1, 4, 2, 16, 1>}, {pipeline_mode = #tpu.pipeline_mode<synchronous>, transform_indices = @transform_3, window_bounds = array<i64: 16, 1>}, {pipeline_mode = #tpu.pipeline_mode<synchronous>, transform_indices = @transform_4, window_bounds = array<i64: 16, 1>}, {pipeline_mode = #tpu.pipeline_mode<synchronous>, transform_indices = @transform_5, window_bounds = array<i64: 2, 3, 16, 16>}, {pipeline_mode = #tpu.pipeline_mode<synchronous>, transform_indices = @transform_6, window_bounds = array<i64: 2, 16, 1>}, {pipeline_mode = #tpu.pipeline_mode<synchronous>, transform_indices = @transform_7, window_bounds = array<i64: 16, 1>}, {pipeline_mode = #tpu.pipeline_mode<synchronous>, transform_indices = @transform_8, window_bounds = array<i64: 1, 1>}, {transform_indices = @transform_9, window_bounds = array<i64: 1, 1, 32>}]} {
    %cst = arith.constant 0.000000e+00 : f32
    %0 = vector.broadcast %cst : f32 to vector<16x2xf32>
    %c0 = arith.constant 0 : index
    %c0_0 = arith.constant 0 : index
    %1 = vector.load %arg11[%c0, %c0_0] : memref<16x36xf32, #tpu.memory_space<vmem>>, vector<16x2xf32>
    tpu.vector_store %arg11[%c0, %c0_0], %0 {strides = array<i32>} : memref<16x36xf32, #tpu.memory_space<vmem>>, vector<16x2xf32>,
    %cst_1 = arith.constant 0.000000e+00 : f32
    %2 = vector.broadcast %cst_1 : f32 to vector<16x2xf32>
    %c0_2 = arith.constant 0 : index
    %c34 = arith.constant 34 : index
    %3 = vector.load %arg11[%c0_2, %c34] : memref<16x36xf32, #tpu.memory_space<vmem>>, vector<16x2xf32>
    tpu.vector_store %arg11[%c0_2, %c34], %2 {strides = array<i32>} : memref<16x36xf32, #tpu.memory_space<vmem>>, vector<16x2xf32>,
    %c0_3 = arith.constant 0 : index
    %c0_4 = arith.constant 0 : index
    %4 = vector.load %arg4[%c0_3, %c0_4] : memref<16x1xf32, #tpu.memory_space<vmem>>, vector<16x1xf32>
    %c0_5 = arith.constant 0 : index
    %c0_6 = arith.constant 0 : index
    %c0_7 = arith.constant 0 : index
    %5 = vector.load %arg1[%c0_5, %c0_6, %c0_7] : memref<1x1x32xf32, #tpu.memory_space<vmem>>, vector<1x1x32xf32>
    %6 = vector.shape_cast %5 : vector<1x1x32xf32> to vector<1x32xf32>
    %7 = vector.broadcast %4 : vector<16x1xf32> to vector<16x32xf32>
    %8 = vector.broadcast %6 : vector<1x32xf32> to vector<16x32xf32>
    %9 = arith.mulf %7, %8 : vector<16x32xf32>
    %c0_8 = arith.constant 0 : index
    %c0_9 = arith.constant 0 : index
    %10 = vector.load %arg5[%c0_8, %c0_9] : memref<16x1xf32, #tpu.memory_space<vmem>>, vector<16x1xf32>
    %11 = vector.broadcast %10 : vector<16x1xf32> to vector<16x32xf32>
    %12 = arith.addf %9, %11 : vector<16x32xf32>
    %cst_10 = arith.constant 0.000000e+00 : f32
    %13 = vector.broadcast %cst_10 : f32 to vector<16x32xf32>
    %14 = arith.cmpf ogt, %12, %13 : vector<16x32xf32>
    %cst_11 = arith.constant 2.000000e-01 : f32
    %15 = vector.broadcast %cst_11 : f32 to vector<16x32xf32>
    %16 = arith.mulf %15, %12 : vector<16x32xf32>
    %17 = arith.select %14, %12, %16 : vector<16x32xi1>, vector<16x32xf32>
    %c0_12 = arith.constant 0 : index
    %c2 = arith.constant 2 : index
    %18 = vector.load %arg11[%c0_12, %c2] : memref<16x36xf32, #tpu.memory_space<vmem>>, vector<16x32xf32>
    tpu.vector_store %arg11[%c0_12, %c2], %17 {strides = array<i32>} : memref<16x36xf32, #tpu.memory_space<vmem>>, vector<16x32xf32>,
    %c0_13 = arith.constant 0 : index
    %c1 = arith.constant 1 : index
    %19 = vector.load %arg11[%c0_13, %c1] : memref<16x36xf32, #tpu.memory_space<vmem>>, vector<16x32xf32>
    %20 = arith.truncf %19 : vector<16x32xf32> to vector<16x32xbf16>
    %c0_14 = arith.constant 0 : index
    %c0_15 = arith.constant 0 : index
    %21 = vector.load %arg12[%c0_14, %c0_15] : memref<48x32xbf16, #tpu.memory_space<vmem>>, vector<16x32xbf16>
    tpu.vector_store %arg12[%c0_14, %c0_15], %20 {strides = array<i32>} : memref<48x32xbf16, #tpu.memory_space<vmem>>, vector<16x32xbf16>,
    %c0_16 = arith.constant 0 : index
    %c2_17 = arith.constant 2 : index
    %22 = vector.load %arg11[%c0_16, %c2_17] : memref<16x36xf32, #tpu.memory_space<vmem>>, vector<16x32xf32>
    %23 = arith.truncf %22 : vector<16x32xf32> to vector<16x32xbf16>
    %c16 = arith.constant 16 : index
    %c0_18 = arith.constant 0 : index
    %24 = vector.load %arg12[%c16, %c0_18] : memref<48x32xbf16, #tpu.memory_space<vmem>>, vector<16x32xbf16>
    tpu.vector_store %arg12[%c16, %c0_18], %23 {strides = array<i32>} : memref<48x32xbf16, #tpu.memory_space<vmem>>, vector<16x32xbf16>,
    %c0_19 = arith.constant 0 : index
    %c3 = arith.constant 3 : index
    %25 = vector.load %arg11[%c0_19, %c3] : memref<16x36xf32, #tpu.memory_space<vmem>>, vector<16x32xf32>
    %26 = arith.truncf %25 : vector<16x32xf32> to vector<16x32xbf16>
    %c32 = arith.constant 32 : index
    %c0_20 = arith.constant 0 : index
    %27 = vector.load %arg12[%c32, %c0_20] : memref<48x32xbf16, #tpu.memory_space<vmem>>, vector<16x32xbf16>
    tpu.vector_store %arg12[%c32, %c0_20], %26 {strides = array<i32>} : memref<48x32xbf16, #tpu.memory_space<vmem>>, vector<16x32xbf16>,
    %c0_21 = arith.constant 0 : index
    %c0_22 = arith.constant 0 : index
    %c0_23 = arith.constant 0 : index
    %c0_24 = arith.constant 0 : index
    %c0_25 = arith.constant 0 : index
    %28 = vector.load %arg2[%c0_21, %c0_22, %c0_23, %c0_24, %c0_25] : memref<1x4x2x16x48xbf16, #tpu.memory_space<vmem>>, vector<1x1x1x16x48xbf16>
    %29 = vector.shape_cast %28 : vector<1x1x1x16x48xbf16> to vector<16x48xbf16>
    %c0_26 = arith.constant 0 : index
    %c0_27 = arith.constant 0 : index
    %30 = vector.load %arg12[%c0_26, %c0_27] : memref<48x32xbf16, #tpu.memory_space<vmem>>, vector<48x8xbf16>
    %cst_28 = arith.constant dense<0.000000e+00> : vector<16x8xf32>
    %31 = tpu.matmul %29, %30, %cst_28 {dimension_numbers = #tpu.dot_dimension_numbers<[1], [0], [0], [1], [0, 0, 1, 1], [], []>} : vector<16x48xbf16>, vector<48x8xbf16>, vector<16x8xf32> -> vector<16x8xf32>
    %c0_29 = arith.constant 0 : index
    %c0_30 = arith.constant 0 : index
    %c0_31 = arith.constant 0 : index
    %c0_32 = arith.constant 0 : index
    %c0_33 = arith.constant 0 : index
    %32 = vector.load %arg3[%c0_29, %c0_30, %c0_31, %c0_32, %c0_33] : memref<1x4x2x16x1xf32, #tpu.memory_space<vmem>>, vector<1x1x1x16x1xf32>
    %33 = vector.shape_cast %32 : vector<1x1x1x16x1xf32> to vector<16x1xf32>
    %34 = vector.broadcast %33 : vector<16x1xf32> to vector<16x8xf32>
    %35 = arith.addf %31, %34 : vector<16x8xf32>
    %cst_34 = arith.constant 0.000000e+00 : f32
    %36 = vector.broadcast %cst_34 : f32 to vector<16x8xf32>
    %37 = arith.cmpf ogt, %35, %36 : vector<16x8xf32>
    %cst_35 = arith.constant 3.000000e+00 : f32
    %38 = vector.broadcast %cst_35 : f32 to vector<16x8xf32>
    %39 = arith.mulf %38, %35 : vector<16x8xf32>
    %40 = arith.select %37, %35, %39 : vector<16x8xi1>, vector<16x8xf32>
    %c0_36 = arith.constant 0 : index
    %c2_37 = arith.constant 2 : index
    %41 = vector.load %arg11[%c0_36, %c2_37] : memref<16x36xf32, #tpu.memory_space<vmem>>, vector<16x8xf32>
    tpu.vector_store %arg11[%c0_36, %c2_37], %40 {strides = array<i32>} : memref<16x36xf32, #tpu.memory_space<vmem>>, vector<16x8xf32>,
    %c0_38 = arith.constant 0 : index
    %c1_39 = arith.constant 1 : index
    %c0_40 = arith.constant 0 : index
    %c0_41 = arith.constant 0 : index
    %c0_42 = arith.constant 0 : index
    %42 = vector.load %arg2[%c0_38, %c1_39, %c0_40, %c0_41, %c0_42] : memref<1x4x2x16x48xbf16, #tpu.memory_space<vmem>>, vector<1x1x1x16x48xbf16>
    %43 = vector.shape_cast %42 : vector<1x1x1x16x48xbf16> to vector<16x48xbf16>
    %c0_43 = arith.constant 0 : index
    %c8 = arith.constant 8 : index
    %44 = vector.load %arg12[%c0_43, %c8] : memref<48x32xbf16, #tpu.memory_space<vmem>>, vector<48x8xbf16>
    %cst_44 = arith.constant dense<0.000000e+00> : vector<16x8xf32>
    %45 = tpu.matmul %43, %44, %cst_44 {dimension_numbers = #tpu.dot_dimension_numbers<[1], [0], [0], [1], [0, 0, 1, 1], [], []>} : vector<16x48xbf16>, vector<48x8xbf16>, vector<16x8xf32> -> vector<16x8xf32>
    %c0_45 = arith.constant 0 : index
    %c1_46 = arith.constant 1 : index
    %c0_47 = arith.constant 0 : index
    %c0_48 = arith.constant 0 : index
    %c0_49 = arith.constant 0 : index
    %46 = vector.load %arg3[%c0_45, %c1_46, %c0_47, %c0_48, %c0_49] : memref<1x4x2x16x1xf32, #tpu.memory_space<vmem>>, vector<1x1x1x16x1xf32>
    %47 = vector.shape_cast %46 : vector<1x1x1x16x1xf32> to vector<16x1xf32>
    %48 = vector.broadcast %47 : vector<16x1xf32> to vector<16x8xf32>
    %49 = arith.addf %45, %48 : vector<16x8xf32>
    %cst_50 = arith.constant 0.000000e+00 : f32
    %50 = vector.broadcast %cst_50 : f32 to vector<16x8xf32>
    %51 = arith.cmpf ogt, %49, %50 : vector<16x8xf32>
    %cst_51 = arith.constant 3.000000e+00 : f32
    %52 = vector.broadcast %cst_51 : f32 to vector<16x8xf32>
    %53 = arith.mulf %52, %49 : vector<16x8xf32>
    %54 = arith.select %51, %49, %53 : vector<16x8xi1>, vector<16x8xf32>
    %c0_52 = arith.constant 0 : index
    %c10 = arith.constant 10 : index
    %55 = vector.load %arg11[%c0_52, %c10] : memref<16x36xf32, #tpu.memory_space<vmem>>, vector<16x8xf32>
    tpu.vector_store %arg11[%c0_52, %c10], %54 {strides = array<i32>} : memref<16x36xf32, #tpu.memory_space<vmem>>, vector<16x8xf32>,
    %c0_53 = arith.constant 0 : index
    %c2_54 = arith.constant 2 : index
    %c0_55 = arith.constant 0 : index
    %c0_56 = arith.constant 0 : index
    %c0_57 = arith.constant 0 : index
    %56 = vector.load %arg2[%c0_53, %c2_54, %c0_55, %c0_56, %c0_57] : memref<1x4x2x16x48xbf16, #tpu.memory_space<vmem>>, vector<1x1x1x16x48xbf16>
    %57 = vector.shape_cast %56 : vector<1x1x1x16x48xbf16> to vector<16x48xbf16>
    %c0_58 = arith.constant 0 : index
    %c16_59 = arith.constant 16 : index
    %58 = vector.load %arg12[%c0_58, %c16_59] : memref<48x32xbf16, #tpu.memory_space<vmem>>, vector<48x8xbf16>
    %cst_60 = arith.constant dense<0.000000e+00> : vector<16x8xf32>
    %59 = tpu.matmul %57, %58, %cst_60 {dimension_numbers = #tpu.dot_dimension_numbers<[1], [0], [0], [1], [0, 0, 1, 1], [], []>} : vector<16x48xbf16>, vector<48x8xbf16>, vector<16x8xf32> -> vector<16x8xf32>
    %c0_61 = arith.constant 0 : index
    %c2_62 = arith.constant 2 : index
    %c0_63 = arith.constant 0 : index
    %c0_64 = arith.constant 0 : index
    %c0_65 = arith.constant 0 : index
    %60 = vector.load %arg3[%c0_61, %c2_62, %c0_63, %c0_64, %c0_65] : memref<1x4x2x16x1xf32, #tpu.memory_space<vmem>>, vector<1x1x1x16x1xf32>
    %61 = vector.shape_cast %60 : vector<1x1x1x16x1xf32> to vector<16x1xf32>
    %62 = vector.broadcast %61 : vector<16x1xf32> to vector<16x8xf32>
    %63 = arith.addf %59, %62 : vector<16x8xf32>
    %cst_66 = arith.constant 0.000000e+00 : f32
    %64 = vector.broadcast %cst_66 : f32 to vector<16x8xf32>
    %65 = arith.cmpf ogt, %63, %64 : vector<16x8xf32>
    %cst_67 = arith.constant 3.000000e+00 : f32
    %66 = vector.broadcast %cst_67 : f32 to vector<16x8xf32>
    %67 = arith.mulf %66, %63 : vector<16x8xf32>
    %68 = arith.select %65, %63, %67 : vector<16x8xi1>, vector<16x8xf32>
    %c0_68 = arith.constant 0 : index
    %c18 = arith.constant 18 : index
    %69 = vector.load %arg11[%c0_68, %c18] : memref<16x36xf32, #tpu.memory_space<vmem>>, vector<16x8xf32>
    tpu.vector_store %arg11[%c0_68, %c18], %68 {strides = array<i32>} : memref<16x36xf32, #tpu.memory_space<vmem>>, vector<16x8xf32>,
    %c0_69 = arith.constant 0 : index
    %c3_70 = arith.constant 3 : index
    %c0_71 = arith.constant 0 : index
    %c0_72 = arith.constant 0 : index
    %c0_73 = arith.constant 0 : index
    %70 = vector.load %arg2[%c0_69, %c3_70, %c0_71, %c0_72, %c0_73] : memref<1x4x2x16x48xbf16, #tpu.memory_space<vmem>>, vector<1x1x1x16x48xbf16>
    %71 = vector.shape_cast %70 : vector<1x1x1x16x48xbf16> to vector<16x48xbf16>
    %c0_74 = arith.constant 0 : index
    %c24 = arith.constant 24 : index
    %72 = vector.load %arg12[%c0_74, %c24] : memref<48x32xbf16, #tpu.memory_space<vmem>>, vector<48x8xbf16>
    %cst_75 = arith.constant dense<0.000000e+00> : vector<16x8xf32>
    %73 = tpu.matmul %71, %72, %cst_75 {dimension_numbers = #tpu.dot_dimension_numbers<[1], [0], [0], [1], [0, 0, 1, 1], [], []>} : vector<16x48xbf16>, vector<48x8xbf16>, vector<16x8xf32> -> vector<16x8xf32>
    %c0_76 = arith.constant 0 : index
    %c3_77 = arith.constant 3 : index
    %c0_78 = arith.constant 0 : index
    %c0_79 = arith.constant 0 : index
    %c0_80 = arith.constant 0 : index
    %74 = vector.load %arg3[%c0_76, %c3_77, %c0_78, %c0_79, %c0_80] : memref<1x4x2x16x1xf32, #tpu.memory_space<vmem>>, vector<1x1x1x16x1xf32>
    %75 = vector.shape_cast %74 : vector<1x1x1x16x1xf32> to vector<16x1xf32>
    %76 = vector.broadcast %75 : vector<16x1xf32> to vector<16x8xf32>
    %77 = arith.addf %73, %76 : vector<16x8xf32>
    %cst_81 = arith.constant 0.000000e+00 : f32
    %78 = vector.broadcast %cst_81 : f32 to vector<16x8xf32>
    %79 = arith.cmpf ogt, %77, %78 : vector<16x8xf32>
    %cst_82 = arith.constant 3.000000e+00 : f32
    %80 = vector.broadcast %cst_82 : f32 to vector<16x8xf32>
    %81 = arith.mulf %80, %77 : vector<16x8xf32>
    %82 = arith.select %79, %77, %81 : vector<16x8xi1>, vector<16x8xf32>
    %c0_83 = arith.constant 0 : index
    %c26 = arith.constant 26 : index
    %83 = vector.load %arg11[%c0_83, %c26] : memref<16x36xf32, #tpu.memory_space<vmem>>, vector<16x8xf32>
    tpu.vector_store %arg11[%c0_83, %c26], %82 {strides = array<i32>} : memref<16x36xf32, #tpu.memory_space<vmem>>, vector<16x8xf32>,
    %c0_84 = arith.constant 0 : index
    %c0_85 = arith.constant 0 : index
    %c0_86 = arith.constant 0 : index
    %c0_87 = arith.constant 0 : index
    %84 = vector.load %arg6[%c0_84, %c0_85, %c0_86, %c0_87] : memref<2x3x16x16xbf16, #tpu.memory_space<vmem>>, vector<1x1x16x16xbf16>
    %85 = vector.shape_cast %84 : vector<1x1x16x16xbf16> to vector<16x16xbf16>
    %c0_88 = arith.constant 0 : index
    %c1_89 = arith.constant 1 : index
    %86 = vector.load %arg11[%c0_88, %c1_89] : memref<16x36xf32, #tpu.memory_space<vmem>>, vector<16x32xf32>
    %87 = arith.truncf %86 : vector<16x32xf32> to vector<16x32xbf16>
    %cst_90 = arith.constant dense<0.000000e+00> : vector<16x32xf32>
    %88 = tpu.matmul %85, %87, %cst_90 {dimension_numbers = #tpu.dot_dimension_numbers<[1], [0], [0], [1], [0, 0, 1, 1], [], []>} : vector<16x16xbf16>, vector<16x32xbf16>, vector<16x32xf32> -> vector<16x32xf32>
    %c0_91 = arith.constant 0 : index
    %c1_92 = arith.constant 1 : index
    %c0_93 = arith.constant 0 : index
    %c0_94 = arith.constant 0 : index
    %89 = vector.load %arg6[%c0_91, %c1_92, %c0_93, %c0_94] : memref<2x3x16x16xbf16, #tpu.memory_space<vmem>>, vector<1x1x16x16xbf16>
    %90 = vector.shape_cast %89 : vector<1x1x16x16xbf16> to vector<16x16xbf16>
    %c0_95 = arith.constant 0 : index
    %c2_96 = arith.constant 2 : index
    %91 = vector.load %arg11[%c0_95, %c2_96] : memref<16x36xf32, #tpu.memory_space<vmem>>, vector<16x32xf32>
    %92 = arith.truncf %91 : vector<16x32xf32> to vector<16x32xbf16>
    %cst_97 = arith.constant dense<0.000000e+00> : vector<16x32xf32>
    %93 = tpu.matmul %90, %92, %cst_97 {dimension_numbers = #tpu.dot_dimension_numbers<[1], [0], [0], [1], [0, 0, 1, 1], [], []>} : vector<16x16xbf16>, vector<16x32xbf16>, vector<16x32xf32> -> vector<16x32xf32>
    %94 = arith.addf %88, %93 : vector<16x32xf32>
    %c0_98 = arith.constant 0 : index
    %c2_99 = arith.constant 2 : index
    %c0_100 = arith.constant 0 : index
    %c0_101 = arith.constant 0 : index
    %95 = vector.load %arg6[%c0_98, %c2_99, %c0_100, %c0_101] : memref<2x3x16x16xbf16, #tpu.memory_space<vmem>>, vector<1x1x16x16xbf16>
    %96 = vector.shape_cast %95 : vector<1x1x16x16xbf16> to vector<16x16xbf16>
    %c0_102 = arith.constant 0 : index
    %c3_103 = arith.constant 3 : index
    %97 = vector.load %arg11[%c0_102, %c3_103] : memref<16x36xf32, #tpu.memory_space<vmem>>, vector<16x32xf32>
    %98 = arith.truncf %97 : vector<16x32xf32> to vector<16x32xbf16>
    %cst_104 = arith.constant dense<0.000000e+00> : vector<16x32xf32>
    %99 = tpu.matmul %96, %98, %cst_104 {dimension_numbers = #tpu.dot_dimension_numbers<[1], [0], [0], [1], [0, 0, 1, 1], [], []>} : vector<16x16xbf16>, vector<16x32xbf16>, vector<16x32xf32> -> vector<16x32xf32>
    %100 = arith.addf %94, %99 : vector<16x32xf32>
    %c0_105 = arith.constant 0 : index
    %c0_106 = arith.constant 0 : index
    %c0_107 = arith.constant 0 : index
    %101 = vector.load %arg7[%c0_105, %c0_106, %c0_107] : memref<2x16x1xf32, #tpu.memory_space<vmem>>, vector<1x16x1xf32>
    %102 = vector.shape_cast %101 : vector<1x16x1xf32> to vector<16x1xf32>
    %103 = vector.broadcast %102 : vector<16x1xf32> to vector<16x32xf32>
    %104 = arith.addf %100, %103 : vector<16x32xf32>
    %cst_108 = arith.constant 0.000000e+00 : f32
    %105 = vector.broadcast %cst_108 : f32 to vector<16x32xf32>
    %106 = arith.cmpf ogt, %104, %105 : vector<16x32xf32>
    %cst_109 = arith.constant 3.000000e+00 : f32
    %107 = vector.broadcast %cst_109 : f32 to vector<16x32xf32>
    %108 = arith.mulf %107, %104 : vector<16x32xf32>
    %109 = arith.select %106, %104, %108 : vector<16x32xi1>, vector<16x32xf32>
    %c0_110 = arith.constant 0 : index
    %c2_111 = arith.constant 2 : index
    %110 = vector.load %arg11[%c0_110, %c2_111] : memref<16x36xf32, #tpu.memory_space<vmem>>, vector<16x32xf32>
    tpu.vector_store %arg11[%c0_110, %c2_111], %109 {strides = array<i32>} : memref<16x36xf32, #tpu.memory_space<vmem>>, vector<16x32xf32>,
    %c0_112 = arith.constant 0 : index
    %c1_113 = arith.constant 1 : index
    %111 = vector.load %arg11[%c0_112, %c1_113] : memref<16x36xf32, #tpu.memory_space<vmem>>, vector<16x32xf32>
    %112 = arith.truncf %111 : vector<16x32xf32> to vector<16x32xbf16>
    %c0_114 = arith.constant 0 : index
    %c0_115 = arith.constant 0 : index
    %113 = vector.load %arg12[%c0_114, %c0_115] : memref<48x32xbf16, #tpu.memory_space<vmem>>, vector<16x32xbf16>
    tpu.vector_store %arg12[%c0_114, %c0_115], %112 {strides = array<i32>} : memref<48x32xbf16, #tpu.memory_space<vmem>>, vector<16x32xbf16>,
    %c0_116 = arith.constant 0 : index
    %c2_117 = arith.constant 2 : index
    %114 = vector.load %arg11[%c0_116, %c2_117] : memref<16x36xf32, #tpu.memory_space<vmem>>, vector<16x32xf32>
    %115 = arith.truncf %114 : vector<16x32xf32> to vector<16x32xbf16>
    %c16_118 = arith.constant 16 : index
    %c0_119 = arith.constant 0 : index
    %116 = vector.load %arg12[%c16_118, %c0_119] : memref<48x32xbf16, #tpu.memory_space<vmem>>, vector<16x32xbf16>
    tpu.vector_store %arg12[%c16_118, %c0_119], %115 {strides = array<i32>} : memref<48x32xbf16, #tpu.memory_space<vmem>>, vector<16x32xbf16>,
    %c0_120 = arith.constant 0 : index
    %c3_121 = arith.constant 3 : index
    %117 = vector.load %arg11[%c0_120, %c3_121] : memref<16x36xf32, #tpu.memory_space<vmem>>, vector<16x32xf32>
    %118 = arith.truncf %117 : vector<16x32xf32> to vector<16x32xbf16>
    %c32_122 = arith.constant 32 : index
    %c0_123 = arith.constant 0 : index
    %119 = vector.load %arg12[%c32_122, %c0_123] : memref<48x32xbf16, #tpu.memory_space<vmem>>, vector<16x32xbf16>
    tpu.vector_store %arg12[%c32_122, %c0_123], %118 {strides = array<i32>} : memref<48x32xbf16, #tpu.memory_space<vmem>>, vector<16x32xbf16>,
    %c0_124 = arith.constant 0 : index
    %c0_125 = arith.constant 0 : index
    %c1_126 = arith.constant 1 : index
    %c0_127 = arith.constant 0 : index
    %c0_128 = arith.constant 0 : index
    %120 = vector.load %arg2[%c0_124, %c0_125, %c1_126, %c0_127, %c0_128] : memref<1x4x2x16x48xbf16, #tpu.memory_space<vmem>>, vector<1x1x1x16x48xbf16>
    %121 = vector.shape_cast %120 : vector<1x1x1x16x48xbf16> to vector<16x48xbf16>
    %c0_129 = arith.constant 0 : index
    %c0_130 = arith.constant 0 : index
    %122 = vector.load %arg12[%c0_129, %c0_130] : memref<48x32xbf16, #tpu.memory_space<vmem>>, vector<48x8xbf16>
    %cst_131 = arith.constant dense<0.000000e+00> : vector<16x8xf32>
    %123 = tpu.matmul %121, %122, %cst_131 {dimension_numbers = #tpu.dot_dimension_numbers<[1], [0], [0], [1], [0, 0, 1, 1], [], []>} : vector<16x48xbf16>, vector<48x8xbf16>, vector<16x8xf32> -> vector<16x8xf32>
    %c0_132 = arith.constant 0 : index
    %c0_133 = arith.constant 0 : index
    %c1_134 = arith.constant 1 : index
    %c0_135 = arith.constant 0 : index
    %c0_136 = arith.constant 0 : index
    %124 = vector.load %arg3[%c0_132, %c0_133, %c1_134, %c0_135, %c0_136] : memref<1x4x2x16x1xf32, #tpu.memory_space<vmem>>, vector<1x1x1x16x1xf32>
    %125 = vector.shape_cast %124 : vector<1x1x1x16x1xf32> to vector<16x1xf32>
    %126 = vector.broadcast %125 : vector<16x1xf32> to vector<16x8xf32>
    %127 = arith.addf %123, %126 : vector<16x8xf32>
    %cst_137 = arith.constant 0.000000e+00 : f32
    %128 = vector.broadcast %cst_137 : f32 to vector<16x8xf32>
    %129 = arith.cmpf ogt, %127, %128 : vector<16x8xf32>
    %cst_138 = arith.constant 3.000000e+00 : f32
    %130 = vector.broadcast %cst_138 : f32 to vector<16x8xf32>
    %131 = arith.mulf %130, %127 : vector<16x8xf32>
    %132 = arith.select %129, %127, %131 : vector<16x8xi1>, vector<16x8xf32>
    %c0_139 = arith.constant 0 : index
    %c2_140 = arith.constant 2 : index
    %133 = vector.load %arg11[%c0_139, %c2_140] : memref<16x36xf32, #tpu.memory_space<vmem>>, vector<16x8xf32>
    tpu.vector_store %arg11[%c0_139, %c2_140], %132 {strides = array<i32>} : memref<16x36xf32, #tpu.memory_space<vmem>>, vector<16x8xf32>,
    %c0_141 = arith.constant 0 : index
    %c1_142 = arith.constant 1 : index
    %c1_143 = arith.constant 1 : index
    %c0_144 = arith.constant 0 : index
    %c0_145 = arith.constant 0 : index
    %134 = vector.load %arg2[%c0_141, %c1_142, %c1_143, %c0_144, %c0_145] : memref<1x4x2x16x48xbf16, #tpu.memory_space<vmem>>, vector<1x1x1x16x48xbf16>
    %135 = vector.shape_cast %134 : vector<1x1x1x16x48xbf16> to vector<16x48xbf16>
    %c0_146 = arith.constant 0 : index
    %c8_147 = arith.constant 8 : index
    %136 = vector.load %arg12[%c0_146, %c8_147] : memref<48x32xbf16, #tpu.memory_space<vmem>>, vector<48x8xbf16>
    %cst_148 = arith.constant dense<0.000000e+00> : vector<16x8xf32>
    %137 = tpu.matmul %135, %136, %cst_148 {dimension_numbers = #tpu.dot_dimension_numbers<[1], [0], [0], [1], [0, 0, 1, 1], [], []>} : vector<16x48xbf16>, vector<48x8xbf16>, vector<16x8xf32> -> vector<16x8xf32>
    %c0_149 = arith.constant 0 : index
    %c1_150 = arith.constant 1 : index
    %c1_151 = arith.constant 1 : index
    %c0_152 = arith.constant 0 : index
    %c0_153 = arith.constant 0 : index
    %138 = vector.load %arg3[%c0_149, %c1_150, %c1_151, %c0_152, %c0_153] : memref<1x4x2x16x1xf32, #tpu.memory_space<vmem>>, vector<1x1x1x16x1xf32>
    %139 = vector.shape_cast %138 : vector<1x1x1x16x1xf32> to vector<16x1xf32>
    %140 = vector.broadcast %139 : vector<16x1xf32> to vector<16x8xf32>
    %141 = arith.addf %137, %140 : vector<16x8xf32>
    %cst_154 = arith.constant 0.000000e+00 : f32
    %142 = vector.broadcast %cst_154 : f32 to vector<16x8xf32>
    %143 = arith.cmpf ogt, %141, %142 : vector<16x8xf32>
    %cst_155 = arith.constant 3.000000e+00 : f32
    %144 = vector.broadcast %cst_155 : f32 to vector<16x8xf32>
    %145 = arith.mulf %144, %141 : vector<16x8xf32>
    %146 = arith.select %143, %141, %145 : vector<16x8xi1>, vector<16x8xf32>
    %c0_156 = arith.constant 0 : index
    %c10_157 = arith.constant 10 : index
    %147 = vector.load %arg11[%c0_156, %c10_157] : memref<16x36xf32, #tpu.memory_space<vmem>>, vector<16x8xf32>
    tpu.vector_store %arg11[%c0_156, %c10_157], %146 {strides = array<i32>} : memref<16x36xf32, #tpu.memory_space<vmem>>, vector<16x8xf32>,
    %c0_158 = arith.constant 0 : index
    %c2_159 = arith.constant 2 : index
    %c1_160 = arith.constant 1 : index
    %c0_161 = arith.constant 0 : index
    %c0_162 = arith.constant 0 : index
    %148 = vector.load %arg2[%c0_158, %c2_159, %c1_160, %c0_161, %c0_162] : memref<1x4x2x16x48xbf16, #tpu.memory_space<vmem>>, vector<1x1x1x16x48xbf16>
    %149 = vector.shape_cast %148 : vector<1x1x1x16x48xbf16> to vector<16x48xbf16>
    %c0_163 = arith.constant 0 : index
    %c16_164 = arith.constant 16 : index
    %150 = vector.load %arg12[%c0_163, %c16_164] : memref<48x32xbf16, #tpu.memory_space<vmem>>, vector<48x8xbf16>
    %cst_165 = arith.constant dense<0.000000e+00> : vector<16x8xf32>
    %151 = tpu.matmul %149, %150, %cst_165 {dimension_numbers = #tpu.dot_dimension_numbers<[1], [0], [0], [1], [0, 0, 1, 1], [], []>} : vector<16x48xbf16>, vector<48x8xbf16>, vector<16x8xf32> -> vector<16x8xf32>
    %c0_166 = arith.constant 0 : index
    %c2_167 = arith.constant 2 : index
    %c1_168 = arith.constant 1 : index
    %c0_169 = arith.constant 0 : index
    %c0_170 = arith.constant 0 : index
    %152 = vector.load %arg3[%c0_166, %c2_167, %c1_168, %c0_169, %c0_170] : memref<1x4x2x16x1xf32, #tpu.memory_space<vmem>>, vector<1x1x1x16x1xf32>
    %153 = vector.shape_cast %152 : vector<1x1x1x16x1xf32> to vector<16x1xf32>
    %154 = vector.broadcast %153 : vector<16x1xf32> to vector<16x8xf32>
    %155 = arith.addf %151, %154 : vector<16x8xf32>
    %cst_171 = arith.constant 0.000000e+00 : f32
    %156 = vector.broadcast %cst_171 : f32 to vector<16x8xf32>
    %157 = arith.cmpf ogt, %155, %156 : vector<16x8xf32>
    %cst_172 = arith.constant 3.000000e+00 : f32
    %158 = vector.broadcast %cst_172 : f32 to vector<16x8xf32>
    %159 = arith.mulf %158, %155 : vector<16x8xf32>
    %160 = arith.select %157, %155, %159 : vector<16x8xi1>, vector<16x8xf32>
    %c0_173 = arith.constant 0 : index
    %c18_174 = arith.constant 18 : index
    %161 = vector.load %arg11[%c0_173, %c18_174] : memref<16x36xf32, #tpu.memory_space<vmem>>, vector<16x8xf32>
    tpu.vector_store %arg11[%c0_173, %c18_174], %160 {strides = array<i32>} : memref<16x36xf32, #tpu.memory_space<vmem>>, vector<16x8xf32>,
    %c0_175 = arith.constant 0 : index
    %c3_176 = arith.constant 3 : index
    %c1_177 = arith.constant 1 : index
    %c0_178 = arith.constant 0 : index
    %c0_179 = arith.constant 0 : index
    %162 = vector.load %arg2[%c0_175, %c3_176, %c1_177, %c0_178, %c0_179] : memref<1x4x2x16x48xbf16, #tpu.memory_space<vmem>>, vector<1x1x1x16x48xbf16>
    %163 = vector.shape_cast %162 : vector<1x1x1x16x48xbf16> to vector<16x48xbf16>
    %c0_180 = arith.constant 0 : index
    %c24_181 = arith.constant 24 : index
    %164 = vector.load %arg12[%c0_180, %c24_181] : memref<48x32xbf16, #tpu.memory_space<vmem>>, vector<48x8xbf16>
    %cst_182 = arith.constant dense<0.000000e+00> : vector<16x8xf32>
    %165 = tpu.matmul %163, %164, %cst_182 {dimension_numbers = #tpu.dot_dimension_numbers<[1], [0], [0], [1], [0, 0, 1, 1], [], []>} : vector<16x48xbf16>, vector<48x8xbf16>, vector<16x8xf32> -> vector<16x8xf32>
    %c0_183 = arith.constant 0 : index
    %c3_184 = arith.constant 3 : index
    %c1_185 = arith.constant 1 : index
    %c0_186 = arith.constant 0 : index
    %c0_187 = arith.constant 0 : index
    %166 = vector.load %arg3[%c0_183, %c3_184, %c1_185, %c0_186, %c0_187] : memref<1x4x2x16x1xf32, #tpu.memory_space<vmem>>, vector<1x1x1x16x1xf32>
    %167 = vector.shape_cast %166 : vector<1x1x1x16x1xf32> to vector<16x1xf32>
    %168 = vector.broadcast %167 : vector<16x1xf32> to vector<16x8xf32>
    %169 = arith.addf %165, %168 : vector<16x8xf32>
    %cst_188 = arith.constant 0.000000e+00 : f32
    %170 = vector.broadcast %cst_188 : f32 to vector<16x8xf32>
    %171 = arith.cmpf ogt, %169, %170 : vector<16x8xf32>
    %cst_189 = arith.constant 3.000000e+00 : f32
    %172 = vector.broadcast %cst_189 : f32 to vector<16x8xf32>
    %173 = arith.mulf %172, %169 : vector<16x8xf32>
    %174 = arith.select %171, %169, %173 : vector<16x8xi1>, vector<16x8xf32>
    %c0_190 = arith.constant 0 : index
    %c26_191 = arith.constant 26 : index
    %175 = vector.load %arg11[%c0_190, %c26_191] : memref<16x36xf32, #tpu.memory_space<vmem>>, vector<16x8xf32>
    tpu.vector_store %arg11[%c0_190, %c26_191], %174 {strides = array<i32>} : memref<16x36xf32, #tpu.memory_space<vmem>>, vector<16x8xf32>,
    %c1_192 = arith.constant 1 : index
    %c0_193 = arith.constant 0 : index
    %c0_194 = arith.constant 0 : index
    %c0_195 = arith.constant 0 : index
    %176 = vector.load %arg6[%c1_192, %c0_193, %c0_194, %c0_195] : memref<2x3x16x16xbf16, #tpu.memory_space<vmem>>, vector<1x1x16x16xbf16>
    %177 = vector.shape_cast %176 : vector<1x1x16x16xbf16> to vector<16x16xbf16>
    %c0_196 = arith.constant 0 : index
    %c0_197 = arith.constant 0 : index
    %178 = vector.load %arg11[%c0_196, %c0_197] : memref<16x36xf32, #tpu.memory_space<vmem>>, vector<16x32xf32>
    %179 = arith.truncf %178 : vector<16x32xf32> to vector<16x32xbf16>
    %cst_198 = arith.constant dense<0.000000e+00> : vector<16x32xf32>
    %180 = tpu.matmul %177, %179, %cst_198 {dimension_numbers = #tpu.dot_dimension_numbers<[1], [0], [0], [1], [0, 0, 1, 1], [], []>} : vector<16x16xbf16>, vector<16x32xbf16>, vector<16x32xf32> -> vector<16x32xf32>
    %c1_199 = arith.constant 1 : index
    %c1_200 = arith.constant 1 : index
    %c0_201 = arith.constant 0 : index
    %c0_202 = arith.constant 0 : index
    %181 = vector.load %arg6[%c1_199, %c1_200, %c0_201, %c0_202] : memref<2x3x16x16xbf16, #tpu.memory_space<vmem>>, vector<1x1x16x16xbf16>
    %182 = vector.shape_cast %181 : vector<1x1x16x16xbf16> to vector<16x16xbf16>
    %c0_203 = arith.constant 0 : index
    %c2_204 = arith.constant 2 : index
    %183 = vector.load %arg11[%c0_203, %c2_204] : memref<16x36xf32, #tpu.memory_space<vmem>>, vector<16x32xf32>
    %184 = arith.truncf %183 : vector<16x32xf32> to vector<16x32xbf16>
    %cst_205 = arith.constant dense<0.000000e+00> : vector<16x32xf32>
    %185 = tpu.matmul %182, %184, %cst_205 {dimension_numbers = #tpu.dot_dimension_numbers<[1], [0], [0], [1], [0, 0, 1, 1], [], []>} : vector<16x16xbf16>, vector<16x32xbf16>, vector<16x32xf32> -> vector<16x32xf32>
    %186 = arith.addf %180, %185 : vector<16x32xf32>
    %c1_206 = arith.constant 1 : index
    %c2_207 = arith.constant 2 : index
    %c0_208 = arith.constant 0 : index
    %c0_209 = arith.constant 0 : index
    %187 = vector.load %arg6[%c1_206, %c2_207, %c0_208, %c0_209] : memref<2x3x16x16xbf16, #tpu.memory_space<vmem>>, vector<1x1x16x16xbf16>
    %188 = vector.shape_cast %187 : vector<1x1x16x16xbf16> to vector<16x16xbf16>
    %c0_210 = arith.constant 0 : index
    %c4 = arith.constant 4 : index
    %189 = vector.load %arg11[%c0_210, %c4] : memref<16x36xf32, #tpu.memory_space<vmem>>, vector<16x32xf32>
    %190 = arith.truncf %189 : vector<16x32xf32> to vector<16x32xbf16>
    %cst_211 = arith.constant dense<0.000000e+00> : vector<16x32xf32>
    %191 = tpu.matmul %188, %190, %cst_211 {dimension_numbers = #tpu.dot_dimension_numbers<[1], [0], [0], [1], [0, 0, 1, 1], [], []>} : vector<16x16xbf16>, vector<16x32xbf16>, vector<16x32xf32> -> vector<16x32xf32>
    %192 = arith.addf %186, %191 : vector<16x32xf32>
    %c1_212 = arith.constant 1 : index
    %c0_213 = arith.constant 0 : index
    %c0_214 = arith.constant 0 : index
    %193 = vector.load %arg7[%c1_212, %c0_213, %c0_214] : memref<2x16x1xf32, #tpu.memory_space<vmem>>, vector<1x16x1xf32>
    %194 = vector.shape_cast %193 : vector<1x16x1xf32> to vector<16x1xf32>
    %195 = vector.broadcast %194 : vector<16x1xf32> to vector<16x32xf32>
    %196 = arith.addf %192, %195 : vector<16x32xf32>
    %cst_215 = arith.constant 0.000000e+00 : f32
    %197 = vector.broadcast %cst_215 : f32 to vector<16x32xf32>
    %198 = arith.cmpf ogt, %196, %197 : vector<16x32xf32>
    %cst_216 = arith.constant 3.000000e+00 : f32
    %199 = vector.broadcast %cst_216 : f32 to vector<16x32xf32>
    %200 = arith.mulf %199, %196 : vector<16x32xf32>
    %201 = arith.select %198, %196, %200 : vector<16x32xi1>, vector<16x32xf32>
    %c0_217 = arith.constant 0 : index
    %c0_218 = arith.constant 0 : index
    %202 = vector.load %arg8[%c0_217, %c0_218] : memref<16x1xf32, #tpu.memory_space<vmem>>, vector<16x1xf32>
    %203 = vector.broadcast %202 : vector<16x1xf32> to vector<16x32xf32>
    %204 = arith.mulf %203, %201 : vector<16x32xf32>
    %cst_219 = arith.constant dense<0.000000e+00> : vector<32xf32>
    %205 = vector.multi_reduction <add>, %204, %cst_219 [0] : vector<16x32xf32> to vector<32xf32>
    %206 = vector.shape_cast %205 : vector<32xf32> to vector<1x32xf32>
    %c0_220 = arith.constant 0 : index
    %c0_221 = arith.constant 0 : index
    %207 = vector.load %arg9[%c0_220, %c0_221] : memref<1x1xf32, #tpu.memory_space<vmem>>, vector<1x1xf32>
    %208 = vector.broadcast %207 : vector<1x1xf32> to vector<1x32xf32>
    %209 = arith.addf %206, %208 : vector<1x32xf32>
    %c0_222 = arith.constant 0 : index
    %c0_223 = arith.constant 0 : index
    %c0_224 = arith.constant 0 : index
    %210 = vector.load %arg10[%c0_222, %c0_223, %c0_224] : memref<1x1x32xf32, #tpu.memory_space<vmem>>, vector<1x1x32xf32>
    %211 = vector.shape_cast %210 : vector<1x1x32xf32> to vector<1x32xf32>
    %212 = vector.shape_cast %209 : vector<1x32xf32> to vector<1x1x32xf32>
    tpu.vector_store %arg10[%c0_222, %c0_223, %c0_224], %212 {strides = array<i32>} : memref<1x1x32xf32, #tpu.memory_space<vmem>>, vector<1x1x32xf32>,
    return
  }
  func.func @transform_0(%arg0: i32) -> (i32, i32, i32) {
    %c0_i32 = arith.constant 0 : i32
    %c0_i32_0 = arith.constant 0 : i32
    %c0_i32_1 = arith.constant 0 : i32
    return %arg0, %c0_i32, %c0_i32_0 : i32, i32, i32
  }
  func.func @transform_1(%arg0: i32) -> (i32, i32, i32, i32, i32) {
    %c0_i32 = arith.constant 0 : i32
    %c0_i32_0 = arith.constant 0 : i32
    %c0_i32_1 = arith.constant 0 : i32
    %c0_i32_2 = arith.constant 0 : i32
    %c0_i32_3 = arith.constant 0 : i32
    return %arg0, %c0_i32, %c0_i32_0, %c0_i32_1, %c0_i32_2 : i32, i32, i32, i32, i32
  }
  func.func @transform_2(%arg0: i32) -> (i32, i32, i32, i32, i32) {
    %c0_i32 = arith.constant 0 : i32
    %c0_i32_0 = arith.constant 0 : i32
    %c0_i32_1 = arith.constant 0 : i32
    %c0_i32_2 = arith.constant 0 : i32
    %c0_i32_3 = arith.constant 0 : i32
    return %arg0, %c0_i32, %c0_i32_0, %c0_i32_1, %c0_i32_2 : i32, i32, i32, i32, i32
  }
  func.func @transform_3(%arg0: i32) -> (i32, i32) {
    %c0_i32 = arith.constant 0 : i32
    %c0_i32_0 = arith.constant 0 : i32
    %c0_i32_1 = arith.constant 0 : i32
    return %c0_i32, %c0_i32_0 : i32, i32
  }
  func.func @transform_4(%arg0: i32) -> (i32, i32) {
    %c0_i32 = arith.constant 0 : i32
    %c0_i32_0 = arith.constant 0 : i32
    %c0_i32_1 = arith.constant 0 : i32
    return %c0_i32, %c0_i32_0 : i32, i32
  }
  func.func @transform_5(%arg0: i32) -> (i32, i32, i32, i32) {
    %c0_i32 = arith.constant 0 : i32
    %c0_i32_0 = arith.constant 0 : i32
    %c0_i32_1 = arith.constant 0 : i32
    %c0_i32_2 = arith.constant 0 : i32
    %c0_i32_3 = arith.constant 0 : i32
    return %c0_i32, %c0_i32_0, %c0_i32_1, %c0_i32_2 : i32, i32, i32, i32
  }
  func.func @transform_6(%arg0: i32) -> (i32, i32, i32) {
    %c0_i32 = arith.constant 0 : i32
    %c0_i32_0 = arith.constant 0 : i32
    %c0_i32_1 = arith.constant 0 : i32
    %c0_i32_2 = arith.constant 0 : i32
    return %c0_i32, %c0_i32_0, %c0_i32_1 : i32, i32, i32
  }
  func.func @transform_7(%arg0: i32) -> (i32, i32) {
    %c0_i32 = arith.constant 0 : i32
    %c0_i32_0 = arith.constant 0 : i32
    %c0_i32_1 = arith.constant 0 : i32
    return %c0_i32, %c0_i32_0 : i32, i32
  }
  func.func @transform_8(%arg0: i32) -> (i32, i32) {
    %c0_i32 = arith.constant 0 : i32
    %c0_i32_0 = arith.constant 0 : i32
    %c0_i32_1 = arith.constant 0 : i32
    return %c0_i32, %c0_i32_0 : i32, i32
  }
  func.func @transform_9(%arg0: i32) -> (i32, i32, i32) {
    %c0_i32 = arith.constant 0 : i32
    %c0_i32_0 = arith.constant 0 : i32
    %c0_i32_1 = arith.constant 0 : i32
    return %arg0, %c0_i32, %c0_i32_0 : i32, i32, i32
  }
}

module attributes {stable_mosaic.version = 11 : i64} {
  func.func @_kp_kernel(%arg0: i32, %arg1: memref<8x8xbf16, #tpu.memory_space<vmem>>, %arg2: memref<8x1536xbf16, #tpu.memory_space<vmem>>, %arg3: memref<1x1536xf32, #tpu.memory_space<vmem>>, %arg4: memref<8x32xbf16, #tpu.memory_space<vmem>>, %arg5: memref<1x32xf32, #tpu.memory_space<vmem>>, %arg6: memref<8x1536xbf16, #tpu.memory_space<vmem>>, %arg7: memref<8x32xf32, #tpu.memory_space<vmem>>) attributes {dimension_semantics = [#tpu.dimension_semantics<parallel>], iteration_bounds = array<i64: 1>, scalar_prefetch = 0 : i64, scratch_operands = 0 : i64, tpu.core_type = #tpu.core_type<tc>, window_params = [{transform_indices = @transform_0, window_bounds = array<i64: 8, 8>}, {pipeline_mode = #tpu.pipeline_mode<synchronous>, transform_indices = @transform_1, window_bounds = array<i64: 8, 1536>}, {pipeline_mode = #tpu.pipeline_mode<synchronous>, transform_indices = @transform_2, window_bounds = array<i64: 1, 1536>}, {pipeline_mode = #tpu.pipeline_mode<synchronous>, transform_indices = @transform_3, window_bounds = array<i64: 8, 32>}, {pipeline_mode = #tpu.pipeline_mode<synchronous>, transform_indices = @transform_4, window_bounds = array<i64: 1, 32>}, {transform_indices = @transform_5, window_bounds = array<i64: 8, 1536>}, {transform_indices = @transform_6, window_bounds = array<i64: 8, 32>}]} {
    %c0 = arith.constant 0 : index
    %c0_0 = arith.constant 0 : index
    %0 = vector.load %arg1[%c0, %c0_0] : memref<8x8xbf16, #tpu.memory_space<vmem>>, vector<8x8xbf16>
    %c0_1 = arith.constant 0 : index
    %c0_2 = arith.constant 0 : index
    %1 = vector.load %arg2[%c0_1, %c0_2] : memref<8x1536xbf16, #tpu.memory_space<vmem>>, vector<8x1536xbf16>
    %cst = arith.constant dense<0.000000e+00> : vector<8x1536xf32>
    %2 = tpu.matmul %0, %1, %cst {dimension_numbers = #tpu.dot_dimension_numbers<[1], [0], [0], [1], [0, 0, 1, 1], [], []>} : vector<8x8xbf16>, vector<8x1536xbf16>, vector<8x1536xf32> -> vector<8x1536xf32>
    %c0_3 = arith.constant 0 : index
    %c0_4 = arith.constant 0 : index
    %3 = vector.load %arg3[%c0_3, %c0_4] : memref<1x1536xf32, #tpu.memory_space<vmem>>, vector<1x1536xf32>
    %4 = vector.broadcast %3 : vector<1x1536xf32> to vector<8x1536xf32>
    %5 = arith.addf %2, %4 : vector<8x1536xf32>
    %6 = arith.truncf %5 : vector<8x1536xf32> to vector<8x1536xbf16>
    %c0_5 = arith.constant 0 : index
    %c0_6 = arith.constant 0 : index
    %7 = vector.load %arg6[%c0_5, %c0_6] : memref<8x1536xbf16, #tpu.memory_space<vmem>>, vector<8x1536xbf16>
    tpu.vector_store %arg6[%c0_5, %c0_6], %6 {strides = array<i32>} : memref<8x1536xbf16, #tpu.memory_space<vmem>>, vector<8x1536xbf16>,
    %c0_7 = arith.constant 0 : index
    %c0_8 = arith.constant 0 : index
    %8 = vector.load %arg4[%c0_7, %c0_8] : memref<8x32xbf16, #tpu.memory_space<vmem>>, vector<8x32xbf16>
    %cst_9 = arith.constant dense<0.000000e+00> : vector<8x32xf32>
    %9 = tpu.matmul %0, %8, %cst_9 {dimension_numbers = #tpu.dot_dimension_numbers<[1], [0], [0], [1], [0, 0, 1, 1], [], []>} : vector<8x8xbf16>, vector<8x32xbf16>, vector<8x32xf32> -> vector<8x32xf32>
    %c0_10 = arith.constant 0 : index
    %c0_11 = arith.constant 0 : index
    %10 = vector.load %arg5[%c0_10, %c0_11] : memref<1x32xf32, #tpu.memory_space<vmem>>, vector<1x32xf32>
    %11 = vector.broadcast %10 : vector<1x32xf32> to vector<8x32xf32>
    %12 = arith.addf %9, %11 : vector<8x32xf32>
    %c0_12 = arith.constant 0 : index
    %c0_13 = arith.constant 0 : index
    %13 = vector.load %arg7[%c0_12, %c0_13] : memref<8x32xf32, #tpu.memory_space<vmem>>, vector<8x32xf32>
    tpu.vector_store %arg7[%c0_12, %c0_13], %12 {strides = array<i32>} : memref<8x32xf32, #tpu.memory_space<vmem>>, vector<8x32xf32>,
    return
  }
  func.func @transform_0(%arg0: i32) -> (i32, i32) {
    %c0_i32 = arith.constant 0 : i32
    %c0_i32_0 = arith.constant 0 : i32
    return %arg0, %c0_i32 : i32, i32
  }
  func.func @transform_1(%arg0: i32) -> (i32, i32) {
    %c0_i32 = arith.constant 0 : i32
    %c0_i32_0 = arith.constant 0 : i32
    %c0_i32_1 = arith.constant 0 : i32
    return %c0_i32, %c0_i32_0 : i32, i32
  }
  func.func @transform_2(%arg0: i32) -> (i32, i32) {
    %c0_i32 = arith.constant 0 : i32
    %c0_i32_0 = arith.constant 0 : i32
    %c0_i32_1 = arith.constant 0 : i32
    return %c0_i32, %c0_i32_0 : i32, i32
  }
  func.func @transform_3(%arg0: i32) -> (i32, i32) {
    %c0_i32 = arith.constant 0 : i32
    %c0_i32_0 = arith.constant 0 : i32
    %c0_i32_1 = arith.constant 0 : i32
    return %c0_i32, %c0_i32_0 : i32, i32
  }
  func.func @transform_4(%arg0: i32) -> (i32, i32) {
    %c0_i32 = arith.constant 0 : i32
    %c0_i32_0 = arith.constant 0 : i32
    %c0_i32_1 = arith.constant 0 : i32
    return %c0_i32, %c0_i32_0 : i32, i32
  }
  func.func @transform_5(%arg0: i32) -> (i32, i32) {
    %c0_i32 = arith.constant 0 : i32
    %c0_i32_0 = arith.constant 0 : i32
    return %arg0, %c0_i32 : i32, i32
  }
  func.func @transform_6(%arg0: i32) -> (i32, i32) {
    %c0_i32 = arith.constant 0 : i32
    %c0_i32_0 = arith.constant 0 : i32
    return %arg0, %c0_i32 : i32, i32
  }
}

</mosaic_0001>

<bundles_post_ra>
// kernel: discriminator_forward.6
= control target key start
LH: loop header
LB: loop body
LE: loop exit
PB: predicated region body
PF: predicated region fallthrough
CT: control target
= control target key end

     0   :  { %12 = vsyncpa [#allocation3], 0  ;;  %s607_s0 = inlined_call_operand.vmem [shape: bf16[8,8], index: 0, kind: input, shape index: {}]   ;;  %s608_s1 = inlined_call_operand.hbm [shape: bf16[8,1536], index: 1, kind: input, shape index: {}]   ;;  %s609_s2 = inlined_call_operand.hbm [shape: f32[1,1536], index: 2, kind: input, shape index: {}]   ;;  %s610_s3 = inlined_call_operand.hbm [shape: bf16[8,32], index: 3, kind: input, shape index: {}]   ;;  %s611_s4 = inlined_call_operand.hbm [shape: f32[1,32], index: 4, kind: input, shape index: {}]   ;;  %s612_s5 = inlined_call_operand.vmem [shape: bf16[8,1536], index: 5, kind: output, shape index: {0}]   ;;  %s613_s6 = inlined_call_operand.vmem [shape: f32[8,32], index: 6, kind: output, shape index: {1}]  }
   0x1   :  { %13 = vsyncpa [#allocation5], 0  ;;  %s33_s23 = sshll.u32 %s609_s2, 4  ;;  %s34_s23 = int_to_ptr.hbm [resolvable:$true] %s33_s23 }
   0x2   :  { %14 = vsyncpa [#allocation8], 0  ;;  %s506_s24 = smov [#allocation4]   ;;  %s22_s28 = sshll.u32 %s608_s1, 4  ;;  %s23_s28 = int_to_ptr.hbm [resolvable:$true] %s22_s28 }
   0x3   :  { %s35_s25 = sshll.u32 %s506_s24, 4  ;;  %s507_s29 = smov [#allocation2]   ;;  %s36_s25 = int_to_ptr.vmem [resolvable:$true] %s35_s25 }
   0x4   :  { %38 = dma.hbm_to_vmem [thread:$0]  %s34_s23, 192, %s36_s25, [#allocation5]  }
   0x5   :  { %s24_s30 = sshll.u32 %s507_s29, 4  ;;  %s44_s9 = sshll.u32 %s610_s3, 4  ;;  %s25_s30 = int_to_ptr.vmem [resolvable:$true] %s24_s30  ;;  %s45_s9 = int_to_ptr.hbm [resolvable:$true] %s44_s9 }
   0x6   :  { %27 = dma.hbm_to_vmem [thread:$0]  %s23_s28, 768, %s25_s30, [#allocation3]  }
   0x7   :  { %s55_s11 = sshll.u32 %s611_s4, 4  ;;  %s508_s12 = smov [#allocation6]   ;;  %s56_s11 = int_to_ptr.hbm [resolvable:$true] %s55_s11 }
   0x8   :  { %s46_s13 = sshll.u32 %s508_s12, 4  ;;  %s509_s1 = smov [#allocation7]   ;;  %s47_s13 = int_to_ptr.vmem [resolvable:$true] %s46_s13 }
   0x9   :  { %49 = dma.hbm_to_vmem [thread:$0]  %s45_s9, 64, %s47_s13, [#allocation5]  }
   0xa   :  { %s57_s14 = sshll.u32 %s509_s1, 4  ;;  %s58_s14 = int_to_ptr.vmem [resolvable:$true] %s57_s14 }
   0xb   :  { %60 = dma.hbm_to_vmem [thread:$0]  %s56_s11, 16, %s58_s14, [#allocation8]  }
   0xc   :  { %500 = dma.done.wait [#allocation3], 768  }
   0xd   :  { %501 = vsyncadd [#allocation3], 4294966528 }
   0xe   :  { %502 = dma.done.wait [#allocation5], 256  }
   0xf   :  { %503 = vsyncadd [#allocation5], 4294967040 }
  0x10   :  { %504 = dma.done.wait [#allocation8], 16  }
  0x11   :  { %505 = vsyncadd [#allocation8], 4294967280  ;;  %v79_v0 = vld [vmem:[#allocation2] sm:$0xff]  ;;  %vm147_vm0 = vcmask 1043456   ;;  %v80_v1 = vld [vmem:[#allocation2 + $0x8] sm:$0xff]  ;;  %vm143_vm1 = vcmask 64512  }
  0x12   :  { %v119_v2 = vunpack.c.l.b16 %v79_v0  ;;  %v120_v3 = vunpack.c.h.b16 %v79_v0  ;;  %v121_v4 = vunpack.c.l.b16 %v80_v1  ;;  %v122_v5 = vunpack.c.h.b16 %v80_v1  ;;  %v81_v6 = vld [vmem:[#allocation2 + $0x10] sm:$0xff]  ;;  %v82_v7 = vld [vmem:[#allocation2 + $0x18] sm:$0xff]  ;;  %v83_v20 = vld [vmem:[#allocation2 + $0x20] sm:$0xff] }
  0x13   :  { %v123_v8 = vunpack.c.l.b16 %v81_v6  ;;  %v125_v9 = vunpack.c.l.b16 %v82_v7  ;;  %v126_v10 = vunpack.c.h.b16 %v82_v7  ;;  %v124_v11 = vunpack.c.h.b16 %v81_v6  ;;  %v84_v21 = vld [vmem:[#allocation2 + $0x28] sm:$0xff]  ;;  %v78_v26 = vld [vmem:[%s607_s0] sm:$0xf]  ;;  %v352_v43 = vld [vmem:[#allocation6] sm:$0xf] }
  0x14   :  { %v131_v12 = vpack.c.b16 %v119_v2, %v119_v2  ;;  %v132_v13 = vpack.c.b16 %v120_v3, %v120_v3  ;;  %v133_v14 = vpack.c.b16 %v121_v4, %v121_v4  ;;  %v134_v15 = vpack.c.b16 %v122_v5, %v122_v5  ;;  %v85_v45 = vld [vmem:[#allocation4] sm:$0xff] }
  0x15   :  { %v135_v16 = vpack.c.b16 %v123_v8, %v123_v8  ;;  %v137_v17 = vpack.c.b16 %v125_v9, %v125_v9  ;;  %v138_v18 = vpack.c.b16 %v126_v10, %v126_v10  ;;  %v136_v19 = vpack.c.b16 %v124_v11, %v124_v11 }
  0x16   :  { %v149_v22 = vsel %vm147_vm0, %v131_v12, 0  ;;  %v152_v23 = vsel %vm147_vm0, %v132_v13, 0  ;;  %v155_v24 = vsel %vm147_vm0, %v133_v14, 0  ;;  %v158_v25 = vsel %vm147_vm0, %v134_v15, 0 }
  0x17   :  { %191 = vmatpush.bf16.msra.mxu0 %v149_v22  ;;  %204 = vmatpush.bf16.msra.mxu1 %v152_v23  ;;  %v161_v27 = vsel %vm147_vm0, %v135_v16, 0  ;;  %v167_v28 = vsel %vm147_vm0, %v137_v17, 0  ;;  %v127_v29 = vunpack.c.l.b16 %v83_v20  ;;  %v129_v30 = vunpack.c.l.b16 %v84_v21  ;;  %v86_v16 = vld [vmem:[#allocation4 + $0x8] sm:$0xf] }
  0x18   :  { %217 = vmatpush.bf16.msra.mxu2 %v155_v24  ;;  %230 = vmatpush.bf16.msra.mxu3 %v158_v25  ;;  %v130_v31 = vunpack.c.h.b16 %v84_v21  ;;  %v128_v32 = vunpack.c.h.b16 %v83_v20  ;;  %v170_v33 = vsel %vm147_vm0, %v138_v18, 0  ;;  %v164_v34 = vsel %vm147_vm0, %v136_v19, 0 }
  0x19   :  { %v139_v35 = vpack.c.b16 %v127_v29, %v127_v29  ;;  %v141_v36 = vpack.c.b16 %v129_v30, %v129_v30  ;;  %v358_v44 = vsel %vm147_vm0, %v352_v43, 0  ;;  %v89_v46 = vperm.slane %v85_v45, 0 }
  0x1a   :  { %386 = vmatmul.msk.bf16.vlgmr.msra.gmra.mxu0 %vm143_vm1, %v78_v26  ;;  %387 = vmatmul.msk.bf16.vlgmr.msra.gmra.mxu1 %vm143_vm1, %v78_v26  ;;  %v142_v37 = vpack.c.b16 %v130_v31, %v130_v31  ;;  %v140_v38 = vpack.c.b16 %v128_v32, %v128_v32  ;;  %v90_v47 = vperm.slane %v85_v45, 1  ;;  %v91_v53 = vperm.slane %v85_v45, 2 }
  0x1b   :  { %243 = vmatpush.bf16.msrb.mxu0 %v161_v27  ;;  %388 = vmatmul.msk.bf16.vlgmr.msra.gmra.mxu2 %vm143_vm1, %v78_v26  ;;  %v173_v39 = vsel %vm147_vm0, %v139_v35, 0  ;;  %v179_v40 = vsel %vm147_vm0, %v141_v36, 0  ;;  %v92_v54 = vperm.slane %v85_v45, 3  ;;  %v93_v62 = vperm.slane %v85_v45, 4  ;;  %v403_v35 = vld [vmem:[#allocation7] ss:$0 sm:$0xff] }
  0x1c   :  { %269 = vmatpush.bf16.msrb.mxu2 %v167_v28  ;;  %389 = vmatmul.msk.bf16.vlgmr.msra.gmra.mxu3 %vm143_vm1, %v78_v26  ;;  %v182_v41 = vsel %vm147_vm0, %v142_v37, 0  ;;  %v176_v42 = vsel %vm147_vm0, %v140_v38, 0  ;;  %v94_v63 = vperm.slane %v85_v45, 5  ;;  %v95_v7 = vperm.slane %v85_v45, 6 }
  0x1d   :  { %282 = vmatpush.bf16.msrb.mxu3 %v170_v33  ;;  %256 = vmatpush.bf16.msrb.mxu1 %v164_v34  ;;  %v96_v8 = vperm.slane %v85_v45, 7  ;;  %v97_v17 = vperm.slane %v86_v16, 0  ;;  %v98_v18 = vperm.slane %v86_v16, 1  ;;  %v100_v27 = vperm.slane %v86_v16, 3 }
  0x1e   :  { %vm373_vm2 = vcmask 261120  }
  0x1f   :  { %295 = vmatpush.bf16.msra.mxu0 %v173_v39 }
  0x20   :  { %321 = vmatpush.bf16.msra.mxu2 %v179_v40 }
  0x21   :  { %334 = vmatpush.bf16.msra.mxu3 %v182_v41  ;;  %308 = vmatpush.bf16.msra.mxu1 %v176_v42 }
  0x2a   :  { %390 = vmatmul.msk.bf16.vlgmr.msrb.gmra.mxu0 %vm143_vm1, %v78_v26  ;;  %391 = vmatmul.msk.bf16.vlgmr.msrb.gmra.mxu1 %vm143_vm1, %v78_v26 }
  0x2b   :  { %392 = vmatmul.msk.bf16.vlgmr.msrb.gmra.mxu2 %vm143_vm1, %v78_v26  ;;  %367 = vmatpush.bf16.msrb.mxu0 %v358_v44 }
  0x2c   :  { %393 = vmatmul.msk.bf16.vlgmr.msrb.gmra.mxu3 %vm143_vm1, %v78_v26 }
  0x3a   :  { %394 = vmatmul.msk.bf16.vlgmr.msra.gmra.mxu0 %vm143_vm1, %v78_v26  ;;  %395 = vmatmul.msk.bf16.vlgmr.msra.gmra.mxu1 %vm143_vm1, %v78_v26 }
  0x3b   :  { %396 = vmatmul.msk.bf16.vlgmr.msra.gmra.mxu2 %vm143_vm1, %v78_v26 }
  0x3c   :  { %397 = vmatmul.msk.bf16.vlgmr.msra.gmra.mxu3 %vm143_vm1, %v78_v26 }
  0x4a   :  { %398 = vmatmul.msk.bf16.vlgmr.msrb.gmra.mxu0 %vm143_vm1, %v78_v26  ;;  %v99_v26 = vperm.slane %v86_v16, 2 }
  0x97   :  { %v193_v48 = vpop.f32.mrf.mxu0  ;;  %v206_v49 = vpop.f32.mrf.mxu1 }
  0x98   :  { %v194_v50 = vadd.f32 %v193_v48, %v89_v46  ;;  %v207_v51 = vadd.f32 %v206_v49, %v90_v47 }
  0x9a   :  { %v340_v52 = vpack.c.bf16 %v207_v51, %v194_v50 }
  0x9c   :  { %346 = vst [vmem:[%s612_s5] sm:$0xff] %v340_v52 }
  0x9e   :  { %v219_v55 = vpop.f32.mrf.mxu2 }
  0x9f   :  { %v232_v56 = vpop.f32.mrf.mxu3  ;;  %v195_v57 = vpop.f32.mrf.mxu0  ;;  %v220_v59 = vadd.f32 %v219_v55, %v91_v53 }
  0xa0   :  { %v208_v58 = vpop.f32.mrf.mxu1  ;;  %v233_v60 = vadd.f32 %v232_v56, %v92_v54 }
  0xa2   :  { %v341_v61 = vpack.c.bf16 %v233_v60, %v220_v59 }
  0xa4   :  { %347 = vst [vmem:[%s612_s5 + $0x8] sm:$0xff] %v341_v61 }
  0xa6   :  { %v221_v0 = vpop.f32.mrf.mxu2 }
  0xa7   :  { %v234_v1 = vpop.f32.mrf.mxu3  ;;  %v245_v2 = vpop.f32.mrf.mxu0 }
  0xa8   :  { %v258_v3 = vpop.f32.mrf.mxu1  ;;  %v246_v4 = vadd.f32 %v245_v2, %v93_v62 }
  0xa9   :  { %v259_v5 = vadd.f32 %v258_v3, %v94_v63 }
  0xab   :  { %v342_v6 = vpack.c.bf16 %v259_v5, %v246_v4 }
  0xad   :  { %348 = vst [vmem:[%s612_s5 + $0x10] sm:$0xff] %v342_v6 }
  0xae   :  { %v271_v9 = vpop.f32.mrf.mxu2 }
  0xaf   :  { %v284_v10 = vpop.f32.mrf.mxu3  ;;  %v247_v11 = vpop.f32.mrf.mxu0  ;;  %v272_v13 = vadd.f32 %v271_v9, %v95_v7 }
  0xb0   :  { %v260_v12 = vpop.f32.mrf.mxu1  ;;  %v285_v14 = vadd.f32 %v284_v10, %v96_v8 }
  0xb2   :  { %v343_v15 = vpack.c.bf16 %v285_v14, %v272_v13 }
  0xb4   :  { %349 = vst [vmem:[%s612_s5 + $0x18] sm:$0xff] %v343_v15 }
  0xb6   :  { %v273_v19 = vpop.f32.mrf.mxu2 }
  0xb7   :  { %v286_v20 = vpop.f32.mrf.mxu3  ;;  %v297_v21 = vpop.f32.mrf.mxu0 }
  0xb8   :  { %v310_v22 = vpop.f32.mrf.mxu1  ;;  %v298_v23 = vadd.f32 %v297_v21, %v97_v17 }
  0xb9   :  { %v311_v24 = vadd.f32 %v310_v22, %v98_v18 }
  0xbb   :  { %v344_v25 = vpack.c.bf16 %v311_v24, %v298_v23 }
  0xbd   :  { %350 = vst [vmem:[%s612_s5 + $0x20] sm:$0xff] %v344_v25 }
  0xbe   :  { %v323_v28 = vpop.f32.mrf.mxu2 }
  0xbf   :  { %v336_v29 = vpop.f32.mrf.mxu3  ;;  %v299_v30 = vpop.f32.mrf.mxu0  ;;  %v324_v31 = vadd.f32 %v323_v28, %v99_v26 }
  0xc0   :  { %v337_v32 = vadd.f32 %v336_v29, %v100_v27  ;;  %v312_v33 = vpop.f32.mrf.mxu1 }
  0xc2   :  { %v345_v34 = vpack.c.bf16 %v337_v32, %v324_v31 }
  0xc4   :  { %351 = vst [vmem:[%s612_s5 + $0x28] sm:$0xff] %v345_v34 }
  0xc6   :  { %v325_v36 = vpop.f32.mrf.mxu2 }
  0xc7   :  { %v338_v37 = vpop.f32.mrf.mxu3  ;;  %v369_v38 = vpop.f32.mrf.mxu0 }
  0xc8   :  { %v370_v39 = vadd.f32 %v403_v35, %v369_v38 }
  0xca   :  { %374 = vst.msk [vmem:[%s613_s6] sm:$0xff] %vm373_vm2, %v370_v39 }
  0xcf   :  { %v371_v40 = vpop.f32.mrf.mxu0 }
  0xd0   :  { %383 = vsyncpa [#allocation3], 1 }
  0xd1   :  { %384 = vsyncpa [#allocation5], 1 }
  0xd2   :  { %385 = vsyncpa [#allocation8], 1 }

// kernel: discriminator_forward.4
= control target key start
LH: loop header
LB: loop body
LE: loop exit
PB: predicated region body
PF: predicated region fallthrough
CT: control target
= control target key end

     0   :  { %12 = vsyncpa [#allocation3], 0  ;;  %s5828_s0 = inlined_call_operand.vmem [shape: bf16[8,512], index: 0, kind: input, shape index: {}]   ;;  %s5829_s1 = inlined_call_operand.hbm [shape: bf16[512,1536], index: 1, kind: input, shape index: {}]   ;;  %s5830_s2 = inlined_call_operand.hbm [shape: f32[1,1536], index: 2, kind: input, shape index: {}]   ;;  %s5831_s3 = inlined_call_operand.vmem [shape: bf16[512,32], index: 3, kind: input, shape index: {}]   ;;  %s5832_s4 = inlined_call_operand.hbm [shape: f32[1,32], index: 4, kind: input, shape index: {}]   ;;  %s5833_s5 = inlined_call_operand.vmem [shape: bf16[8,1536], index: 5, kind: output, shape index: {0}]   ;;  %s5834_s6 = inlined_call_operand.vmem [shape: f32[8,32], index: 6, kind: output, shape index: {1}]  }
   0x1   :  { %13 = vsyncpa [#allocation5], 0  ;;  %s34_s23 = sshll.u32 %s5830_s2, 4  ;;  %s5536_s24 = smov [#allocation4]   ;;  %s35_s23 = int_to_ptr.hbm [resolvable:$true] %s34_s23 }
   0x2   :  { %s36_s25 = sshll.u32 %s5536_s24, 4  ;;  %s20_s28 = sshll.u32 %s5829_s1, 4  ;;  %s37_s25 = int_to_ptr.vmem [resolvable:$true] %s36_s25  ;;  %s21_s28 = int_to_ptr.hbm [resolvable:$true] %s20_s28 }
   0x3   :  { %39 = dma.hbm_to_vmem [thread:$0]  %s35_s23, 192, %s37_s25, [#allocation5]  }
   0x4   :  { %s5537_s29 = smov [#allocation2]   ;;  %s5538_s7 = smov 768  }
   0x5   :  { %s22_s30 = sshll.u32 %s5537_s29, 4  ;;  %s5539_s8 = smov 48   ;;  %s23_s30 = int_to_ptr.vmem [resolvable:$true] %s22_s30 }
   0x6   :  { %28 = dma.hbm_to_vmem [thread:$0]  %s21_s28, 49152, %s23_s30, [#allocation3], %s5538_s7, %s5538_s7, %s5539_s8  }
   0x7   :  { %s47_s2 = sshll.u32 %s5832_s4, 4  ;;  %s5540_s11 = smov [#allocation6]   ;;  %s48_s2 = int_to_ptr.hbm [resolvable:$true] %s47_s2 }
   0x8   :  { %s49_s12 = sshll.u32 %s5540_s11, 4  ;;  %s50_s12 = int_to_ptr.vmem [resolvable:$true] %s49_s12 }
   0x9   :  { %52 = dma.hbm_to_vmem [thread:$0]  %s48_s2, 16, %s50_s12, [#allocation5]  }
   0xa   :  { %5532 = dma.done.wait [#allocation3], 49152  }
   0xb   :  { %5533 = vsyncadd [#allocation3], 4294918144 }
   0xc   :  { %5534 = dma.done.wait [#allocation5], 208  }
   0xd   :  { %5535 = vsyncadd [#allocation5], 4294967088  ;;  %v3711_v0 = vld [vmem:[#allocation2 + $0x2a0] sm:$0xf]  ;;  %v5127_v1 = vld [vmem:[#allocation2 + $0x2cc] sm:$0xf0] }
   0xe   :  { %v4095_v2 = vld [vmem:[#allocation2 + $0x5a0] sm:$0xf]  ;;  %v3712_v3 = vor.u32 %v5127_v1, %v3711_v0  ;;  %v5223_v4 = vld [vmem:[#allocation2 + $0x5cc] sm:$0xf0]  ;;  %vm3361_vm0 = vcmask 261120  }
   0xf   :  { %v4479_v5 = vld [vmem:[#allocation2 + $0x8a0] sm:$0xf]  ;;  %v5319_v6 = vld [vmem:[#allocation2 + $0x8cc] sm:$0xf0]  ;;  %v4096_v7 = vor.u32 %v5223_v4, %v4095_v2 }
  0x10   :  { %v4480_v8 = vor.u32 %v5319_v6, %v4479_v5  ;;  %v4863_v9 = vld [vmem:[#allocation2 + $0xba0] sm:$0xf]  ;;  %v5415_v10 = vld [vmem:[#allocation2 + $0xbcc] sm:$0xf0]  ;;  %2413 = vmatpush.bf16.msra.mxu0 %v3712_v3 }
  0x11   :  { %v3663_v11 = vld [vmem:[#allocation2 + $0x240] sm:$0xf]  ;;  %v4864_v12 = vor.u32 %v5415_v10, %v4863_v9  ;;  %v5115_v13 = vld [vmem:[#allocation2 + $0x26c] sm:$0xf0]  ;;  %2426 = vmatpush.bf16.msra.mxu1 %v4096_v7 }
  0x12   :  { %v4047_v14 = vld [vmem:[#allocation2 + $0x540] sm:$0xf]  ;;  %v5211_v15 = vld [vmem:[#allocation2 + $0x56c] sm:$0xf0]  ;;  %2439 = vmatpush.bf16.msra.mxu2 %v4480_v8  ;;  %v3664_v16 = vor.u32 %v5115_v13, %v3663_v11 }
  0x13   :  { %v4048_v17 = vor.u32 %v5211_v15, %v4047_v14  ;;  %v4431_v18 = vld [vmem:[#allocation2 + $0x840] sm:$0xf]  ;;  %v5307_v19 = vld [vmem:[#allocation2 + $0x86c] sm:$0xf0]  ;;  %2452 = vmatpush.bf16.msra.mxu3 %v4864_v12 }
  0x14   :  { %v4815_v20 = vld [vmem:[#allocation2 + $0xb40] sm:$0xf]  ;;  %v4432_v21 = vor.u32 %v5307_v19, %v4431_v18  ;;  %v5403_v22 = vld [vmem:[#allocation2 + $0xb6c] sm:$0xf0]  ;;  %2414 = vmatpush.bf16.msra.mxu0 %v3664_v16 }
  0x15   :  { %v3615_v23 = vld [vmem:[#allocation2 + $0x1e0] sm:$0xf]  ;;  %v5103_v24 = vld [vmem:[#allocation2 + $0x20c] sm:$0xf0]  ;;  %v4816_v25 = vor.u32 %v5403_v22, %v4815_v20  ;;  %2427 = vmatpush.bf16.msra.mxu1 %v4048_v17 }
  0x16   :  { %v3999_v26 = vld [vmem:[#allocation2 + $0x4e0] sm:$0xf]  ;;  %v5199_v27 = vld [vmem:[#allocation2 + $0x50c] sm:$0xf0]  ;;  %v3616_v29 = vor.u32 %v5103_v24, %v3615_v23  ;;  %2440 = vmatpush.bf16.msra.mxu2 %v4432_v21 }
  0x17   :  { %v4383_v28 = vld [vmem:[#allocation2 + $0x7e0] sm:$0xf]  ;;  %v5295_v30 = vld [vmem:[#allocation2 + $0x80c] sm:$0xf0]  ;;  %v4000_v33 = vor.u32 %v5199_v27, %v3999_v26  ;;  %2453 = vmatpush.bf16.msra.mxu3 %v4816_v25 }
  0x18   :  { %v4767_v31 = vld [vmem:[#allocation2 + $0xae0] sm:$0xf]  ;;  %v5391_v32 = vld [vmem:[#allocation2 + $0xb0c] sm:$0xf0]  ;;  %v4384_v34 = vor.u32 %v5295_v30, %v4383_v28  ;;  %2415 = vmatpush.bf16.msra.mxu0 %v3616_v29  ;;  %v5121_v28 = vld [vmem:[#allocation2 + $0x2a4] sm:$0xf] }
  0x19   :  { %v3567_v35 = vld [vmem:[#allocation2 + $0x180] sm:$0xf]  ;;  %v5091_v36 = vld [vmem:[#allocation2 + $0x1ac] sm:$0xf0]  ;;  %v4768_v38 = vor.u32 %v5391_v32, %v4767_v31  ;;  %2428 = vmatpush.bf16.msra.mxu1 %v4000_v33  ;;  %v3713_v29 = vld [vmem:[#allocation2 + $0x2d0] sm:$0xf0] }
  0x1a   :  { %v3951_v37 = vld [vmem:[#allocation2 + $0x480] sm:$0xf]  ;;  %v5187_v39 = vld [vmem:[#allocation2 + $0x4ac] sm:$0xf0]  ;;  %v3568_v44 = vor.u32 %v5091_v36, %v3567_v35  ;;  %2441 = vmatpush.bf16.msra.mxu2 %v4384_v34  ;;  %v5217_v30 = vld [vmem:[#allocation2 + $0x5a4] sm:$0xf] }
  0x1b   :  { %v4335_v40 = vld [vmem:[#allocation2 + $0x780] sm:$0xf]  ;;  %v5283_v41 = vld [vmem:[#allocation2 + $0x7ac] sm:$0xf0]  ;;  %v3952_v45 = vor.u32 %v5187_v39, %v3951_v37  ;;  %2454 = vmatpush.bf16.msra.mxu3 %v4768_v38  ;;  %v4097_v32 = vld [vmem:[#allocation2 + $0x5d0] sm:$0xf0] }
  0x1c   :  { %v4719_v42 = vld [vmem:[#allocation2 + $0xa80] sm:$0xf]  ;;  %v5379_v43 = vld [vmem:[#allocation2 + $0xaac] sm:$0xf0]  ;;  %v4336_v46 = vor.u32 %v5283_v41, %v4335_v40  ;;  %2416 = vmatpush.bf16.msra.mxu0 %v3568_v44  ;;  %v5313_v33 = vld [vmem:[#allocation2 + $0x8a4] sm:$0xf]  ;;  %v3716_v40 = vor.u32 %v5121_v28, %v3713_v29  ;;  %v4100_v41 = vor.u32 %v5217_v30, %v4097_v32 }
  0x1d   :  { %v3519_v47 = vld [vmem:[#allocation2 + $0x120] sm:$0xf]  ;;  %v5079_v48 = vld [vmem:[#allocation2 + $0x14c] sm:$0xf0]  ;;  %v4720_v50 = vor.u32 %v5379_v43, %v4719_v42  ;;  %2429 = vmatpush.bf16.msra.mxu1 %v3952_v45  ;;  %v4481_v34 = vld [vmem:[#allocation2 + $0x8d0] sm:$0xf0] }
  0x1e   :  { %v3903_v49 = vld [vmem:[#allocation2 + $0x420] sm:$0xf]  ;;  %v5175_v51 = vld [vmem:[#allocation2 + $0x44c] sm:$0xf0]  ;;  %v3520_v56 = vor.u32 %v5079_v48, %v3519_v47  ;;  %2442 = vmatpush.bf16.msra.mxu2 %v4336_v46  ;;  %v5409_v37 = vld [vmem:[#allocation2 + $0xba4] sm:$0xf]  ;;  %v4484_v42 = vor.u32 %v5313_v33, %v4481_v34 }
  0x1f   :  { %v4287_v52 = vld [vmem:[#allocation2 + $0x720] sm:$0xf]  ;;  %v5271_v53 = vld [vmem:[#allocation2 + $0x74c] sm:$0xf0]  ;;  %v3904_v57 = vor.u32 %v5175_v51, %v3903_v49  ;;  %2455 = vmatpush.bf16.msra.mxu3 %v4720_v50  ;;  %v4865_v38 = vld [vmem:[#allocation2 + $0xbd0] sm:$0xf0] }
  0x20   :  { %v4671_v54 = vld [vmem:[#allocation2 + $0xa20] sm:$0xf]  ;;  %v5367_v55 = vld [vmem:[#allocation2 + $0xa4c] sm:$0xf0]  ;;  %v4288_v58 = vor.u32 %v5271_v53, %v4287_v52  ;;  %2417 = vmatpush.bf16.msra.mxu0 %v3520_v56  ;;  %v5109_v43 = vld [vmem:[#allocation2 + $0x244] sm:$0xf]  ;;  %v4868_v46 = vor.u32 %v5409_v37, %v4865_v38 }
  0x21   :  { %v3471_v59 = vld [vmem:[#allocation2 + $0xc0] sm:$0xf]  ;;  %v5067_v60 = vld [vmem:[#allocation2 + $0xec] sm:$0xf0]  ;;  %v4672_v62 = vor.u32 %v5367_v55, %v4671_v54  ;;  %2430 = vmatpush.bf16.msra.mxu1 %v3904_v57  ;;  %v3665_v44 = vld [vmem:[#allocation2 + $0x270] sm:$0xf0] }
  0x22   :  { %v3855_v61 = vld [vmem:[#allocation2 + $0x3c0] sm:$0xf]  ;;  %v5163_v63 = vld [vmem:[#allocation2 + $0x3ec] sm:$0xf0]  ;;  %v3472_v4 = vor.u32 %v5067_v60, %v3471_v59  ;;  %2443 = vmatpush.bf16.msra.mxu2 %v4288_v58  ;;  %v5205_v45 = vld [vmem:[#allocation2 + $0x544] sm:$0xf]  ;;  %v3668_v53 = vor.u32 %v5109_v43, %v3665_v44 }
  0x23   :  { %v4239_v0 = vld [vmem:[#allocation2 + $0x6c0] sm:$0xf]  ;;  %v5259_v1 = vld [vmem:[#allocation2 + $0x6ec] sm:$0xf0]  ;;  %v3856_v5 = vor.u32 %v5163_v63, %v3855_v61  ;;  %2456 = vmatpush.bf16.msra.mxu3 %v4672_v62  ;;  %v4049_v47 = vld [vmem:[#allocation2 + $0x570] sm:$0xf0] }
  0x24   :  { %v4623_v2 = vld [vmem:[#allocation2 + $0x9c0] sm:$0xf]  ;;  %v5355_v3 = vld [vmem:[#allocation2 + $0x9ec] sm:$0xf0]  ;;  %v4240_v6 = vor.u32 %v5259_v1, %v4239_v0  ;;  %2418 = vmatpush.bf16.msra.mxu0 %v3472_v4  ;;  %v5301_v48 = vld [vmem:[#allocation2 + $0x844] sm:$0xf]  ;;  %v4052_v57 = vor.u32 %v5205_v45, %v4049_v47 }
  0x25   :  { %v3423_v7 = vld [vmem:[#allocation2 + $0x60] sm:$0xf]  ;;  %v5055_v8 = vld [vmem:[#allocation2 + $0x8c] sm:$0xf0]  ;;  %v4624_v10 = vor.u32 %v5355_v3, %v4623_v2  ;;  %2431 = vmatpush.bf16.msra.mxu1 %v3856_v5  ;;  %v4433_v49 = vld [vmem:[#allocation2 + $0x870] sm:$0xf0] }
  0x26   :  { %v3807_v9 = vld [vmem:[#allocation2 + $0x360] sm:$0xf]  ;;  %v5151_v11 = vld [vmem:[#allocation2 + $0x38c] sm:$0xf0]  ;;  %v3424_v16 = vor.u32 %v5055_v8, %v3423_v7  ;;  %2444 = vmatpush.bf16.msra.mxu2 %v4240_v6  ;;  %v5397_v50 = vld [vmem:[#allocation2 + $0xb44] sm:$0xf]  ;;  %v4436_v58 = vor.u32 %v5301_v48, %v4433_v49 }
  0x27   :  { %v4191_v12 = vld [vmem:[#allocation2 + $0x660] sm:$0xf]  ;;  %v5247_v13 = vld [vmem:[#allocation2 + $0x68c] sm:$0xf0]  ;;  %v3808_v19 = vor.u32 %v5151_v11, %v3807_v9  ;;  %2457 = vmatpush.bf16.msra.mxu3 %v4624_v10  ;;  %v4817_v51 = vld [vmem:[#allocation2 + $0xb70] sm:$0xf0] }
  0x28   :  { %v4575_v14 = vld [vmem:[#allocation2 + $0x960] sm:$0xf]  ;;  %v5343_v15 = vld [vmem:[#allocation2 + $0x98c] sm:$0xf0]  ;;  %v4192_v20 = vor.u32 %v5247_v13, %v4191_v12  ;;  %2419 = vmatpush.bf16.msra.mxu0 %v3424_v16  ;;  %v66_v52 = vld [vmem:[%s5828_s0 + $0x8] sm:$0xff]  ;;  %v4820_v62 = vor.u32 %v5397_v50, %v4817_v51 }
  0x29   :  { %v3375_v17 = vld [vmem:[#allocation2] sm:$0xf]  ;;  %v5043_v18 = vld [vmem:[#allocation2 + $0x2c] sm:$0xf0]  ;;  %v4576_v24 = vor.u32 %v5343_v15, %v4575_v14  ;;  %2432 = vmatpush.bf16.msra.mxu1 %v3808_v19  ;;  %v5097_v54 = vld [vmem:[#allocation2 + $0x1e4] sm:$0xf]  ;;  %v483_v55 = vunpack.c.l.b16 %v66_v52  ;;  %v484_v56 = vunpack.c.h.b16 %v66_v52 }
  0x2a   :  { %v3759_v21 = vld [vmem:[#allocation2 + $0x300] sm:$0xf]  ;;  %v5139_v22 = vld [vmem:[#allocation2 + $0x32c] sm:$0xf0]  ;;  %v3376_v31 = vor.u32 %v5043_v18, %v3375_v17  ;;  %2445 = vmatpush.bf16.msra.mxu2 %v4192_v20  ;;  %v3617_v59 = vld [vmem:[#allocation2 + $0x210] sm:$0xf0] }
  0x2b   :  { %v4143_v23 = vld [vmem:[#allocation2 + $0x600] sm:$0xf]  ;;  %v5235_v25 = vld [vmem:[#allocation2 + $0x62c] sm:$0xf0]  ;;  %v3760_v35 = vor.u32 %v5139_v22, %v3759_v21  ;;  %2458 = vmatpush.bf16.msra.mxu3 %v4576_v24  ;;  %v5193_v60 = vld [vmem:[#allocation2 + $0x4e4] sm:$0xf]  ;;  %v5588_v1 = vpack.c.b16 %v483_v55, %v483_v55  ;;  %v5593_v6 = vpack.c.b16 %v484_v56, %v484_v56  ;;  %v3620_v8 = vor.u32 %v5097_v54, %v3617_v59 }
  0x2c   :  { %v4527_v26 = vld [vmem:[#allocation2 + $0x900] sm:$0xf]  ;;  %v5331_v27 = vld [vmem:[#allocation2 + $0x92c] sm:$0xf0]  ;;  %v4144_v36 = vor.u32 %v5235_v25, %v4143_v23  ;;  %2420 = vmatpush.bf16.msra.mxu0 %v3376_v31  ;;  %v4001_v61 = vld [vmem:[#allocation2 + $0x510] sm:$0xf0] }
  0x2d   :  { %v4528_v39 = vor.u32 %v5331_v27, %v4527_v26  ;;  %2433 = vmatpush.bf16.msra.mxu1 %v3760_v35  ;;  %v5289_v63 = vld [vmem:[#allocation2 + $0x7e4] sm:$0xf]  ;;  %v4385_v0 = vld [vmem:[#allocation2 + $0x810] sm:$0xf0]  ;;  %v4004_v9 = vor.u32 %v5193_v60, %v4001_v61 }
  0x2e   :  { %2446 = vmatpush.bf16.msra.mxu2 %v4144_v36  ;;  %v65_v2 = vld [vmem:[%s5828_s0] sm:$0xff]  ;;  %v4769_v4 = vld [vmem:[#allocation2 + $0xb10] sm:$0xf0]  ;;  %v4388_v10 = vor.u32 %v5289_v63, %v4385_v0 }
  0x2f   :  { %2459 = vmatpush.bf16.msra.mxu3 %v4528_v39  ;;  %v5385_v3 = vld [vmem:[#allocation2 + $0xae4] sm:$0xf]  ;;  %v481_v5 = vunpack.c.l.b16 %v65_v2  ;;  %v482_v7 = vunpack.c.h.b16 %v65_v2  ;;  %v3569_v12 = vld [vmem:[#allocation2 + $0x1b0] sm:$0xf0] }
  0x30   :  { %2465 = vmatpush.bf16.msrb.mxu0 %v3716_v40  ;;  %v5085_v11 = vld [vmem:[#allocation2 + $0x184] sm:$0xf]  ;;  %v4772_v16 = vor.u32 %v5385_v3, %v4769_v4  ;;  %v3953_v17 = vld [vmem:[#allocation2 + $0x4b0] sm:$0xf0] }
  0x31   :  { %2478 = vmatpush.bf16.msrb.mxu1 %v4100_v41  ;;  %2447 = vmatmul.bf16.vlgmr.msra.gmra.mxu2 %v5588_v1  ;;  %v5181_v13 = vld [vmem:[#allocation2 + $0x484] sm:$0xf]  ;;  %v5596_v14 = vpack.c.b16 %v481_v5, %v481_v5  ;;  %v5598_v15 = vpack.c.b16 %v482_v7, %v482_v7  ;;  %v4337_v19 = vld [vmem:[#allocation2 + $0x7b0] sm:$0xf0]  ;;  %v3572_v22 = vor.u32 %v5085_v11, %v3569_v12  ;;  %v5224_v12 = vld [vmem:[#allocation2 + $0x5d4] sm:$0xf0] }
  0x32   :  { %2491 = vmatpush.bf16.msrb.mxu2 %v4484_v42  ;;  %v5277_v18 = vld [vmem:[#allocation2 + $0x784] sm:$0xf]  ;;  %v4721_v21 = vld [vmem:[#allocation2 + $0xab0] sm:$0xf0]  ;;  %2460 = vmatmul.bf16.vlgmr.msra.gmra.mxu3 %v5593_v6  ;;  %v3956_v23 = vor.u32 %v5181_v13, %v3953_v17  ;;  %v4487_v13 = vld [vmem:[#allocation2 + $0x8a8] sm:$0xf] }
  0x33   :  { %2504 = vmatpush.bf16.msrb.mxu3 %v4868_v46  ;;  %v5373_v20 = vld [vmem:[#allocation2 + $0xa84] sm:$0xf]  ;;  %2421 = vmatmul.bf16.vlgmr.msra.gmra.mxu0 %v5596_v14  ;;  %v4340_v24 = vor.u32 %v5277_v18, %v4337_v19  ;;  %v3521_v26 = vld [vmem:[#allocation2 + $0x150] sm:$0xf0]  ;;  %v4871_v19 = vld [vmem:[#allocation2 + $0xba8] sm:$0xf] }
  0x34   :  { %2466 = vmatpush.bf16.msrb.mxu0 %v3668_v53  ;;  %2434 = vmatmul.bf16.vlgmr.msra.gmra.mxu1 %v5598_v15  ;;  %v5073_v25 = vld [vmem:[#allocation2 + $0x124] sm:$0xf]  ;;  %v4724_v28 = vor.u32 %v5373_v20, %v4721_v21  ;;  %v3905_v29 = vld [vmem:[#allocation2 + $0x450] sm:$0xf0]  ;;  %v5416_v20 = vld [vmem:[#allocation2 + $0xbd4] sm:$0xf0] }
  0x35   :  { %2479 = vmatpush.bf16.msrb.mxu1 %v4052_v57  ;;  %v5169_v27 = vld [vmem:[#allocation2 + $0x424] sm:$0xf]  ;;  %v4289_v31 = vld [vmem:[#allocation2 + $0x750] sm:$0xf0]  ;;  %v3524_v34 = vor.u32 %v5073_v25, %v3521_v26  ;;  %v3671_v25 = vld [vmem:[#allocation2 + $0x248] sm:$0xf] }
  0x36   :  { %2492 = vmatpush.bf16.msrb.mxu2 %v4436_v58  ;;  %v5265_v30 = vld [vmem:[#allocation2 + $0x724] sm:$0xf]  ;;  %v4673_v33 = vld [vmem:[#allocation2 + $0xa50] sm:$0xf0]  ;;  %v3908_v35 = vor.u32 %v5169_v27, %v3905_v29  ;;  %v5116_v26 = vld [vmem:[#allocation2 + $0x274] sm:$0xf0] }
  0x37   :  { %2505 = vmatpush.bf16.msrb.mxu3 %v4820_v62  ;;  %v5361_v32 = vld [vmem:[#allocation2 + $0xa24] sm:$0xf]  ;;  %v4292_v36 = vor.u32 %v5265_v30, %v4289_v31  ;;  %v3473_v38 = vld [vmem:[#allocation2 + $0xf0] sm:$0xf0]  ;;  %v4055_v27 = vld [vmem:[#allocation2 + $0x548] sm:$0xf] }
  0x38   :  { %2467 = vmatpush.bf16.msrb.mxu0 %v3620_v8  ;;  %v5061_v37 = vld [vmem:[#allocation2 + $0xc4] sm:$0xf]  ;;  %v4676_v40 = vor.u32 %v5361_v32, %v4673_v33  ;;  %v3857_v41 = vld [vmem:[#allocation2 + $0x3f0] sm:$0xf0]  ;;  %v3719_v8 = vld [vmem:[#allocation2 + $0x2a8] sm:$0xf] }
  0x39   :  { %2480 = vmatpush.bf16.msrb.mxu1 %v4004_v9  ;;  %v5157_v39 = vld [vmem:[#allocation2 + $0x3c4] sm:$0xf]  ;;  %v4241_v43 = vld [vmem:[#allocation2 + $0x6f0] sm:$0xf0]  ;;  %v3476_v46 = vor.u32 %v5061_v37, %v3473_v38  ;;  %v5128_v9 = vld [vmem:[#allocation2 + $0x2d4] sm:$0xf0] }
  0x3a   :  { %2493 = vmatpush.bf16.msrb.mxu2 %v4388_v10  ;;  %v5253_v42 = vld [vmem:[#allocation2 + $0x6c4] sm:$0xf]  ;;  %v4625_v45 = vld [vmem:[#allocation2 + $0x9f0] sm:$0xf0]  ;;  %v3860_v47 = vor.u32 %v5157_v39, %v3857_v41  ;;  %v4103_v10 = vld [vmem:[#allocation2 + $0x5a8] sm:$0xf] }
  0x3b   :  { %2506 = vmatpush.bf16.msrb.mxu3 %v4772_v16  ;;  %v5349_v44 = vld [vmem:[#allocation2 + $0x9c4] sm:$0xf]  ;;  %v4244_v48 = vor.u32 %v5253_v42, %v4241_v43  ;;  %v3425_v50 = vld [vmem:[#allocation2 + $0x90] sm:$0xf0]  ;;  %v5320_v16 = vld [vmem:[#allocation2 + $0x8d4] sm:$0xf0] }
  0x3c   :  { %2468 = vmatpush.bf16.msrb.mxu0 %v3572_v22  ;;  %v5049_v49 = vld [vmem:[#allocation2 + $0x64] sm:$0xf]  ;;  %v4628_v52 = vor.u32 %v5349_v44, %v4625_v45  ;;  %v3809_v53 = vld [vmem:[#allocation2 + $0x390] sm:$0xf0]  ;;  %v3720_v22 = vor.u32 %v5128_v9, %v3719_v8  ;;  %v5212_v29 = vld [vmem:[#allocation2 + $0x574] sm:$0xf0] }
  0x3d   :  { %2481 = vmatpush.bf16.msrb.mxu1 %v3956_v23  ;;  %v5145_v51 = vld [vmem:[#allocation2 + $0x364] sm:$0xf]  ;;  %v4193_v55 = vld [vmem:[#allocation2 + $0x690] sm:$0xf0]  ;;  %v3428_v58 = vor.u32 %v5049_v49, %v3425_v50  ;;  %v4104_v23 = vor.u32 %v5224_v12, %v4103_v10  ;;  %v4439_v30 = vld [vmem:[#allocation2 + $0x848] sm:$0xf] }
  0x3e   :  { %2494 = vmatpush.bf16.msrb.mxu2 %v4340_v24  ;;  %v5241_v54 = vld [vmem:[#allocation2 + $0x664] sm:$0xf]  ;;  %v4577_v57 = vld [vmem:[#allocation2 + $0x990] sm:$0xf0]  ;;  %v3812_v61 = vor.u32 %v5145_v51, %v3809_v53  ;;  %v4488_v24 = vor.u32 %v5320_v16, %v4487_v13  ;;  %v5308_v31 = vld [vmem:[#allocation2 + $0x874] sm:$0xf0] }
  0x3f   :  { %2507 = vmatpush.bf16.msrb.mxu3 %v4724_v28  ;;  %v5337_v56 = vld [vmem:[#allocation2 + $0x964] sm:$0xf]  ;;  %v3377_v60 = vld [vmem:[#allocation2 + $0x30] sm:$0xf0]  ;;  %v4196_v62 = vor.u32 %v5241_v54, %v4193_v55  ;;  %v4872_v28 = vor.u32 %v5416_v20, %v4871_v19  ;;  %v4823_v32 = vld [vmem:[#allocation2 + $0xb48] sm:$0xf] }
  0x40   :  { %2469 = vmatpush.bf16.msrb.mxu0 %v3524_v34  ;;  %v5037_v59 = vld [vmem:[#allocation2 + $0x4] sm:$0xf]  ;;  %v3761_v0 = vld [vmem:[#allocation2 + $0x330] sm:$0xf0]  ;;  %v4580_v3 = vor.u32 %v5337_v56, %v4577_v57  ;;  %v5404_v33 = vld [vmem:[#allocation2 + $0xb74] sm:$0xf0]  ;;  %v3672_v34 = vor.u32 %v5116_v26, %v3671_v25 }
  0x41   :  { %2482 = vmatpush.bf16.msrb.mxu1 %v3908_v35  ;;  %v5133_v63 = vld [vmem:[#allocation2 + $0x304] sm:$0xf]  ;;  %v4145_v4 = vld [vmem:[#allocation2 + $0x630] sm:$0xf0]  ;;  %v3380_v11 = vor.u32 %v5037_v59, %v3377_v60  ;;  %v4056_v35 = vor.u32 %v5212_v29, %v4055_v27  ;;  %v3623_v37 = vld [vmem:[#allocation2 + $0x1e8] sm:$0xf] }
  0x42   :  { %2495 = vmatpush.bf16.msrb.mxu2 %v4292_v36  ;;  %v5229_v2 = vld [vmem:[#allocation2 + $0x604] sm:$0xf]  ;;  %v4529_v7 = vld [vmem:[#allocation2 + $0x930] sm:$0xf0]  ;;  %v3764_v17 = vor.u32 %v5133_v63, %v3761_v0  ;;  %v4440_v36 = vor.u32 %v5308_v31, %v4439_v30  ;;  %v5104_v38 = vld [vmem:[#allocation2 + $0x214] sm:$0xf0] }
  0x43   :  { %2508 = vmatpush.bf16.msrb.mxu3 %v4676_v40  ;;  %v5325_v5 = vld [vmem:[#allocation2 + $0x904] sm:$0xf]  ;;  %v4148_v18 = vor.u32 %v5229_v2, %v4145_v4  ;;  %v4007_v39 = vld [vmem:[#allocation2 + $0x4e8] sm:$0xf]  ;;  %v4824_v40 = vor.u32 %v5404_v33, %v4823_v32  ;;  %v5200_v41 = vld [vmem:[#allocation2 + $0x514] sm:$0xf0] }
  0x44   :  { %2470 = vmatpush.bf16.msrb.mxu0 %v3476_v46  ;;  %v4532_v21 = vor.u32 %v5325_v5, %v4529_v7  ;;  %v4391_v42 = vld [vmem:[#allocation2 + $0x7e8] sm:$0xf]  ;;  %v5296_v43 = vld [vmem:[#allocation2 + $0x814] sm:$0xf0]  ;;  %v3624_v46 = vor.u32 %v5104_v38, %v3623_v37 }
  0x45   :  { %2483 = vmatpush.bf16.msrb.mxu1 %v3860_v47  ;;  %v4775_v44 = vld [vmem:[#allocation2 + $0xae8] sm:$0xf]  ;;  %v5392_v45 = vld [vmem:[#allocation2 + $0xb14] sm:$0xf0]  ;;  %v4008_v47 = vor.u32 %v5200_v41, %v4007_v39 }
  0x46   :  { %2496 = vmatpush.bf16.msrb.mxu2 %v4244_v48  ;;  %v4392_v48 = vor.u32 %v5296_v43, %v4391_v42  ;;  %v3575_v49 = vld [vmem:[#allocation2 + $0x188] sm:$0xf]  ;;  %v5092_v50 = vld [vmem:[#allocation2 + $0x1b4] sm:$0xf0] }
  0x47   :  { %2509 = vmatpush.bf16.msrb.mxu3 %v4628_v52  ;;  %v3959_v51 = vld [vmem:[#allocation2 + $0x488] sm:$0xf]  ;;  %v4776_v52 = vor.u32 %v5392_v45, %v4775_v44  ;;  %v5188_v53 = vld [vmem:[#allocation2 + $0x4b4] sm:$0xf0] }
  0x48   :  { %2471 = vmatpush.bf16.msrb.mxu0 %v3428_v58  ;;  %v4343_v54 = vld [vmem:[#allocation2 + $0x788] sm:$0xf]  ;;  %v5284_v55 = vld [vmem:[#allocation2 + $0x7b4] sm:$0xf0]  ;;  %v3576_v58 = vor.u32 %v5092_v50, %v3575_v49  ;;  %v3960_v59 = vor.u32 %v5188_v53, %v3959_v51  ;;  %v4105_v50 = vld [vmem:[#allocation2 + $0x5d8] sm:$0xf0] }
  0x49   :  { %2484 = vmatpush.bf16.msrb.mxu1 %v3812_v61  ;;  %v4727_v56 = vld [vmem:[#allocation2 + $0xa88] sm:$0xf]  ;;  %v5380_v57 = vld [vmem:[#allocation2 + $0xab4] sm:$0xf0]  ;;  %v4344_v60 = vor.u32 %v5284_v55, %v4343_v54  ;;  %v5314_v51 = vld [vmem:[#allocation2 + $0x8ac] sm:$0xf] }
  0x4a   :  { %2497 = vmatpush.bf16.msrb.mxu2 %v4196_v62  ;;  %v3527_v61 = vld [vmem:[#allocation2 + $0x128] sm:$0xf]  ;;  %v5080_v62 = vld [vmem:[#allocation2 + $0x154] sm:$0xf0]  ;;  %v4728_v0 = vor.u32 %v5380_v57, %v4727_v56  ;;  %v5410_v55 = vld [vmem:[#allocation2 + $0xbac] sm:$0xf] }
  0x4b   :  { %2510 = vmatpush.bf16.msrb.mxu3 %v4580_v3  ;;  %v3911_v63 = vld [vmem:[#allocation2 + $0x428] sm:$0xf]  ;;  %v5176_v2 = vld [vmem:[#allocation2 + $0x454] sm:$0xf0]  ;;  %v3528_v8 = vor.u32 %v5080_v62, %v3527_v61  ;;  %v4873_v56 = vld [vmem:[#allocation2 + $0xbd8] sm:$0xf0] }
  0x4c   :  { %2472 = vmatpush.bf16.msrb.mxu0 %v3380_v11  ;;  %v4295_v3 = vld [vmem:[#allocation2 + $0x728] sm:$0xf]  ;;  %v5272_v4 = vld [vmem:[#allocation2 + $0x754] sm:$0xf0]  ;;  %v3912_v9 = vor.u32 %v5176_v2, %v3911_v63  ;;  %v5110_v61 = vld [vmem:[#allocation2 + $0x24c] sm:$0xf] }
  0x4d   :  { %2485 = vmatpush.bf16.msrb.mxu1 %v3764_v17  ;;  %v4679_v5 = vld [vmem:[#allocation2 + $0xa28] sm:$0xf]  ;;  %v5368_v7 = vld [vmem:[#allocation2 + $0xa54] sm:$0xf0]  ;;  %v4296_v10 = vor.u32 %v5272_v4, %v4295_v3  ;;  %v3673_v62 = vld [vmem:[#allocation2 + $0x278] sm:$0xf0] }
  0x4e   :  { %2498 = vmatpush.bf16.msrb.mxu2 %v4148_v18  ;;  %v3479_v11 = vld [vmem:[#allocation2 + $0xc8] sm:$0xf]  ;;  %v5068_v12 = vld [vmem:[#allocation2 + $0xf4] sm:$0xf0]  ;;  %v4680_v16 = vor.u32 %v5368_v7, %v4679_v5  ;;  %v5206_v63 = vld [vmem:[#allocation2 + $0x54c] sm:$0xf] }
  0x4f   :  { %2511 = vmatpush.bf16.msrb.mxu3 %v4532_v21  ;;  %2473 = vmatmul.bf16.vlgmr.msrb.gmra.mxu0 %v5596_v14  ;;  %v3863_v13 = vld [vmem:[#allocation2 + $0x3c8] sm:$0xf]  ;;  %v5164_v17 = vld [vmem:[#allocation2 + $0x3f4] sm:$0xf0]  ;;  %v4057_v2 = vld [vmem:[#allocation2 + $0x578] sm:$0xf0] }
  0x50   :  { %2517 = vmatpush.bf16.msra.mxu0 %v3720_v22  ;;  %2486 = vmatmul.bf16.vlgmr.msrb.gmra.mxu1 %v5598_v15  ;;  %v4247_v18 = vld [vmem:[#allocation2 + $0x6c8] sm:$0xf]  ;;  %v5260_v19 = vld [vmem:[#allocation2 + $0x6f4] sm:$0xf0]  ;;  %v3480_v22 = vor.u32 %v5068_v12, %v3479_v11  ;;  %v5302_v3 = vld [vmem:[#allocation2 + $0x84c] sm:$0xf] }
  0x51   :  { %2530 = vmatpush.bf16.msra.mxu1 %v4104_v23  ;;  %2499 = vmatmul.bf16.vlgmr.msrb.gmra.mxu2 %v5588_v1  ;;  %v4631_v20 = vld [vmem:[#allocation2 + $0x9c8] sm:$0xf]  ;;  %v5356_v21 = vld [vmem:[#allocation2 + $0x9f4] sm:$0xf0]  ;;  %v3864_v23 = vor.u32 %v5164_v17, %v3863_v13  ;;  %v4441_v4 = vld [vmem:[#allocation2 + $0x878] sm:$0xf0] }
  0x52   :  { %2543 = vmatpush.bf16.msra.mxu2 %v4488_v24  ;;  %2512 = vmatmul.bf16.vlgmr.msrb.gmra.mxu3 %v5593_v6  ;;  %v4248_v24 = vor.u32 %v5260_v19, %v4247_v18  ;;  %v3431_v25 = vld [vmem:[#allocation2 + $0x68] sm:$0xf]  ;;  %v5056_v26 = vld [vmem:[#allocation2 + $0x94] sm:$0xf0]  ;;  %v5398_v5 = vld [vmem:[#allocation2 + $0xb4c] sm:$0xf] }
  0x53   :  { %2556 = vmatpush.bf16.msra.mxu3 %v4872_v28  ;;  %v3815_v27 = vld [vmem:[#allocation2 + $0x368] sm:$0xf]  ;;  %v4632_v28 = vor.u32 %v5356_v21, %v4631_v20  ;;  %v5152_v29 = vld [vmem:[#allocation2 + $0x394] sm:$0xf0]  ;;  %v4825_v7 = vld [vmem:[#allocation2 + $0xb78] sm:$0xf0] }
  0x54   :  { %2518 = vmatpush.bf16.msra.mxu0 %v3672_v34  ;;  %v4199_v30 = vld [vmem:[#allocation2 + $0x668] sm:$0xf]  ;;  %v5248_v31 = vld [vmem:[#allocation2 + $0x694] sm:$0xf0]  ;;  %v3432_v34 = vor.u32 %v5056_v26, %v3431_v25  ;;  %v3816_v37 = vor.u32 %v5152_v29, %v3815_v27  ;;  %v5098_v11 = vld [vmem:[#allocation2 + $0x1ec] sm:$0xf] }
  0x55   :  { %2531 = vmatpush.bf16.msra.mxu1 %v4056_v35  ;;  %v4583_v32 = vld [vmem:[#allocation2 + $0x968] sm:$0xf]  ;;  %v5344_v33 = vld [vmem:[#allocation2 + $0x994] sm:$0xf0]  ;;  %v4200_v38 = vor.u32 %v5248_v31, %v4199_v30  ;;  %v3625_v12 = vld [vmem:[#allocation2 + $0x218] sm:$0xf0] }
  0x56   :  { %2544 = vmatpush.bf16.msra.mxu2 %v4440_v36  ;;  %v3383_v35 = vld [vmem:[#allocation2 + $0x8] sm:$0xf]  ;;  %v5044_v36 = vld [vmem:[#allocation2 + $0x34] sm:$0xf0]  ;;  %v4584_v42 = vor.u32 %v5344_v33, %v4583_v32  ;;  %v5194_v13 = vld [vmem:[#allocation2 + $0x4ec] sm:$0xf] }
  0x57   :  { %2557 = vmatpush.bf16.msra.mxu3 %v4824_v40  ;;  %v3767_v39 = vld [vmem:[#allocation2 + $0x308] sm:$0xf]  ;;  %v5140_v40 = vld [vmem:[#allocation2 + $0x334] sm:$0xf0]  ;;  %v3384_v49 = vor.u32 %v5044_v36, %v3383_v35  ;;  %v4009_v17 = vld [vmem:[#allocation2 + $0x518] sm:$0xf0] }
  0x58   :  { %2519 = vmatpush.bf16.msra.mxu0 %v3624_v46  ;;  %v4151_v41 = vld [vmem:[#allocation2 + $0x608] sm:$0xf]  ;;  %v5236_v43 = vld [vmem:[#allocation2 + $0x634] sm:$0xf0]  ;;  %v5122_v46 = vld [vmem:[#allocation2 + $0x2ac] sm:$0xf]  ;;  %v3768_v53 = vor.u32 %v5140_v40, %v3767_v39 }
  0x59   :  { %2532 = vmatpush.bf16.msra.mxu1 %v4008_v47  ;;  %v4535_v44 = vld [vmem:[#allocation2 + $0x908] sm:$0xf]  ;;  %v5332_v45 = vld [vmem:[#allocation2 + $0x934] sm:$0xf0]  ;;  %v3721_v47 = vld [vmem:[#allocation2 + $0x2d8] sm:$0xf0]  ;;  %v4152_v54 = vor.u32 %v5236_v43, %v4151_v41 }
  0x5a   :  { %2545 = vmatpush.bf16.msra.mxu2 %v4392_v48  ;;  %v5218_v48 = vld [vmem:[#allocation2 + $0x5ac] sm:$0xf]  ;;  %v4536_v57 = vor.u32 %v5332_v45, %v4535_v44  ;;  %v4393_v19 = vld [vmem:[#allocation2 + $0x818] sm:$0xf0] }
  0x5b   :  { %2558 = vmatpush.bf16.msra.mxu3 %v4776_v52  ;;  %v4489_v52 = vld [vmem:[#allocation2 + $0x8d8] sm:$0xf0]  ;;  %v5290_v18 = vld [vmem:[#allocation2 + $0x7ec] sm:$0xf] }
  0x5c   :  { %2520 = vmatpush.bf16.msra.mxu0 %v3576_v58  ;;  %v3724_v58 = vor.u32 %v5122_v46, %v3721_v47  ;;  %v5386_v20 = vld [vmem:[#allocation2 + $0xaec] sm:$0xf]  ;;  %v4777_v21 = vld [vmem:[#allocation2 + $0xb18] sm:$0xf0] }
  0x5d   :  { %2533 = vmatpush.bf16.msra.mxu1 %v3960_v59  ;;  %v4108_v59 = vor.u32 %v5218_v48, %v4105_v50  ;;  %v5086_v25 = vld [vmem:[#allocation2 + $0x18c] sm:$0xf]  ;;  %v3577_v26 = vld [vmem:[#allocation2 + $0x1b8] sm:$0xf0] }
  0x5e   :  { %2546 = vmatpush.bf16.msra.mxu2 %v4344_v60  ;;  %v4492_v60 = vor.u32 %v5314_v51, %v4489_v52  ;;  %v5182_v27 = vld [vmem:[#allocation2 + $0x48c] sm:$0xf]  ;;  %v3961_v29 = vld [vmem:[#allocation2 + $0x4b8] sm:$0xf0] }
  0x5f   :  { %2559 = vmatpush.bf16.msra.mxu3 %v4728_v0  ;;  %v4876_v0 = vor.u32 %v5410_v55, %v4873_v56  ;;  %v5278_v30 = vld [vmem:[#allocation2 + $0x78c] sm:$0xf]  ;;  %v4345_v31 = vld [vmem:[#allocation2 + $0x7b8] sm:$0xf0]  ;;  %v3964_v35 = vor.u32 %v5182_v27, %v3961_v29  ;;  %v4495_v27 = vld [vmem:[#allocation2 + $0x8b0] sm:$0xf] }
  0x60   :  { %2521 = vmatpush.bf16.msra.mxu0 %v3528_v8  ;;  %v3676_v8 = vor.u32 %v5110_v61, %v3673_v62  ;;  %v5374_v32 = vld [vmem:[#allocation2 + $0xa8c] sm:$0xf]  ;;  %v4729_v33 = vld [vmem:[#allocation2 + $0xab8] sm:$0xf0]  ;;  %v4348_v36 = vor.u32 %v5278_v30, %v4345_v31  ;;  %v4879_v31 = vld [vmem:[#allocation2 + $0xbb0] sm:$0xf] }
  0x61   :  { %2534 = vmatpush.bf16.msra.mxu1 %v3912_v9  ;;  %v4060_v9 = vor.u32 %v5206_v63, %v4057_v2  ;;  %v5170_v39 = vld [vmem:[#allocation2 + $0x42c] sm:$0xf]  ;;  %v4732_v40 = vor.u32 %v5374_v32, %v4729_v33  ;;  %v3913_v41 = vld [vmem:[#allocation2 + $0x458] sm:$0xf0]  ;;  %v5417_v32 = vld [vmem:[#allocation2 + $0xbdc] sm:$0xf0] }
  0x62   :  { %2547 = vmatpush.bf16.msra.mxu2 %v4296_v10  ;;  %v4444_v10 = vor.u32 %v5302_v3, %v4441_v4  ;;  %v4297_v43 = vld [vmem:[#allocation2 + $0x758] sm:$0xf0]  ;;  %v5362_v44 = vld [vmem:[#allocation2 + $0xa2c] sm:$0xf]  ;;  %v3916_v47 = vor.u32 %v5170_v39, %v3913_v41  ;;  %v4063_v39 = vld [vmem:[#allocation2 + $0x550] sm:$0xf] }
  0x63   :  { %2560 = vmatpush.bf16.msra.mxu3 %v4680_v16  ;;  %v4828_v16 = vor.u32 %v5398_v5, %v4825_v7  ;;  %v4681_v45 = vld [vmem:[#allocation2 + $0xa58] sm:$0xf0]  ;;  %v5158_v51 = vld [vmem:[#allocation2 + $0x3cc] sm:$0xf]  ;;  %v5213_v41 = vld [vmem:[#allocation2 + $0x57c] sm:$0xf0] }
  0x64   :  { %2522 = vmatpush.bf16.msra.mxu0 %v3480_v22  ;;  %v3628_v22 = vor.u32 %v5098_v11, %v3625_v12  ;;  %v3481_v50 = vld [vmem:[#allocation2 + $0xf8] sm:$0xf0]  ;;  %v4684_v52 = vor.u32 %v5362_v44, %v4681_v45  ;;  %v5350_v56 = vld [vmem:[#allocation2 + $0x9cc] sm:$0xf]  ;;  %v4831_v44 = vld [vmem:[#allocation2 + $0xb50] sm:$0xf] }
  0x65   :  { %2535 = vmatpush.bf16.msra.mxu1 %v3864_v23  ;;  %v4012_v23 = vor.u32 %v5194_v13, %v4009_v17  ;;  %v4249_v55 = vld [vmem:[#allocation2 + $0x6f8] sm:$0xf0]  ;;  %v5050_v61 = vld [vmem:[#allocation2 + $0x6c] sm:$0xf]  ;;  %v5405_v45 = vld [vmem:[#allocation2 + $0xb7c] sm:$0xf0] }
  0x66   :  { %2548 = vmatpush.bf16.msra.mxu2 %v4248_v24  ;;  %v4396_v24 = vor.u32 %v5290_v18, %v4393_v19  ;;  %v3433_v62 = vld [vmem:[#allocation2 + $0x98] sm:$0xf0]  ;;  %v5146_v63 = vld [vmem:[#allocation2 + $0x36c] sm:$0xf] }
  0x67   :  { %2561 = vmatpush.bf16.msra.mxu3 %v4632_v28  ;;  %v4780_v28 = vor.u32 %v5386_v20, %v4777_v21  ;;  %v3817_v2 = vld [vmem:[#allocation2 + $0x398] sm:$0xf0]  ;;  %v5242_v3 = vld [vmem:[#allocation2 + $0x66c] sm:$0xf] }
  0x68   :  { %2523 = vmatpush.bf16.msra.mxu0 %v3432_v34  ;;  %v3580_v34 = vor.u32 %v5086_v25, %v3577_v26  ;;  %v4201_v4 = vld [vmem:[#allocation2 + $0x698] sm:$0xf0]  ;;  %v5338_v5 = vld [vmem:[#allocation2 + $0x96c] sm:$0xf]  ;;  %v3820_v11 = vor.u32 %v5146_v63, %v3817_v2  ;;  %v5225_v26 = vld [vmem:[#allocation2 + $0x5dc] sm:$0xf0] }
  0x69   :  { %2536 = vmatpush.bf16.msra.mxu1 %v3816_v37  ;;  %v5074_v37 = vld [vmem:[#allocation2 + $0x12c] sm:$0xf]  ;;  %v4585_v7 = vld [vmem:[#allocation2 + $0x998] sm:$0xf0]  ;;  %v4204_v12 = vor.u32 %v5242_v3, %v4201_v4  ;;  %v3967_v63 = vld [vmem:[#allocation2 + $0x490] sm:$0xf] }
  0x6a   :  { %2549 = vmatpush.bf16.msra.mxu2 %v4200_v38  ;;  %v3529_v38 = vld [vmem:[#allocation2 + $0x158] sm:$0xf0]  ;;  %v5134_v13 = vld [vmem:[#allocation2 + $0x30c] sm:$0xf]  ;;  %v4588_v18 = vor.u32 %v5338_v5, %v4585_v7  ;;  %v5189_v2 = vld [vmem:[#allocation2 + $0x4bc] sm:$0xf0] }
  0x6b   :  { %2562 = vmatpush.bf16.msra.mxu3 %v4584_v42  ;;  %v5266_v42 = vld [vmem:[#allocation2 + $0x72c] sm:$0xf]  ;;  %v3532_v46 = vor.u32 %v5074_v37, %v3529_v38  ;;  %v4153_v19 = vld [vmem:[#allocation2 + $0x638] sm:$0xf0]  ;;  %v3679_v37 = vld [vmem:[#allocation2 + $0x250] sm:$0xf] }
  0x6c   :  { %2524 = vmatpush.bf16.msra.mxu0 %v3384_v49  ;;  %v4300_v48 = vor.u32 %v5266_v42, %v4297_v43  ;;  %v5062_v49 = vld [vmem:[#allocation2 + $0xcc] sm:$0xf]  ;;  %v4537_v21 = vld [vmem:[#allocation2 + $0x938] sm:$0xf0]  ;;  %v5117_v38 = vld [vmem:[#allocation2 + $0x27c] sm:$0xf0] }
  0x6d   :  { %2537 = vmatpush.bf16.msra.mxu1 %v3768_v53  ;;  %v3865_v53 = vld [vmem:[#allocation2 + $0x3f8] sm:$0xf0]  ;;  %v5230_v17 = vld [vmem:[#allocation2 + $0x60c] sm:$0xf]  ;;  %v4447_v42 = vld [vmem:[#allocation2 + $0x850] sm:$0xf] }
  0x6e   :  { %2550 = vmatpush.bf16.msra.mxu2 %v4152_v54  ;;  %v5254_v54 = vld [vmem:[#allocation2 + $0x6cc] sm:$0xf]  ;;  %v4156_v30 = vor.u32 %v5230_v17, %v4153_v19  ;;  %v5309_v43 = vld [vmem:[#allocation2 + $0x87c] sm:$0xf0]  ;;  %v4351_v3 = vld [vmem:[#allocation2 + $0x790] sm:$0xf] }
  0x6f   :  { %2563 = vmatpush.bf16.msra.mxu3 %v4536_v57  ;;  %2525 = vmatmul.bf16.vlgmr.msra.gmra.mxu0 %v5596_v14  ;;  %v4633_v57 = vld [vmem:[#allocation2 + $0x9f8] sm:$0xf0]  ;;  %v5326_v20 = vld [vmem:[#allocation2 + $0x90c] sm:$0xf]  ;;  %v5285_v4 = vld [vmem:[#allocation2 + $0x7bc] sm:$0xf0] }
  0x70   :  { %2569 = vmatpush.bf16.msrb.mxu0 %v3724_v58  ;;  %2538 = vmatmul.bf16.vlgmr.msra.gmra.mxu1 %v5598_v15  ;;  %v3484_v58 = vor.u32 %v5062_v49, %v3481_v50  ;;  %v4540_v33 = vor.u32 %v5326_v20, %v4537_v21  ;;  %v3631_v49 = vld [vmem:[#allocation2 + $0x1f0] sm:$0xf]  ;;  %v5105_v50 = vld [vmem:[#allocation2 + $0x21c] sm:$0xf0] }
  0x71   :  { %2582 = vmatpush.bf16.msrb.mxu1 %v4108_v59  ;;  %2551 = vmatmul.bf16.vlgmr.msra.gmra.mxu2 %v5588_v1  ;;  %v3868_v59 = vor.u32 %v5158_v51, %v3865_v53  ;;  %v4015_v51 = vld [vmem:[#allocation2 + $0x4f0] sm:$0xf]  ;;  %v5201_v53 = vld [vmem:[#allocation2 + $0x51c] sm:$0xf0] }
  0x72   :  { %2595 = vmatpush.bf16.msrb.mxu2 %v4492_v60  ;;  %2564 = vmatmul.bf16.vlgmr.msra.gmra.mxu3 %v5593_v6  ;;  %v4252_v60 = vor.u32 %v5254_v54, %v4249_v55  ;;  %v4399_v54 = vld [vmem:[#allocation2 + $0x7f0] sm:$0xf]  ;;  %v5297_v55 = vld [vmem:[#allocation2 + $0x81c] sm:$0xf0] }
  0x73   :  { %2608 = vmatpush.bf16.msrb.mxu3 %v4876_v0  ;;  %v4636_v0 = vor.u32 %v5350_v56, %v4633_v57  ;;  %v4783_v56 = vld [vmem:[#allocation2 + $0xaf0] sm:$0xf]  ;;  %v5393_v57 = vld [vmem:[#allocation2 + $0xb1c] sm:$0xf0] }
  0x74   :  { %2570 = vmatpush.bf16.msrb.mxu0 %v3676_v8  ;;  %v3436_v8 = vor.u32 %v5050_v61, %v3433_v62  ;;  %v3583_v61 = vld [vmem:[#allocation2 + $0x190] sm:$0xf]  ;;  %v5093_v62 = vld [vmem:[#allocation2 + $0x1bc] sm:$0xf0] }
  0x75   :  { %2583 = vmatpush.bf16.msrb.mxu1 %v4060_v9  ;;  %v5038_v9 = vld [vmem:[#allocation2 + $0xc] sm:$0xf]  ;;  %v4735_v5 = vld [vmem:[#allocation2 + $0xa90] sm:$0xf]  ;;  %v5381_v7 = vld [vmem:[#allocation2 + $0xabc] sm:$0xf0] }
  0x76   :  { %2596 = vmatpush.bf16.msrb.mxu2 %v4444_v10  ;;  %v3385_v10 = vld [vmem:[#allocation2 + $0x38] sm:$0xf0]  ;;  %v5177_v17 = vld [vmem:[#allocation2 + $0x45c] sm:$0xf0]  ;;  %v4687_v20 = vld [vmem:[#allocation2 + $0xa30] sm:$0xf] }
  0x77   :  { %2609 = vmatpush.bf16.msrb.mxu3 %v4828_v16  ;;  %v3769_v16 = vld [vmem:[#allocation2 + $0x338] sm:$0xf0]  ;;  %v3388_v25 = vor.u32 %v5038_v9, %v3385_v10  ;;  %v3968_v9 = vor.u32 %v5189_v2, %v3967_v63  ;;  %v4352_v10 = vor.u32 %v5285_v4, %v4351_v3  ;;  %v5273_v19 = vld [vmem:[#allocation2 + $0x75c] sm:$0xf0]  ;;  %v5315_v63 = vld [vmem:[#allocation2 + $0x8b4] sm:$0xf] }
  0x78   :  { %2571 = vmatpush.bf16.msrb.mxu0 %v3628_v22  ;;  %v3727_v22 = vld [vmem:[#allocation2 + $0x2b0] sm:$0xf]  ;;  %v3772_v29 = vor.u32 %v5134_v13, %v3769_v16  ;;  %v4736_v16 = vor.u32 %v5381_v7, %v4735_v5  ;;  %v5369_v21 = vld [vmem:[#allocation2 + $0xa5c] sm:$0xf0]  ;;  %v5411_v4 = vld [vmem:[#allocation2 + $0xbb4] sm:$0xf] }
  0x79   :  { %2584 = vmatpush.bf16.msrb.mxu1 %v4012_v23  ;;  %v5129_v23 = vld [vmem:[#allocation2 + $0x2dc] sm:$0xf0]  ;;  %v3919_v13 = vld [vmem:[#allocation2 + $0x430] sm:$0xf]  ;;  %v4881_v5 = vld [vmem:[#allocation2 + $0xbe0] sm:$0xf0] }
  0x7a   :  { %2597 = vmatpush.bf16.msrb.mxu2 %v4396_v24  ;;  %v4111_v24 = vld [vmem:[#allocation2 + $0x5b0] sm:$0xf] }
  0x7b   :  { %2610 = vmatpush.bf16.msrb.mxu3 %v4780_v28  ;;  %v5321_v28 = vld [vmem:[#allocation2 + $0x8dc] sm:$0xf0] }
  0x7c   :  { %2572 = vmatpush.bf16.msrb.mxu0 %v3580_v34  ;;  %v3728_v34 = vor.u32 %v5129_v23, %v3727_v22  ;;  %v3920_v23 = vor.u32 %v5177_v17, %v3919_v13  ;;  %v5207_v13 = vld [vmem:[#allocation2 + $0x554] sm:$0xf]  ;;  %v4065_v17 = vld [vmem:[#allocation2 + $0x580] sm:$0xf0] }
  0x7d   :  { %2585 = vmatpush.bf16.msrb.mxu1 %v3964_v35  ;;  %v4112_v35 = vor.u32 %v5225_v26, %v4111_v24  ;;  %v5069_v26 = vld [vmem:[#allocation2 + $0xfc] sm:$0xf0] }
  0x7e   :  { %2598 = vmatpush.bf16.msrb.mxu2 %v4348_v36  ;;  %v4496_v36 = vor.u32 %v5321_v28, %v4495_v27  ;;  %v3871_v27 = vld [vmem:[#allocation2 + $0x3d0] sm:$0xf]  ;;  %v4688_v28 = vor.u32 %v5369_v21, %v4687_v20  ;;  %v5399_v20 = vld [vmem:[#allocation2 + $0xb54] sm:$0xf]  ;;  %v4833_v21 = vld [vmem:[#allocation2 + $0xb80] sm:$0xf0] }
  0x7f   :  { %2611 = vmatpush.bf16.msrb.mxu3 %v4732_v40  ;;  %v4880_v40 = vor.u32 %v5417_v32, %v4879_v31  ;;  %v5261_v31 = vld [vmem:[#allocation2 + $0x6fc] sm:$0xf0]  ;;  %v4639_v32 = vld [vmem:[#allocation2 + $0x9d0] sm:$0xf] }
  0x80   :  { %2573 = vmatpush.bf16.msrb.mxu0 %v3532_v46  ;;  %v3680_v46 = vor.u32 %v5117_v38, %v3679_v37  ;;  %v3439_v37 = vld [vmem:[#allocation2 + $0x70] sm:$0xf]  ;;  %v5057_v38 = vld [vmem:[#allocation2 + $0x9c] sm:$0xf0] }
  0x81   :  { %2586 = vmatpush.bf16.msrb.mxu1 %v3916_v47  ;;  %v4064_v47 = vor.u32 %v5213_v41, %v4063_v39  ;;  %v3823_v39 = vld [vmem:[#allocation2 + $0x370] sm:$0xf]  ;;  %v5153_v41 = vld [vmem:[#allocation2 + $0x39c] sm:$0xf0] }
  0x82   :  { %2599 = vmatpush.bf16.msrb.mxu2 %v4300_v48  ;;  %v4448_v48 = vor.u32 %v5309_v43, %v4447_v42  ;;  %v4207_v42 = vld [vmem:[#allocation2 + $0x670] sm:$0xf]  ;;  %v5249_v43 = vld [vmem:[#allocation2 + $0x69c] sm:$0xf0] }
  0x83   :  { %2612 = vmatpush.bf16.msrb.mxu3 %v4684_v52  ;;  %v4832_v52 = vor.u32 %v5405_v45, %v4831_v44  ;;  %v4591_v44 = vld [vmem:[#allocation2 + $0x970] sm:$0xf]  ;;  %v5345_v45 = vld [vmem:[#allocation2 + $0x99c] sm:$0xf0] }
  0x84   :  { %2574 = vmatpush.bf16.msrb.mxu0 %v3484_v58  ;;  %v3632_v58 = vor.u32 %v5105_v50, %v3631_v49  ;;  %v3824_v49 = vor.u32 %v5153_v41, %v3823_v39  ;;  %v4208_v50 = vor.u32 %v5249_v43, %v4207_v42  ;;  %v5183_v39 = vld [vmem:[#allocation2 + $0x494] sm:$0xf]  ;;  %v3969_v41 = vld [vmem:[#allocation2 + $0x4c0] sm:$0xf0] }
  0x85   :  { %2587 = vmatpush.bf16.msrb.mxu1 %v3868_v59  ;;  %v4016_v59 = vor.u32 %v5201_v53, %v4015_v51  ;;  %v3775_v51 = vld [vmem:[#allocation2 + $0x310] sm:$0xf]  ;;  %v5279_v42 = vld [vmem:[#allocation2 + $0x794] sm:$0xf]  ;;  %v4353_v43 = vld [vmem:[#allocation2 + $0x7c0] sm:$0xf0] }
  0x86   :  { %2600 = vmatpush.bf16.msrb.mxu2 %v4252_v60  ;;  %v4400_v60 = vor.u32 %v5297_v55, %v4399_v54  ;;  %v4159_v53 = vld [vmem:[#allocation2 + $0x610] sm:$0xf]  ;;  %v4592_v54 = vor.u32 %v5345_v45, %v4591_v44  ;;  %v5237_v55 = vld [vmem:[#allocation2 + $0x63c] sm:$0xf0]  ;;  %v5375_v44 = vld [vmem:[#allocation2 + $0xa94] sm:$0xf] }
  0x87   :  { %2613 = vmatpush.bf16.msrb.mxu3 %v4636_v0  ;;  %v4784_v0 = vor.u32 %v5393_v57, %v4783_v56  ;;  %v4543_v56 = vld [vmem:[#allocation2 + $0x910] sm:$0xf]  ;;  %v5333_v57 = vld [vmem:[#allocation2 + $0x93c] sm:$0xf0]  ;;  %v4160_v3 = vor.u32 %v5237_v55, %v4159_v53  ;;  %v4737_v45 = vld [vmem:[#allocation2 + $0xac0] sm:$0xf0] }
  0x88   :  { %2575 = vmatpush.bf16.msrb.mxu0 %v3436_v8  ;;  %v3584_v8 = vor.u32 %v5093_v62, %v3583_v61  ;;  %v4113_v62 = vld [vmem:[#allocation2 + $0x5e0] sm:$0xf0]  ;;  %v4544_v7 = vor.u32 %v5333_v57, %v4543_v56  ;;  %v5363_v56 = vld [vmem:[#allocation2 + $0xa34] sm:$0xf] }
  0x89   :  { %2588 = vmatpush.bf16.msrb.mxu1 %v3820_v11  ;;  %v3535_v11 = vld [vmem:[#allocation2 + $0x130] sm:$0xf]  ;;  %v3921_v53 = vld [vmem:[#allocation2 + $0x460] sm:$0xf0] }
  0x8a   :  { %2601 = vmatpush.bf16.msrb.mxu2 %v4204_v12  ;;  %v5081_v12 = vld [vmem:[#allocation2 + $0x15c] sm:$0xf0]  ;;  %v4305_v55 = vld [vmem:[#allocation2 + $0x760] sm:$0xf0] }
  0x8b   :  { %2614 = vmatpush.bf16.msrb.mxu3 %v4588_v18  ;;  %v4303_v18 = vld [vmem:[#allocation2 + $0x730] sm:$0xf]  ;;  %v3536_v22 = vor.u32 %v5081_v12, %v3535_v11  ;;  %v5111_v11 = vld [vmem:[#allocation2 + $0x254] sm:$0xf]  ;;  %v3681_v12 = vld [vmem:[#allocation2 + $0x280] sm:$0xf0] }
  0x8c   :  { %2576 = vmatpush.bf16.msrb.mxu0 %v3388_v25  ;;  %v4304_v24 = vor.u32 %v5273_v19, %v4303_v18  ;;  %v3487_v25 = vld [vmem:[#allocation2 + $0xd0] sm:$0xf]  ;;  %v5303_v18 = vld [vmem:[#allocation2 + $0x854] sm:$0xf]  ;;  %v4449_v19 = vld [vmem:[#allocation2 + $0x880] sm:$0xf0] }
  0x8d   :  { %2589 = vmatpush.bf16.msrb.mxu1 %v3772_v29  ;;  %v5165_v29 = vld [vmem:[#allocation2 + $0x3fc] sm:$0xf0]  ;;  %v4689_v57 = vld [vmem:[#allocation2 + $0xa60] sm:$0xf0] }
  0x8e   :  { %2602 = vmatpush.bf16.msrb.mxu2 %v4156_v30  ;;  %v4255_v30 = vld [vmem:[#allocation2 + $0x6d0] sm:$0xf] }
  0x8f   :  { %2615 = vmatpush.bf16.msrb.mxu3 %v4540_v33  ;;  %2577 = vmatmul.bf16.vlgmr.msrb.gmra.mxu0 %v5596_v14  ;;  %v5357_v33 = vld [vmem:[#allocation2 + $0x9fc] sm:$0xf0] }
  0x90   :  { %2621 = vmatpush.bf16.msra.mxu0 %v3728_v34  ;;  %2590 = vmatmul.bf16.vlgmr.msrb.gmra.mxu1 %v5598_v15  ;;  %v3488_v34 = vor.u32 %v5069_v26, %v3487_v25  ;;  %v5099_v25 = vld [vmem:[#allocation2 + $0x1f4] sm:$0xf]  ;;  %v3633_v26 = vld [vmem:[#allocation2 + $0x220] sm:$0xf0] }
  0x91   :  { %2634 = vmatpush.bf16.msra.mxu1 %v4112_v35  ;;  %2603 = vmatmul.bf16.vlgmr.msrb.gmra.mxu2 %v5588_v1  ;;  %v3872_v35 = vor.u32 %v5165_v29, %v3871_v27  ;;  %v5195_v27 = vld [vmem:[#allocation2 + $0x4f4] sm:$0xf]  ;;  %v4017_v29 = vld [vmem:[#allocation2 + $0x520] sm:$0xf0] }
  0x92   :  { %2647 = vmatpush.bf16.msra.mxu2 %v4496_v36  ;;  %2616 = vmatmul.bf16.vlgmr.msrb.gmra.mxu3 %v5593_v6  ;;  %v4256_v36 = vor.u32 %v5261_v31, %v4255_v30  ;;  %v5291_v30 = vld [vmem:[#allocation2 + $0x7f4] sm:$0xf]  ;;  %v4401_v31 = vld [vmem:[#allocation2 + $0x820] sm:$0xf0] }
  0x93   :  { %2660 = vmatpush.bf16.msra.mxu3 %v4880_v40  ;;  %v4640_v40 = vor.u32 %v5357_v33, %v4639_v32  ;;  %v5387_v32 = vld [vmem:[#allocation2 + $0xaf4] sm:$0xf]  ;;  %v4785_v33 = vld [vmem:[#allocation2 + $0xb20] sm:$0xf0] }
  0x94   :  { %2622 = vmatpush.bf16.msra.mxu0 %v3680_v46  ;;  %v3440_v46 = vor.u32 %v5057_v38, %v3439_v37  ;;  %v5087_v37 = vld [vmem:[#allocation2 + $0x194] sm:$0xf]  ;;  %v3585_v38 = vld [vmem:[#allocation2 + $0x1c0] sm:$0xf0] }
  0x95   :  { %2635 = vmatpush.bf16.msra.mxu1 %v4064_v47  ;;  %v3391_v47 = vld [vmem:[#allocation2 + $0x10] sm:$0xf] }
  0x96   :  { %2648 = vmatpush.bf16.msra.mxu2 %v4448_v48  ;;  %v5045_v48 = vld [vmem:[#allocation2 + $0x3c] sm:$0xf0] }
  0x97   :  { %2661 = vmatpush.bf16.msra.mxu3 %v4832_v52  ;;  %v5141_v52 = vld [vmem:[#allocation2 + $0x33c] sm:$0xf0]  ;;  %v3392_v61 = vor.u32 %v5045_v48, %v3391_v47  ;;  %v3972_v47 = vor.u32 %v5183_v39, %v3969_v41  ;;  %v4356_v48 = vor.u32 %v5279_v42, %v4353_v43  ;;  %v4545_v39 = vld [vmem:[#allocation2 + $0x940] sm:$0xf0]  ;;  %v5130_v41 = vld [vmem:[#allocation2 + $0x2e4] sm:$0xf0] }
  0x98   :  { %2623 = vmatpush.bf16.msra.mxu0 %v3632_v58  ;;  %v5123_v58 = vld [vmem:[#allocation2 + $0x2b4] sm:$0xf]  ;;  %v3776_v2 = vor.u32 %v5141_v52, %v3775_v51  ;;  %v4740_v52 = vor.u32 %v5375_v44, %v4737_v45  ;;  %v4119_v42 = vld [vmem:[#allocation2 + $0x5b8] sm:$0xf]  ;;  %v5226_v45 = vld [vmem:[#allocation2 + $0x5e4] sm:$0xf0] }
  0x99   :  { %2636 = vmatpush.bf16.msra.mxu1 %v4016_v59  ;;  %v3729_v59 = vld [vmem:[#allocation2 + $0x2e0] sm:$0xf0]  ;;  %v5171_v51 = vld [vmem:[#allocation2 + $0x434] sm:$0xf] }
  0x9a   :  { %2649 = vmatpush.bf16.msra.mxu2 %v4400_v60  ;;  %v5219_v60 = vld [vmem:[#allocation2 + $0x5b4] sm:$0xf] }
  0x9b   :  { %2662 = vmatpush.bf16.msra.mxu3 %v4784_v0  ;;  %v4497_v0 = vld [vmem:[#allocation2 + $0x8e0] sm:$0xf0] }
  0x9c   :  { %2624 = vmatpush.bf16.msra.mxu0 %v3584_v8  ;;  %v3732_v8 = vor.u32 %v5123_v58, %v3729_v59 }
  0x9d   :  { %2637 = vmatpush.bf16.msra.mxu1 %v3968_v9  ;;  %v4116_v9 = vor.u32 %v5219_v60, %v4113_v62  ;;  %v3924_v60 = vor.u32 %v5171_v51, %v3921_v53  ;;  %v5063_v62 = vld [vmem:[#allocation2 + $0xd4] sm:$0xf]  ;;  %v5418_v51 = vld [vmem:[#allocation2 + $0xbe4] sm:$0xf0] }
  0x9e   :  { %2650 = vmatpush.bf16.msra.mxu2 %v4352_v10  ;;  %v4500_v10 = vor.u32 %v5315_v63, %v4497_v0  ;;  %v3489_v63 = vld [vmem:[#allocation2 + $0x100] sm:$0xf0]  ;;  %v5159_v0 = vld [vmem:[#allocation2 + $0x3d4] sm:$0xf] }
  0x9f   :  { %2663 = vmatpush.bf16.msra.mxu3 %v4736_v16  ;;  %v4884_v16 = vor.u32 %v5411_v4, %v4881_v5  ;;  %v3873_v4 = vld [vmem:[#allocation2 + $0x400] sm:$0xf0]  ;;  %v5255_v5 = vld [vmem:[#allocation2 + $0x6d4] sm:$0xf] }
  0xa0   :  { %2625 = vmatpush.bf16.msra.mxu0 %v3536_v22  ;;  %v3684_v22 = vor.u32 %v5111_v11, %v3681_v12  ;;  %v3492_v11 = vor.u32 %v5063_v62, %v3489_v63  ;;  %v3876_v12 = vor.u32 %v5159_v0, %v3873_v4  ;;  %v5214_v63 = vld [vmem:[#allocation2 + $0x584] sm:$0xf0]  ;;  %v4455_v0 = vld [vmem:[#allocation2 + $0x858] sm:$0xf] }
  0xa1   :  { %2638 = vmatpush.bf16.msra.mxu1 %v3920_v23  ;;  %v4068_v23 = vor.u32 %v5207_v13, %v4065_v17  ;;  %v3441_v17 = vld [vmem:[#allocation2 + $0xa0] sm:$0xf0]  ;;  %v4839_v4 = vld [vmem:[#allocation2 + $0xb58] sm:$0xf] }
  0xa2   :  { %2651 = vmatpush.bf16.msra.mxu2 %v4304_v24  ;;  %v4452_v24 = vor.u32 %v5303_v18, %v4449_v19  ;;  %v5147_v18 = vld [vmem:[#allocation2 + $0x374] sm:$0xf] }
  0xa3   :  { %2664 = vmatpush.bf16.msra.mxu3 %v4688_v28  ;;  %v4836_v28 = vor.u32 %v5399_v20, %v4833_v21  ;;  %v3825_v20 = vld [vmem:[#allocation2 + $0x3a0] sm:$0xf0]  ;;  %v5243_v21 = vld [vmem:[#allocation2 + $0x674] sm:$0xf] }
  0xa4   :  { %2626 = vmatpush.bf16.msra.mxu0 %v3488_v34  ;;  %v3636_v34 = vor.u32 %v5099_v25, %v3633_v26  ;;  %v4593_v25 = vld [vmem:[#allocation2 + $0x9a0] sm:$0xf0] }
  0xa5   :  { %2639 = vmatpush.bf16.msra.mxu1 %v3872_v35  ;;  %v4020_v35 = vor.u32 %v5195_v27, %v4017_v29  ;;  %v5039_v27 = vld [vmem:[#allocation2 + $0x14] sm:$0xf] }
  0xa6   :  { %2652 = vmatpush.bf16.msra.mxu2 %v4256_v36  ;;  %v4404_v36 = vor.u32 %v5291_v30, %v4401_v31  ;;  %v3828_v30 = vor.u32 %v5147_v18, %v3825_v20  ;;  %v5202_v18 = vld [vmem:[#allocation2 + $0x524] sm:$0xf0] }
  0xa7   :  { %2665 = vmatpush.bf16.msra.mxu3 %v4640_v40  ;;  %v4788_v40 = vor.u32 %v5387_v32, %v4785_v33  ;;  %v5135_v32 = vld [vmem:[#allocation2 + $0x314] sm:$0xf]  ;;  %v3777_v33 = vld [vmem:[#allocation2 + $0x340] sm:$0xf0]  ;;  %v5298_v20 = vld [vmem:[#allocation2 + $0x824] sm:$0xf0] }
  0xa8   :  { %2627 = vmatpush.bf16.msra.mxu0 %v3440_v46  ;;  %v3588_v46 = vor.u32 %v5087_v37, %v3585_v38  ;;  %v4161_v37 = vld [vmem:[#allocation2 + $0x640] sm:$0xf0]  ;;  %v5327_v38 = vld [vmem:[#allocation2 + $0x914] sm:$0xf] }
  0xa9   :  { %2640 = vmatpush.bf16.msra.mxu1 %v3824_v49  ;;  %v5075_v49 = vld [vmem:[#allocation2 + $0x134] sm:$0xf]  ;;  %v4548_v53 = vor.u32 %v5327_v38, %v4545_v39 }
  0xaa   :  { %2653 = vmatpush.bf16.msra.mxu2 %v4208_v50  ;;  %v3537_v50 = vld [vmem:[#allocation2 + $0x160] sm:$0xf0] }
  0xab   :  { %2666 = vmatpush.bf16.msra.mxu3 %v4592_v54  ;;  %v5267_v54 = vld [vmem:[#allocation2 + $0x734] sm:$0xf]  ;;  %v3540_v58 = vor.u32 %v5075_v49, %v3537_v50  ;;  %v4887_v50 = vld [vmem:[#allocation2 + $0xbb8] sm:$0xf] }
  0xac   :  { %2628 = vmatpush.bf16.msra.mxu0 %v3392_v61  ;;  %v4308_v61 = vor.u32 %v5267_v54, %v4305_v55  ;;  %v4888_v62 = vor.u32 %v5418_v51, %v4887_v50  ;;  %v5274_v50 = vld [vmem:[#allocation2 + $0x764] sm:$0xf0] }
  0xad   :  { %2641 = vmatpush.bf16.msra.mxu1 %v3776_v2 }
  0xae   :  { %2654 = vmatpush.bf16.msra.mxu2 %v4160_v3  ;;  %v4692_v3 = vor.u32 %v5363_v56, %v4689_v57  ;;  %v4120_v56 = vor.u32 %v5226_v45, %v4119_v42  ;;  %v5082_v45 = vld [vmem:[#allocation2 + $0x164] sm:$0xf0] }
  0xaf   :  { %2667 = vmatpush.bf16.msra.mxu3 %v4544_v7  ;;  %2629 = vmatmul.bf16.vlgmr.msra.gmra.mxu0 %v5596_v14  ;;  %v4257_v7 = vld [vmem:[#allocation2 + $0x700] sm:$0xf0] }
  0xb0   :  { %2673 = vmatpush.bf16.msrb.mxu0 %v3732_v8  ;;  %2642 = vmatmul.bf16.vlgmr.msra.gmra.mxu1 %v5598_v15  ;;  %v5619_v59 = vpop.f32.mrf.mxu0  ;;  %v5351_v8 = vld [vmem:[#allocation2 + $0x9d4] sm:$0xf]  ;;  %v4260_v13 = vor.u32 %v5255_v5, %v4257_v7  ;;  %v5406_v5 = vld [vmem:[#allocation2 + $0xb84] sm:$0xf0] }
  0xb1   :  { %2686 = vmatpush.bf16.msrb.mxu1 %v4116_v9  ;;  %2655 = vmatmul.bf16.vlgmr.msra.gmra.mxu2 %v5588_v1  ;;  %v5621_v2 = vpop.f32.mrf.mxu1  ;;  %v4641_v9 = vld [vmem:[#allocation2 + $0xa00] sm:$0xf0] }
  0xb2   :  { %2699 = vmatpush.bf16.msrb.mxu2 %v4500_v10  ;;  %2668 = vmatmul.bf16.vlgmr.msra.gmra.mxu3 %v5593_v6  ;;  %v4644_v19 = vor.u32 %v5351_v8, %v4641_v9 }
  0xb3   :  { %2712 = vmatpush.bf16.msrb.mxu3 %v4884_v16  ;;  %v5051_v16 = vld [vmem:[#allocation2 + $0x74] sm:$0xf] }
  0xb4   :  { %2674 = vmatpush.bf16.msrb.mxu0 %v3684_v22  ;;  %v5623_v10 = vpop.f32.mrf.mxu2  ;;  %v4209_v22 = vld [vmem:[#allocation2 + $0x6a0] sm:$0xf0]  ;;  %v3444_v26 = vor.u32 %v5051_v16, %v3441_v17  ;;  %v4023_v16 = vld [vmem:[#allocation2 + $0x4f8] sm:$0xf]  ;;  %v4840_v17 = vor.u32 %v5406_v5, %v4839_v4  ;;  %v5166_v4 = vld [vmem:[#allocation2 + $0x404] sm:$0xf0] }
  0xb5   :  { %2687 = vmatpush.bf16.msrb.mxu1 %v4068_v23  ;;  %v5625_v23 = vpop.f32.mrf.mxu3  ;;  %v4212_v31 = vor.u32 %v5243_v21, %v4209_v22  ;;  %v4791_v21 = vld [vmem:[#allocation2 + $0xaf8] sm:$0xf]  ;;  %v5394_v22 = vld [vmem:[#allocation2 + $0xb24] sm:$0xf0] }
  0xb6   :  { %2700 = vmatpush.bf16.msrb.mxu2 %v4452_v24  ;;  %v5339_v24 = vld [vmem:[#allocation2 + $0x974] sm:$0xf]  ;;  %v4263_v5 = vld [vmem:[#allocation2 + $0x6d8] sm:$0xf] }
  0xb7   :  { %2713 = vmatpush.bf16.msrb.mxu3 %v4836_v28  ;;  %v3393_v28 = vld [vmem:[#allocation2 + $0x40] sm:$0xf0] }
  0xb8   :  { %2675 = vmatpush.bf16.msrb.mxu0 %v3636_v34  ;;  %v2424_v29 = vpop.f32.mrf.mxu0  ;;  %v5231_v34 = vld [vmem:[#allocation2 + $0x614] sm:$0xf]  ;;  %v3396_v44 = vor.u32 %v5039_v27, %v3393_v28  ;;  %v4024_v27 = vor.u32 %v5202_v18, %v4023_v16  ;;  %v3447_v18 = vld [vmem:[#allocation2 + $0x78] sm:$0xf] }
  0xb9   :  { %2688 = vmatpush.bf16.msrb.mxu1 %v4020_v35  ;;  %v2437_v35 = vpop.f32.mrf.mxu1  ;;  %v4164_v49 = vor.u32 %v5231_v34, %v4161_v37  ;;  %v5094_v29 = vld [vmem:[#allocation2 + $0x1c4] sm:$0xf0]  ;;  %v4359_v34 = vld [vmem:[#allocation2 + $0x798] sm:$0xf] }
  0xba   :  { %2701 = vmatpush.bf16.msrb.mxu2 %v4404_v36  ;;  %v4596_v36 = vor.u32 %v5339_v24, %v4593_v25  ;;  %v5286_v35 = vld [vmem:[#allocation2 + $0x7c4] sm:$0xf0] }
  0xbb   :  { %2714 = vmatpush.bf16.msrb.mxu3 %v4788_v40  ;;  %v3735_v40 = vld [vmem:[#allocation2 + $0x2b8] sm:$0xf] }
  0xbc   :  { %2676 = vmatpush.bf16.msrb.mxu0 %v3588_v46  ;;  %v2450_v43 = vpop.f32.mrf.mxu2  ;;  %v4503_v46 = vld [vmem:[#allocation2 + $0x8b8] sm:$0xf]  ;;  %v3736_v54 = vor.u32 %v5130_v41, %v3735_v40  ;;  %v4360_v41 = vor.u32 %v5286_v35, %v4359_v34  ;;  %v5142_v35 = vld [vmem:[#allocation2 + $0x344] sm:$0xf0] }
  0xbd   :  { %2689 = vmatpush.bf16.msrb.mxu1 %v3972_v47  ;;  %v5322_v47 = vld [vmem:[#allocation2 + $0x8e4] sm:$0xf0]  ;;  %v2463_v55 = vpop.f32.mrf.mxu3  ;;  %v3783_v34 = vld [vmem:[#allocation2 + $0x318] sm:$0xf] }
  0xbe   :  { %2702 = vmatpush.bf16.msrb.mxu2 %v4356_v48  ;;  %v3780_v48 = vor.u32 %v5135_v32, %v3777_v33  ;;  %v4504_v57 = vor.u32 %v5322_v47, %v4503_v46  ;;  %v4792_v32 = vor.u32 %v5394_v22, %v4791_v21  ;;  %v5190_v33 = vld [vmem:[#allocation2 + $0x4c4] sm:$0xf0]  ;;  %v3927_v46 = vld [vmem:[#allocation2 + $0x438] sm:$0xf] }
  0xbf   :  { %2715 = vmatpush.bf16.msrb.mxu3 %v4740_v52  ;;  %v5627_v52 = vld [vmem:[#allocation4] sm:$0xff] }
  0xc0   :  { %2677 = vmatpush.bf16.msrb.mxu0 %v3540_v58  ;;  %v3687_v58 = vld [vmem:[#allocation2 + $0x258] sm:$0xf]  ;;  %v455_v7 = vperm.slane %v5627_v52, 0 }
  0xc1   :  { %2690 = vmatpush.bf16.msrb.mxu1 %v3924_v60  ;;  %v5118_v60 = vld [vmem:[#allocation2 + $0x284] sm:$0xf0] }
  0xc2   :  { %2703 = vmatpush.bf16.msrb.mxu2 %v4308_v61  ;;  %v4071_v61 = vld [vmem:[#allocation2 + $0x558] sm:$0xf]  ;;  %v3688_v8 = vor.u32 %v5118_v60, %v3687_v58  ;;  %v2423_v24 = vadd.f32 %v5619_v59, %v455_v7  ;;  %v5382_v59 = vld [vmem:[#allocation2 + $0xac4] sm:$0xf0] }
  0xc3   :  { %2716 = vmatpush.bf16.msrb.mxu3 %v4692_v3  ;;  %v5310_v3 = vld [vmem:[#allocation2 + $0x884] sm:$0xf0]  ;;  %v4072_v9 = vor.u32 %v5214_v63, %v4071_v61  ;;  %v3495_v60 = vld [vmem:[#allocation2 + $0xd8] sm:$0xf] }
  0xc4   :  { %2678 = vmatpush.bf16.msrb.mxu0 %v3492_v11  ;;  %v4456_v11 = vor.u32 %v5310_v3, %v4455_v0  ;;  %v2436_v37 = vadd.f32 %v5621_v2, %v2423_v24  ;;  %v5370_v2 = vld [vmem:[#allocation2 + $0xa64] sm:$0xf0] }
  0xc5   :  { %2691 = vmatpush.bf16.msrb.mxu1 %v3876_v12  ;;  %v3639_v12 = vld [vmem:[#allocation2 + $0x1f8] sm:$0xf]  ;;  %v5070_v61 = vld [vmem:[#allocation2 + $0x104] sm:$0xf0] }
  0xc6   :  { %2704 = vmatpush.bf16.msrb.mxu2 %v4260_v13  ;;  %v5106_v13 = vld [vmem:[#allocation2 + $0x224] sm:$0xf0] }
  0xc7   :  { %2717 = vmatpush.bf16.msrb.mxu3 %v4644_v19  ;;  %v4407_v19 = vld [vmem:[#allocation2 + $0x7f8] sm:$0xf]  ;;  %v3640_v25 = vor.u32 %v5106_v13, %v3639_v12  ;;  %v5262_v7 = vld [vmem:[#allocation2 + $0x704] sm:$0xf0]  ;;  %v3496_v12 = vor.u32 %v5070_v61, %v3495_v60  ;;  %v5208_v60 = vld [vmem:[#allocation2 + $0x55c] sm:$0xf] }
  0xc8   :  { %2679 = vmatpush.bf16.msrb.mxu0 %v3444_v26  ;;  %v3591_v26 = vld [vmem:[#allocation2 + $0x198] sm:$0xf]  ;;  %v4408_v28 = vor.u32 %v5298_v20, %v4407_v19  ;;  %v5058_v19 = vld [vmem:[#allocation2 + $0xa4] sm:$0xf0] }
  0xc9   :  { %2692 = vmatpush.bf16.msrb.mxu1 %v3828_v30  ;;  %v3975_v30 = vld [vmem:[#allocation2 + $0x498] sm:$0xf]  ;;  %v3592_v38 = vor.u32 %v5094_v29, %v3591_v26  ;;  %v3448_v29 = vor.u32 %v5058_v19, %v3447_v18  ;;  %v5388_v18 = vld [vmem:[#allocation2 + $0xafc] sm:$0xf]  ;;  %v4793_v19 = vld [vmem:[#allocation2 + $0xb28] sm:$0xf0] }
  0xca   :  { %2705 = vmatpush.bf16.msrb.mxu2 %v4212_v31  ;;  %v456_v31 = vperm.slane %v5627_v52, 1  ;;  %v3976_v40 = vor.u32 %v5190_v33, %v3975_v30  ;;  %v3831_v20 = vld [vmem:[#allocation2 + $0x378] sm:$0xf] }
  0xcb   :  { %2718 = vmatpush.bf16.msrb.mxu3 %v4596_v36  ;;  %v4743_v36 = vld [vmem:[#allocation2 + $0xa98] sm:$0xf] }
  0xcc   :  { %2680 = vmatpush.bf16.msrb.mxu0 %v3396_v44  ;;  %v2474_v39 = vpop.f32.mrf.mxu0  ;;  %v3543_v44 = vld [vmem:[#allocation2 + $0x138] sm:$0xf]  ;;  %v4744_v47 = vor.u32 %v5382_v59, %v4743_v36 }
  0xcd   :  { %2693 = vmatpush.bf16.msrb.mxu1 %v3780_v48  ;;  %v2475_v42 = vadd.f32 %v2474_v39, %v456_v31  ;;  %v2487_v43 = vpop.f32.mrf.mxu1  ;;  %v5178_v48 = vld [vmem:[#allocation2 + $0x464] sm:$0xf0]  ;;  %v3544_v55 = vor.u32 %v5082_v45, %v3543_v44  ;;  %v4215_v26 = vld [vmem:[#allocation2 + $0x678] sm:$0xf]  ;;  %v5220_v44 = vld [vmem:[#allocation2 + $0x5bc] sm:$0xf] }
  0xce   :  { %2706 = vmatpush.bf16.msrb.mxu2 %v4164_v49  ;;  %v4311_v49 = vld [vmem:[#allocation2 + $0x738] sm:$0xf]  ;;  %v5046_v31 = vld [vmem:[#allocation2 + $0x44] sm:$0xf0] }
  0xcf   :  { %2719 = vmatpush.bf16.msrb.mxu3 %v4548_v53  ;;  %2681 = vmatmul.bf16.vlgmr.msrb.gmra.mxu0 %v5596_v14  ;;  %v2488_v51 = vadd.f32 %v2487_v43, %v2475_v42  ;;  %v4695_v53 = vld [vmem:[#allocation2 + $0xa38] sm:$0xf]  ;;  %v5124_v42 = vld [vmem:[#allocation2 + $0x2bc] sm:$0xf]  ;;  %v3737_v43 = vld [vmem:[#allocation2 + $0x2e8] sm:$0xf0] }
  0xd0   :  { %2725 = vmatpush.bf16.msra.mxu0 %v3736_v54  ;;  %2694 = vmatmul.bf16.vlgmr.msrb.gmra.mxu1 %v5598_v15  ;;  %v2449_v54 = vadd.f32 %v5623_v10, %v2436_v37  ;;  %v4696_v63 = vor.u32 %v5370_v2, %v4695_v53  ;;  %v3399_v30 = vld [vmem:[#allocation2 + $0x18] sm:$0xf]  ;;  %v4889_v53 = vld [vmem:[#allocation2 + $0xbe8] sm:$0xf0] }
  0xd1   :  { %2738 = vmatpush.bf16.msra.mxu1 %v4120_v56  ;;  %2707 = vmatmul.bf16.vlgmr.msrb.gmra.mxu2 %v5588_v1  ;;  %v3928_v56 = vor.u32 %v5178_v48, %v3927_v46  ;;  %v4167_v36 = vld [vmem:[#allocation2 + $0x618] sm:$0xf]  ;;  %v3400_v45 = vor.u32 %v5046_v31, %v3399_v30  ;;  %v4121_v46 = vld [vmem:[#allocation2 + $0x5e8] sm:$0xf0]  ;;  %v5376_v30 = vld [vmem:[#allocation2 + $0xa9c] sm:$0xf] }
  0xd2   :  { %2751 = vmatpush.bf16.msra.mxu2 %v4504_v57  ;;  %2720 = vmatmul.bf16.vlgmr.msrb.gmra.mxu3 %v5593_v6  ;;  %v4312_v57 = vor.u32 %v5274_v50, %v4311_v49  ;;  %v2462_v10 = vadd.f32 %v5625_v23, %v2449_v54  ;;  %v5346_v23 = vld [vmem:[#allocation2 + $0x9a4] sm:$0xf0]  ;;  %v4551_v39 = vld [vmem:[#allocation2 + $0x918] sm:$0xf]  ;;  %v4505_v48 = vld [vmem:[#allocation2 + $0x8e8] sm:$0xf0]  ;;  %v3784_v49 = vor.u32 %v5142_v35, %v3783_v34 }
  0xd3   :  { %2764 = vmatpush.bf16.msra.mxu3 %v4888_v62  ;;  %v3879_v62 = vld [vmem:[#allocation2 + $0x3d8] sm:$0xf]  ;;  %v3740_v54 = vor.u32 %v5124_v42, %v3737_v43  ;;  %v4745_v31 = vld [vmem:[#allocation2 + $0xac8] sm:$0xf0]  ;;  %v5364_v43 = vld [vmem:[#allocation2 + $0xa3c] sm:$0xf] }
  0xd4   :  { %2726 = vmatpush.bf16.msra.mxu0 %v3688_v8  ;;  %v2500_v58 = vpop.f32.mrf.mxu2  ;;  %v4647_v8 = vld [vmem:[#allocation2 + $0x9d8] sm:$0xf]  ;;  %v2476_v13 = vpop.f32.mrf.mxu0  ;;  %v3880_v16 = vor.u32 %v5166_v4, %v3879_v62  ;;  %v4073_v62 = vld [vmem:[#allocation2 + $0x588] sm:$0xf0] }
  0xd5   :  { %2739 = vmatpush.bf16.msra.mxu1 %v4072_v9  ;;  %v2501_v0 = vadd.f32 %v2500_v58, %v2488_v51  ;;  %v2513_v3 = vpop.f32.mrf.mxu3  ;;  %v5358_v9 = vld [vmem:[#allocation2 + $0xa04] sm:$0xf0]  ;;  %v2489_v21 = vpop.f32.mrf.mxu1  ;;  %v5412_v51 = vld [vmem:[#allocation2 + $0xbbc] sm:$0xf]  ;;  %v3689_v58 = vld [vmem:[#allocation2 + $0x288] sm:$0xf0] }
  0xd6   :  { %2752 = vmatpush.bf16.msra.mxu2 %v4456_v11  ;;  %v4648_v24 = vor.u32 %v5358_v9, %v4647_v8  ;;  %v4892_v61 = vor.u32 %v5412_v51, %v4889_v53  ;;  %v4841_v4 = vld [vmem:[#allocation2 + $0xb88] sm:$0xf0]  ;;  %v5100_v9 = vld [vmem:[#allocation2 + $0x1fc] sm:$0xf] }
  0xd7   :  { %2765 = vmatpush.bf16.msra.mxu3 %v4840_v17  ;;  %v2514_v11 = vadd.f32 %v2513_v3, %v2501_v0  ;;  %v4264_v17 = vor.u32 %v5262_v7, %v4263_v5  ;;  %v4457_v0 = vld [vmem:[#allocation2 + $0x888] sm:$0xf0]  ;;  %v5400_v3 = vld [vmem:[#allocation2 + $0xb5c] sm:$0xf]  ;;  %v4076_v7 = vor.u32 %v5208_v60, %v4073_v62 }
  0xd8   :  { %2727 = vmatpush.bf16.msra.mxu0 %v3640_v25  ;;  %v5154_v25 = vld [vmem:[#allocation2 + $0x3a4] sm:$0xf0]  ;;  %v4025_v13 = vld [vmem:[#allocation2 + $0x528] sm:$0xf0] }
  0xd9   :  { %2740 = vmatpush.bf16.msra.mxu1 %v4024_v27  ;;  %v3037_v22 = vpack.c.bf16 %v2514_v11, %v2462_v10  ;;  %v5250_v27 = vld [vmem:[#allocation2 + $0x6a4] sm:$0xf0]  ;;  %v3641_v10 = vld [vmem:[#allocation2 + $0x228] sm:$0xf0]  ;;  %v5196_v11 = vld [vmem:[#allocation2 + $0x4fc] sm:$0xf] }
  0xda   :  { %2753 = vmatpush.bf16.msra.mxu2 %v4408_v28  ;;  %v4599_v28 = vld [vmem:[#allocation2 + $0x978] sm:$0xf]  ;;  %v4216_v33 = vor.u32 %v5250_v27, %v4215_v26  ;;  %v4028_v21 = vor.u32 %v5196_v11, %v4025_v13  ;;  %v5184_v26 = vld [vmem:[#allocation2 + $0x49c] sm:$0xf]  ;;  %v4796_v27 = vor.u32 %v5388_v18, %v4793_v19  ;;  %v4313_v42 = vld [vmem:[#allocation2 + $0x768] sm:$0xf0] }
  0xdb   :  { %2766 = vmatpush.bf16.msra.mxu3 %v4792_v32  ;;  %3043 = vst [vmem:[%s5833_s5] sm:$0xff] %v3037_v22  ;;  %v3832_v32 = vor.u32 %v5154_v25, %v3831_v20  ;;  %v4600_v37 = vor.u32 %v5346_v23, %v4599_v28  ;;  %v3644_v20 = vor.u32 %v5100_v9, %v3641_v10  ;;  %v3593_v25 = vld [vmem:[#allocation2 + $0x1c8] sm:$0xf0]  ;;  %v5280_v23 = vld [vmem:[#allocation2 + $0x79c] sm:$0xf] }
  0xdc   :  { %2728 = vmatpush.bf16.msra.mxu0 %v3592_v38  ;;  %v2502_v59 = vpop.f32.mrf.mxu2  ;;  %v5238_v38 = vld [vmem:[#allocation2 + $0x644] sm:$0xf0]  ;;  %v3977_v28 = vld [vmem:[#allocation2 + $0x4c8] sm:$0xf0]  ;;  %v5244_v9 = vld [vmem:[#allocation2 + $0x67c] sm:$0xf] }
  0xdd   :  { %2741 = vmatpush.bf16.msra.mxu1 %v3976_v40  ;;  %v5334_v40 = vld [vmem:[#allocation2 + $0x944] sm:$0xf0]  ;;  %v4168_v50 = vor.u32 %v5238_v38, %v4167_v36  ;;  %v3980_v34 = vor.u32 %v5184_v26, %v3977_v28  ;;  %v5076_v36 = vld [vmem:[#allocation2 + $0x13c] sm:$0xf]  ;;  %v3545_v59 = vld [vmem:[#allocation2 + $0x168] sm:$0xf0] }
  0xde   :  { %2754 = vmatpush.bf16.msra.mxu2 %v4360_v41  ;;  %v2515_v41 = vpop.f32.mrf.mxu3  ;;  %v4552_v2 = vor.u32 %v5334_v40, %v4551_v39  ;;  %v4748_v39 = vor.u32 %v5376_v30, %v4745_v31  ;;  %v3929_v40 = vld [vmem:[#allocation2 + $0x468] sm:$0xf0]  ;;  %v5340_v11 = vld [vmem:[#allocation2 + $0x97c] sm:$0xf]  ;;  %v5131_v30 = vld [vmem:[#allocation2 + $0x2ec] sm:$0xf0] }
  0xdf   :  { %2767 = vmatpush.bf16.msra.mxu3 %v4744_v47  ;;  %v5316_v47 = vld [vmem:[#allocation2 + $0x8bc] sm:$0xf]  ;;  %v4217_v10 = vld [vmem:[#allocation2 + $0x6a8] sm:$0xf0]  ;;  %v4127_v31 = vld [vmem:[#allocation2 + $0x5c0] sm:$0xf] }
  0xe0   :  { %2729 = vmatpush.bf16.msra.mxu0 %v3544_v55  ;;  %v4124_v55 = vor.u32 %v5220_v44, %v4121_v46  ;;  %v5268_v41 = vld [vmem:[#allocation2 + $0x73c] sm:$0xf]  ;;  %v4697_v44 = vld [vmem:[#allocation2 + $0xa68] sm:$0xf0]  ;;  %v4220_v19 = vor.u32 %v5244_v9, %v4217_v10 }
  0xe1   :  { %2742 = vmatpush.bf16.msra.mxu1 %v3928_v56  ;;  %v4508_v56 = vor.u32 %v5316_v47, %v4505_v48  ;;  %v4316_v47 = vor.u32 %v5268_v41, %v4313_v42  ;;  %v5064_v48 = vld [vmem:[#allocation2 + $0xdc] sm:$0xf]  ;;  %v4700_v53 = vor.u32 %v5364_v43, %v4697_v44  ;;  %v4169_v26 = vld [vmem:[#allocation2 + $0x648] sm:$0xf0] }
  0xe2   :  { %2755 = vmatpush.bf16.msra.mxu2 %v4312_v57  ;;  %v5112_v57 = vld [vmem:[#allocation2 + $0x25c] sm:$0xf]  ;;  %v4553_v28 = vld [vmem:[#allocation2 + $0x948] sm:$0xf0] }
  0xe3   :  { %2768 = vmatpush.bf16.msra.mxu3 %v4696_v63  ;;  %v5304_v63 = vld [vmem:[#allocation2 + $0x85c] sm:$0xf]  ;;  %v3692_v5 = vor.u32 %v5112_v57, %v3689_v58  ;;  %v4649_v58 = vld [vmem:[#allocation2 + $0xa08] sm:$0xf0] }
  0xe4   :  { %2730 = vmatpush.bf16.msra.mxu0 %v3496_v12  ;;  %v4460_v8 = vor.u32 %v5304_v63, %v4457_v0  ;;  %v4844_v12 = vor.u32 %v5400_v3, %v4841_v4  ;;  %v5352_v57 = vld [vmem:[#allocation2 + $0x9dc] sm:$0xf]  ;;  %v3449_v3 = vld [vmem:[#allocation2 + $0xa8] sm:$0xf0] }
  0xe5   :  { %2743 = vmatpush.bf16.msra.mxu1 %v3880_v16  ;;  %v5292_v16 = vld [vmem:[#allocation2 + $0x7fc] sm:$0xf] }
  0xe6   :  { %2756 = vmatpush.bf16.msra.mxu2 %v4264_v17  ;;  %v4409_v17 = vld [vmem:[#allocation2 + $0x828] sm:$0xf0]  ;;  %v5052_v0 = vld [vmem:[#allocation2 + $0x7c] sm:$0xf] }
  0xe7   :  { %2769 = vmatpush.bf16.msra.mxu3 %v4648_v24  ;;  %v4412_v22 = vor.u32 %v5292_v16, %v4409_v17  ;;  %v5088_v24 = vld [vmem:[#allocation2 + $0x19c] sm:$0xf]  ;;  %v3452_v13 = vor.u32 %v5052_v0, %v3449_v3  ;;  %v3401_v17 = vld [vmem:[#allocation2 + $0x48] sm:$0xf0]  ;;  %v5203_v3 = vld [vmem:[#allocation2 + $0x52c] sm:$0xf0] }
  0xe8   :  { %2731 = vmatpush.bf16.msra.mxu0 %v3448_v29  ;;  %v4361_v29 = vld [vmem:[#allocation2 + $0x7c8] sm:$0xf0]  ;;  %v5148_v4 = vld [vmem:[#allocation2 + $0x37c] sm:$0xf] }
  0xe9   :  { %2744 = vmatpush.bf16.msra.mxu1 %v3832_v32  ;;  %v3596_v32 = vor.u32 %v5088_v24, %v3593_v25  ;;  %v4364_v35 = vor.u32 %v5280_v23, %v4361_v29  ;;  %v5040_v16 = vld [vmem:[#allocation2 + $0x1c] sm:$0xf]  ;;  %v3743_v29 = vld [vmem:[#allocation2 + $0x2c0] sm:$0xf] }
  0xea   :  { %2757 = vmatpush.bf16.msra.mxu2 %v4216_v33  ;;  %v3744_v42 = vor.u32 %v5131_v30, %v3743_v29 }
  0xeb   :  { %2770 = vmatpush.bf16.msra.mxu3 %v4600_v37  ;;  %v5172_v37 = vld [vmem:[#allocation2 + $0x43c] sm:$0xf] }
  0xec   :  { %2732 = vmatpush.bf16.msra.mxu0 %v3400_v45  ;;  %v5646_v33 = vpop.f32.mrf.mxu0  ;;  %v3548_v45 = vor.u32 %v5076_v36, %v3545_v59  ;;  %v3932_v46 = vor.u32 %v5172_v37, %v3929_v40  ;;  %v5323_v36 = vld [vmem:[#allocation2 + $0x8ec] sm:$0xf0] }
  0xed   :  { %2745 = vmatpush.bf16.msra.mxu1 %v3784_v49  ;;  %v5648_v38 = vpop.f32.mrf.mxu1  ;;  %v3497_v49 = vld [vmem:[#allocation2 + $0x108] sm:$0xf0]  ;;  %v5419_v40 = vld [vmem:[#allocation2 + $0xbec] sm:$0xf0] }
  0xee   :  { %2758 = vmatpush.bf16.msra.mxu2 %v4168_v50  ;;  %v5160_v50 = vld [vmem:[#allocation2 + $0x3dc] sm:$0xf]  ;;  %v3500_v60 = vor.u32 %v5064_v48, %v3497_v49  ;;  %v5215_v49 = vld [vmem:[#allocation2 + $0x58c] sm:$0xf0] }
  0xef   :  { %2771 = vmatpush.bf16.msra.mxu3 %v4552_v2  ;;  %2733 = vmatmul.bf16.vlgmr.msra.gmra.mxu0 %v5596_v14  ;;  %v3881_v2 = vld [vmem:[#allocation2 + $0x408] sm:$0xf0] }
  0xf0   :  { %2777 = vmatpush.bf16.msrb.mxu0 %v3740_v54  ;;  %2746 = vmatmul.bf16.vlgmr.msra.gmra.mxu1 %v5598_v15  ;;  %v5256_v54 = vld [vmem:[#allocation2 + $0x6dc] sm:$0xf]  ;;  %v3884_v62 = vor.u32 %v5160_v50, %v3881_v2  ;;  %v4463_v50 = vld [vmem:[#allocation2 + $0x860] sm:$0xf] }
  0xf1   :  { %2790 = vmatpush.bf16.msrb.mxu1 %v4124_v55  ;;  %2759 = vmatmul.bf16.vlgmr.msra.gmra.mxu2 %v5588_v1  ;;  %v4265_v55 = vld [vmem:[#allocation2 + $0x708] sm:$0xf0]  ;;  %v4847_v2 = vld [vmem:[#allocation2 + $0xb60] sm:$0xf] }
  0xf2   :  { %2803 = vmatpush.bf16.msrb.mxu2 %v4508_v56  ;;  %2772 = vmatmul.bf16.vlgmr.msra.gmra.mxu3 %v5593_v6  ;;  %v4268_v63 = vor.u32 %v5256_v54, %v4265_v55  ;;  %v5407_v54 = vld [vmem:[#allocation2 + $0xb8c] sm:$0xf0]  ;;  %v457_v55 = vperm.slane %v5627_v52, 2 }
  0xf3   :  { %2816 = vmatpush.bf16.msrb.mxu3 %v4892_v61  ;;  %v4848_v0 = vor.u32 %v5407_v54, %v4847_v2  ;;  %v4271_v2 = vld [vmem:[#allocation2 + $0x6e0] sm:$0xf]  ;;  %v5263_v54 = vld [vmem:[#allocation2 + $0x70c] sm:$0xf0] }
  0xf4   :  { %2778 = vmatpush.bf16.msrb.mxu0 %v3692_v5  ;;  %v5650_v51 = vpop.f32.mrf.mxu2  ;;  %v2528_v61 = vpop.f32.mrf.mxu0  ;;  %v2527_v9 = vadd.f32 %v5646_v33, %v457_v55  ;;  %v5383_v33 = vld [vmem:[#allocation2 + $0xacc] sm:$0xf0]  ;;  %v4655_v55 = vld [vmem:[#allocation2 + $0x9e0] sm:$0xf] }
  0xf5   :  { %2791 = vmatpush.bf16.msrb.mxu1 %v4076_v7  ;;  %v5652_v56 = vpop.f32.mrf.mxu3  ;;  %v2541_v5 = vpop.f32.mrf.mxu1  ;;  %v4652_v7 = vor.u32 %v5352_v57, %v4649_v58  ;;  %v3647_v61 = vld [vmem:[#allocation2 + $0x200] sm:$0xf] }
  0xf6   :  { %2804 = vmatpush.bf16.msrb.mxu2 %v4460_v8  ;;  %v3833_v8 = vld [vmem:[#allocation2 + $0x3a8] sm:$0xf0]  ;;  %v5299_v5 = vld [vmem:[#allocation2 + $0x82c] sm:$0xf0] }
  0xf7   :  { %2817 = vmatpush.bf16.msrb.mxu3 %v4844_v12  ;;  %v4601_v12 = vld [vmem:[#allocation2 + $0x9a8] sm:$0xf0]  ;;  %v3836_v18 = vor.u32 %v5148_v4, %v3833_v8  ;;  %v4415_v4 = vld [vmem:[#allocation2 + $0x800] sm:$0xf]  ;;  %v5395_v8 = vld [vmem:[#allocation2 + $0xb2c] sm:$0xf0] }
  0xf8   :  { %2779 = vmatpush.bf16.msrb.mxu0 %v3644_v20  ;;  %v5136_v20 = vld [vmem:[#allocation2 + $0x31c] sm:$0xf]  ;;  %v4604_v25 = vor.u32 %v5340_v11, %v4601_v12  ;;  %v3599_v11 = vld [vmem:[#allocation2 + $0x1a0] sm:$0xf] }
  0xf9   :  { %2792 = vmatpush.bf16.msrb.mxu1 %v4028_v21  ;;  %v3785_v21 = vld [vmem:[#allocation2 + $0x348] sm:$0xf0] }
  0xfa   :  { %2805 = vmatpush.bf16.msrb.mxu2 %v4412_v22  ;;  %v5232_v22 = vld [vmem:[#allocation2 + $0x61c] sm:$0xf]  ;;  %v3788_v59 = vor.u32 %v5136_v20, %v3785_v21  ;;  %v5191_v20 = vld [vmem:[#allocation2 + $0x4cc] sm:$0xf0]  ;;  %v4367_v21 = vld [vmem:[#allocation2 + $0x7a0] sm:$0xf] }
  0xfb   :  { %2818 = vmatpush.bf16.msrb.mxu3 %v4796_v27  ;;  %v5328_v27 = vld [vmem:[#allocation2 + $0x91c] sm:$0xf]  ;;  %v4172_v37 = vor.u32 %v5232_v22, %v4169_v26  ;;  %v5287_v22 = vld [vmem:[#allocation2 + $0x7cc] sm:$0xf0] }
  0xfc   :  { %2780 = vmatpush.bf16.msrb.mxu0 %v3596_v32  ;;  %v2554_v24 = vpop.f32.mrf.mxu2  ;;  %v3404_v32 = vor.u32 %v5040_v16, %v3401_v17  ;;  %v4556_v41 = vor.u32 %v5328_v27, %v4553_v28  ;;  %v5095_v16 = vld [vmem:[#allocation2 + $0x1cc] sm:$0xf0]  ;;  %v3983_v17 = vld [vmem:[#allocation2 + $0x4a0] sm:$0xf] }
  0xfd   :  { %2793 = vmatpush.bf16.msrb.mxu1 %v3980_v34  ;;  %v2567_v23 = vpop.f32.mrf.mxu3  ;;  %v5227_v34 = vld [vmem:[#allocation2 + $0x5ec] sm:$0xf0]  ;;  %v4751_v24 = vld [vmem:[#allocation2 + $0xaa0] sm:$0xf]  ;;  %v3600_v26 = vor.u32 %v5095_v16, %v3599_v11  ;;  %v3984_v28 = vor.u32 %v5191_v20, %v3983_v17 }
  0xfe   :  { %2806 = vmatpush.bf16.msrb.mxu2 %v4364_v35  ;;  %v4511_v35 = vld [vmem:[#allocation2 + $0x8c0] sm:$0xf]  ;;  %v4128_v43 = vor.u32 %v5227_v34, %v4127_v31  ;;  %v4368_v23 = vor.u32 %v5287_v22, %v4367_v21  ;;  %v4752_v34 = vor.u32 %v5383_v33, %v4751_v24  ;;  %v5251_v11 = vld [vmem:[#allocation2 + $0x6ac] sm:$0xf0] }
  0xff   :  { %2819 = vmatpush.bf16.msrb.mxu3 %v4748_v39  ;;  %v4895_v39 = vld [vmem:[#allocation2 + $0xbc0] sm:$0xf]  ;;  %v4512_v44 = vor.u32 %v5323_v36, %v4511_v35  ;;  %v5179_v35 = vld [vmem:[#allocation2 + $0x46c] sm:$0xf0] }
 0x100   :  { %2781 = vmatpush.bf16.msrb.mxu0 %v3548_v45  ;;  %v3695_v45 = vld [vmem:[#allocation2 + $0x260] sm:$0xf]  ;;  %v4896_v48 = vor.u32 %v5419_v40, %v4895_v39  ;;  %v5047_v17 = vld [vmem:[#allocation2 + $0x4c] sm:$0xf0] }
 0x101   :  { %2794 = vmatpush.bf16.msrb.mxu1 %v3932_v46  ;;  %v5119_v46 = vld [vmem:[#allocation2 + $0x28c] sm:$0xf0]  ;;  %v3551_v31 = vld [vmem:[#allocation2 + $0x140] sm:$0xf] }
 0x102   :  { %2807 = vmatpush.bf16.msrb.mxu2 %v4316_v47  ;;  %v4079_v47 = vld [vmem:[#allocation2 + $0x560] sm:$0xf]  ;;  %v3696_v57 = vor.u32 %v5119_v46, %v3695_v45  ;;  %v5071_v46 = vld [vmem:[#allocation2 + $0x10c] sm:$0xf0] }
 0x103   :  { %2820 = vmatpush.bf16.msrb.mxu3 %v4700_v53  ;;  %v5311_v53 = vld [vmem:[#allocation2 + $0x88c] sm:$0xf0]  ;;  %v4080_v58 = vor.u32 %v5215_v49, %v4079_v47  ;;  %v4319_v36 = vld [vmem:[#allocation2 + $0x740] sm:$0xf] }
 0x104   :  { %2782 = vmatpush.bf16.msrb.mxu0 %v3500_v60  ;;  %v4464_v60 = vor.u32 %v5311_v53, %v4463_v50  ;;  %v4703_v39 = vld [vmem:[#allocation2 + $0xa40] sm:$0xf]  ;;  %v5167_v53 = vld [vmem:[#allocation2 + $0x40c] sm:$0xf0] }
 0x105   :  { %2795 = vmatpush.bf16.msrb.mxu1 %v3884_v62  ;;  %v5107_v62 = vld [vmem:[#allocation2 + $0x22c] sm:$0xf0]  ;;  %v3503_v45 = vld [vmem:[#allocation2 + $0xe0] sm:$0xf] }
 0x106   :  { %2808 = vmatpush.bf16.msrb.mxu2 %v4268_v63  ;;  %v4031_v63 = vld [vmem:[#allocation2 + $0x500] sm:$0xf]  ;;  %v3648_v10 = vor.u32 %v5107_v62, %v3647_v61  ;;  %v5143_v21 = vld [vmem:[#allocation2 + $0x34c] sm:$0xf0] }
 0x107   :  { %2821 = vmatpush.bf16.msrb.mxu3 %v4652_v7  ;;  %v4799_v7 = vld [vmem:[#allocation2 + $0xb00] sm:$0xf]  ;;  %v4032_v12 = vor.u32 %v5203_v3, %v4031_v63  ;;  %v4272_v63 = vor.u32 %v5263_v54, %v4271_v2  ;;  %v5059_v3 = vld [vmem:[#allocation2 + $0xac] sm:$0xf0] }
 0x108   :  { %2783 = vmatpush.bf16.msrb.mxu0 %v3452_v13  ;;  %v4416_v13 = vor.u32 %v5299_v5, %v4415_v4  ;;  %v3887_v47 = vld [vmem:[#allocation2 + $0x3e0] sm:$0xf] }
 0x109   :  { %2796 = vmatpush.bf16.msrb.mxu1 %v3836_v18  ;;  %v458_v18 = vperm.slane %v5627_v52, 3  ;;  %v5083_v52 = vld [vmem:[#allocation2 + $0x16c] sm:$0xf0]  ;;  %v3888_v62 = vor.u32 %v5167_v53, %v3887_v47  ;;  %v3839_v4 = vld [vmem:[#allocation2 + $0x380] sm:$0xf] }
 0x10a   :  { %2809 = vmatpush.bf16.msrb.mxu2 %v4220_v19  ;;  %v4800_v19 = vor.u32 %v5395_v8, %v4799_v7  ;;  %v3407_v16 = vld [vmem:[#allocation2 + $0x20] sm:$0xf]  ;;  %v5305_v47 = vld [vmem:[#allocation2 + $0x864] sm:$0xf] }
 0x10b   :  { %2822 = vmatpush.bf16.msrb.mxu3 %v4604_v25  ;;  %v2540_v25 = vadd.f32 %v5648_v38, %v2527_v9  ;;  %v5371_v38 = vld [vmem:[#allocation2 + $0xa6c] sm:$0xf0]  ;;  %v3791_v20 = vld [vmem:[#allocation2 + $0x320] sm:$0xf] }
 0x10c   :  { %2784 = vmatpush.bf16.msrb.mxu0 %v3404_v32  ;;  %v2578_v27 = vpop.f32.mrf.mxu0  ;;  %v3935_v32 = vld [vmem:[#allocation2 + $0x440] sm:$0xf]  ;;  %v5155_v9 = vld [vmem:[#allocation2 + $0x3ac] sm:$0xf0] }
 0x10d   :  { %2797 = vmatpush.bf16.msrb.mxu1 %v3788_v59  ;;  %v2579_v29 = vadd.f32 %v2578_v27, %v458_v18  ;;  %v2591_v30 = vpop.f32.mrf.mxu1  ;;  %v5275_v59 = vld [vmem:[#allocation2 + $0x76c] sm:$0xf0]  ;;  %v2553_v40 = vadd.f32 %v5650_v51, %v2540_v25  ;;  %v3840_v18 = vor.u32 %v5155_v9, %v3839_v4  ;;  %v4175_v22 = vld [vmem:[#allocation2 + $0x620] sm:$0xf]  ;;  %v5185_v9 = vld [vmem:[#allocation2 + $0x4a4] sm:$0xf] }
 0x10e   :  { %2810 = vmatpush.bf16.msrb.mxu2 %v4172_v37  ;;  %v5239_v25 = vld [vmem:[#allocation2 + $0x64c] sm:$0xf0] }
 0x10f   :  { %2823 = vmatpush.bf16.msrb.mxu3 %v4556_v41  ;;  %2785 = vmatmul.bf16.vlgmr.msrb.gmra.mxu0 %v5596_v14  ;;  %v2592_v37 = vadd.f32 %v2591_v30, %v2579_v29  ;;  %v3552_v41 = vor.u32 %v5083_v52, %v3551_v31  ;;  %v2566_v51 = vadd.f32 %v5652_v56, %v2553_v40  ;;  %v5347_v56 = vld [vmem:[#allocation2 + $0x9ac] sm:$0xf0]  ;;  %v3745_v29 = vld [vmem:[#allocation2 + $0x2f0] sm:$0xf0]  ;;  %v5221_v30 = vld [vmem:[#allocation2 + $0x5c4] sm:$0xf] }
 0x110   :  { %2829 = vmatpush.bf16.msra.mxu0 %v3744_v42  ;;  %2798 = vmatmul.bf16.vlgmr.msrb.gmra.mxu1 %v5598_v15  ;;  %v3936_v42 = vor.u32 %v5179_v35, %v3935_v32  ;;  %v5335_v27 = vld [vmem:[#allocation2 + $0x94c] sm:$0xf0]  ;;  %v3408_v31 = vor.u32 %v5047_v17, %v3407_v16  ;;  %v4129_v52 = vld [vmem:[#allocation2 + $0x5f0] sm:$0xf0]  ;;  %v5317_v32 = vld [vmem:[#allocation2 + $0x8c4] sm:$0xf]  ;;  %v3792_v35 = vor.u32 %v5143_v21, %v3791_v20 }
 0x111   :  { %2842 = vmatpush.bf16.msra.mxu1 %v4128_v43  ;;  %2811 = vmatmul.bf16.vlgmr.msrb.gmra.mxu2 %v5588_v1  ;;  %v4320_v43 = vor.u32 %v5275_v59, %v4319_v36  ;;  %v4176_v36 = vor.u32 %v5239_v25, %v4175_v22  ;;  %v5413_v59 = vld [vmem:[#allocation2 + $0xbc4] sm:$0xf]  ;;  %v4132_v40 = vor.u32 %v5221_v30, %v4129_v52  ;;  %v4753_v16 = vld [vmem:[#allocation2 + $0xad0] sm:$0xf0] }
 0x112   :  { %2855 = vmatpush.bf16.msra.mxu2 %v4512_v44  ;;  %2824 = vmatmul.bf16.vlgmr.msrb.gmra.mxu3 %v5593_v6  ;;  %v5077_v21 = vld [vmem:[#allocation2 + $0x144] sm:$0xf]  ;;  %v3553_v22 = vld [vmem:[#allocation2 + $0x170] sm:$0xf0] }
 0x113   :  { %2868 = vmatpush.bf16.msra.mxu3 %v4896_v48  ;;  %v4704_v48 = vor.u32 %v5371_v38, %v4703_v39  ;;  %v3556_v30 = vor.u32 %v5077_v21, %v3553_v22 }
 0x114   :  { %2830 = vmatpush.bf16.msra.mxu0 %v3696_v57  ;;  %v2604_v44 = vpop.f32.mrf.mxu2  ;;  %v5359_v57 = vld [vmem:[#allocation2 + $0xa0c] sm:$0xf0]  ;;  %v2580_v61 = vpop.f32.mrf.mxu0 }
 0x115   :  { %2843 = vmatpush.bf16.msra.mxu1 %v4080_v58  ;;  %v2605_v49 = vadd.f32 %v2604_v44, %v2592_v37  ;;  %v2617_v50 = vpop.f32.mrf.mxu3  ;;  %v2593_v5 = vpop.f32.mrf.mxu1  ;;  %v4656_v8 = vor.u32 %v5359_v57, %v4655_v55  ;;  %v4897_v37 = vld [vmem:[#allocation2 + $0xbf0] sm:$0xf0]  ;;  %v5209_v44 = vld [vmem:[#allocation2 + $0x564] sm:$0xf] }
 0x116   :  { %2856 = vmatpush.bf16.msra.mxu2 %v4464_v60  ;;  %v3504_v60 = vor.u32 %v5071_v46, %v3503_v45  ;;  %v4900_v45 = vor.u32 %v5413_v59, %v4897_v37  ;;  %v4081_v46 = vld [vmem:[#allocation2 + $0x590] sm:$0xf0]  ;;  %v5101_v55 = vld [vmem:[#allocation2 + $0x204] sm:$0xf] }
 0x117   :  { %2869 = vmatpush.bf16.msra.mxu3 %v4848_v0  ;;  %v2618_v58 = vadd.f32 %v2617_v50, %v2605_v49  ;;  %v3455_v0 = vld [vmem:[#allocation2 + $0x80] sm:$0xf]  ;;  %v5401_v49 = vld [vmem:[#allocation2 + $0xb64] sm:$0xf]  ;;  %v4849_v50 = vld [vmem:[#allocation2 + $0xb90] sm:$0xf0]  ;;  %v4084_v2 = vor.u32 %v5209_v44, %v4081_v46 }
 0x118   :  { %2831 = vmatpush.bf16.msra.mxu0 %v3648_v10  ;;  %v4223_v10 = vld [vmem:[#allocation2 + $0x680] sm:$0xf]  ;;  %v3649_v57 = vld [vmem:[#allocation2 + $0x230] sm:$0xf0]  ;;  %v5293_v61 = vld [vmem:[#allocation2 + $0x804] sm:$0xf] }
 0x119   :  { %2844 = vmatpush.bf16.msra.mxu1 %v4032_v12  ;;  %v3038_v7 = vpack.c.bf16 %v2618_v58, %v2566_v51  ;;  %v4607_v12 = vld [vmem:[#allocation2 + $0x980] sm:$0xf]  ;;  %v5197_v51 = vld [vmem:[#allocation2 + $0x504] sm:$0xf]  ;;  %v4852_v58 = vor.u32 %v5401_v49, %v4849_v50  ;;  %v3889_v37 = vld [vmem:[#allocation2 + $0x410] sm:$0xf0] }
 0x11a   :  { %2857 = vmatpush.bf16.msra.mxu2 %v4416_v13  ;;  %v3456_v13 = vor.u32 %v5059_v3, %v3455_v0  ;;  %v4608_v33 = vor.u32 %v5347_v56, %v4607_v12  ;;  %v4801_v0 = vld [vmem:[#allocation2 + $0xb30] sm:$0xf0]  ;;  %v3652_v3 = vor.u32 %v5101_v55, %v3649_v57  ;;  %v5281_v12 = vld [vmem:[#allocation2 + $0x7a4] sm:$0xf] }
 0x11b   :  { %2870 = vmatpush.bf16.msra.mxu3 %v4800_v19  ;;  %3044 = vst [vmem:[%s5833_s5 + $0x8] sm:$0xff] %v3038_v7  ;;  %v4224_v19 = vor.u32 %v5251_v11, %v4223_v10  ;;  %v5089_v7 = vld [vmem:[#allocation2 + $0x1a4] sm:$0xf]  ;;  %v3985_v11 = vld [vmem:[#allocation2 + $0x4d0] sm:$0xf0] }
 0x11c   :  { %2832 = vmatpush.bf16.msra.mxu0 %v3600_v26  ;;  %v2606_v24 = vpop.f32.mrf.mxu2  ;;  %v4559_v26 = vld [vmem:[#allocation2 + $0x920] sm:$0xf]  ;;  %v4369_v56 = vld [vmem:[#allocation2 + $0x7d0] sm:$0xf0]  ;;  %v5149_v49 = vld [vmem:[#allocation2 + $0x384] sm:$0xf] }
 0x11d   :  { %2845 = vmatpush.bf16.msra.mxu1 %v3984_v28  ;;  %v2619_v28 = vpop.f32.mrf.mxu3  ;;  %v4560_v39 = vor.u32 %v5335_v27, %v4559_v26  ;;  %v4372_v20 = vor.u32 %v5281_v12, %v4369_v56  ;;  %v5173_v24 = vld [vmem:[#allocation2 + $0x444] sm:$0xf]  ;;  %v3937_v26 = vld [vmem:[#allocation2 + $0x470] sm:$0xf0]  ;;  %v3751_v12 = vld [vmem:[#allocation2 + $0x2c8] sm:$0xf] }
 0x11e   :  { %2858 = vmatpush.bf16.msra.mxu2 %v4368_v23  ;;  %v5125_v23 = vld [vmem:[#allocation2 + $0x2c4] sm:$0xf]  ;;  %v4321_v28 = vld [vmem:[#allocation2 + $0x770] sm:$0xf0]  ;;  %v5132_v56 = vld [vmem:[#allocation2 + $0x2f4] sm:$0xf0] }
 0x11f   :  { %2871 = vmatpush.bf16.msra.mxu3 %v4752_v34  ;;  %v4513_v34 = vld [vmem:[#allocation2 + $0x8f0] sm:$0xf0]  ;;  %v3748_v38 = vor.u32 %v5125_v23, %v3745_v29  ;;  %v5269_v27 = vld [vmem:[#allocation2 + $0x744] sm:$0xf] }
 0x120   :  { %2833 = vmatpush.bf16.msra.mxu0 %v3552_v41  ;;  %v4516_v41 = vor.u32 %v5317_v32, %v4513_v34  ;;  %v5365_v23 = vld [vmem:[#allocation2 + $0xa44] sm:$0xf]  ;;  %v4705_v29 = vld [vmem:[#allocation2 + $0xa70] sm:$0xf0]  ;;  %v4324_v52 = vor.u32 %v5269_v27, %v4321_v28  ;;  %v3752_v27 = vor.u32 %v5132_v56, %v3751_v12 }
 0x121   :  { %2846 = vmatpush.bf16.msra.mxu1 %v3936_v42  ;;  %v5113_v42 = vld [vmem:[#allocation2 + $0x264] sm:$0xf]  ;;  %v3505_v34 = vld [vmem:[#allocation2 + $0x110] sm:$0xf0]  ;;  %v4708_v59 = vor.u32 %v5365_v23, %v4705_v29  ;;  %v3703_v29 = vld [vmem:[#allocation2 + $0x268] sm:$0xf] }
 0x122   :  { %2859 = vmatpush.bf16.msra.mxu2 %v4320_v43  ;;  %v3697_v43 = vld [vmem:[#allocation2 + $0x290] sm:$0xf0]  ;;  %v5065_v32 = vld [vmem:[#allocation2 + $0xe4] sm:$0xf] }
 0x123   :  { %2872 = vmatpush.bf16.msra.mxu3 %v4704_v48  ;;  %v4465_v48 = vld [vmem:[#allocation2 + $0x890] sm:$0xf0]  ;;  %v3700_v53 = vor.u32 %v5113_v42, %v3697_v43  ;;  %v3508_v43 = vor.u32 %v5065_v32, %v3505_v34  ;;  %v5341_v57 = vld [vmem:[#allocation2 + $0x984] sm:$0xf]  ;;  %v5216_v32 = vld [vmem:[#allocation2 + $0x594] sm:$0xf0] }
 0x124   :  { %2834 = vmatpush.bf16.msra.mxu0 %v3504_v60  ;;  %v4468_v54 = vor.u32 %v5305_v47, %v4465_v48  ;;  %v4033_v60 = vld [vmem:[#allocation2 + $0x530] sm:$0xf0]  ;;  %v5053_v47 = vld [vmem:[#allocation2 + $0x84] sm:$0xf]  ;;  %v4471_v34 = vld [vmem:[#allocation2 + $0x868] sm:$0xf] }
 0x125   :  { %2847 = vmatpush.bf16.msra.mxu1 %v3888_v62  ;;  %v4417_v62 = vld [vmem:[#allocation2 + $0x830] sm:$0xf0]  ;;  %v4036_v4 = vor.u32 %v5197_v51, %v4033_v60  ;;  %v5041_v60 = vld [vmem:[#allocation2 + $0x24] sm:$0xf] }
 0x126   :  { %2860 = vmatpush.bf16.msra.mxu2 %v4272_v63  ;;  %v5389_v63 = vld [vmem:[#allocation2 + $0xb04] sm:$0xf]  ;;  %v4420_v5 = vor.u32 %v5293_v61, %v4417_v62  ;;  %v4657_v42 = vld [vmem:[#allocation2 + $0xa10] sm:$0xf0] }
 0x127   :  { %2873 = vmatpush.bf16.msra.mxu3 %v4656_v8  ;;  %v3601_v8 = vld [vmem:[#allocation2 + $0x1d0] sm:$0xf0]  ;;  %v4804_v10 = vor.u32 %v5389_v63, %v4801_v0  ;;  %v5137_v0 = vld [vmem:[#allocation2 + $0x324] sm:$0xf] }
 0x128   :  { %2835 = vmatpush.bf16.msra.mxu0 %v3456_v13  ;;  %v5377_v13 = vld [vmem:[#allocation2 + $0xaa4] sm:$0xf]  ;;  %v3604_v17 = vor.u32 %v5089_v7, %v3601_v8  ;;  %v3457_v48 = vld [vmem:[#allocation2 + $0xb0] sm:$0xf0] }
 0x129   :  { %2848 = vmatpush.bf16.msra.mxu1 %v3840_v18  ;;  %v4756_v25 = vor.u32 %v5377_v13, %v4753_v16  ;;  %v4225_v55 = vld [vmem:[#allocation2 + $0x6b0] sm:$0xf0]  ;;  %v4135_v13 = vld [vmem:[#allocation2 + $0x5c8] sm:$0xf] }
 0x12a   :  { %2861 = vmatpush.bf16.msra.mxu2 %v4224_v19  ;;  %v3988_v19 = vor.u32 %v5185_v9, %v3985_v11  ;;  %v4609_v51 = vld [vmem:[#allocation2 + $0x9b0] sm:$0xf0]  ;;  %v5329_v9 = vld [vmem:[#allocation2 + $0x924] sm:$0xf] }
 0x12b   :  { %2874 = vmatpush.bf16.msra.mxu3 %v4608_v33  ;;  %v3409_v61 = vld [vmem:[#allocation2 + $0x50] sm:$0xf0]  ;;  %v4612_v7 = vor.u32 %v5341_v57, %v4609_v51  ;;  %v3607_v57 = vld [vmem:[#allocation2 + $0x1a8] sm:$0xf] }
 0x12c   :  { %2836 = vmatpush.bf16.msra.mxu0 %v3408_v31  ;;  %v5671_v18 = vpop.f32.mrf.mxu0  ;;  %v3940_v31 = vor.u32 %v5173_v24, %v3937_v26  ;;  %v4177_v8 = vld [vmem:[#allocation2 + $0x650] sm:$0xf0]  ;;  %v3412_v16 = vor.u32 %v5041_v60, %v3409_v61  ;;  %v4903_v24 = vld [vmem:[#allocation2 + $0xbc8] sm:$0xf]  ;;  %v5096_v60 = vld [vmem:[#allocation2 + $0x1d4] sm:$0xf0] }
 0x12d   :  { %2849 = vmatpush.bf16.msra.mxu1 %v3792_v35  ;;  %v5673_v33 = vpop.f32.mrf.mxu1  ;;  %v5161_v35 = vld [vmem:[#allocation2 + $0x3e4] sm:$0xf]  ;;  %v3991_v61 = vld [vmem:[#allocation2 + $0x4a8] sm:$0xf] }
 0x12e   :  { %2862 = vmatpush.bf16.msra.mxu2 %v4176_v36 }
 0x12f   :  { %2875 = vmatpush.bf16.msra.mxu3 %v4560_v39  ;;  %2837 = vmatmul.bf16.vlgmr.msra.gmra.mxu0 %v5596_v14  ;;  %v5257_v39 = vld [vmem:[#allocation2 + $0x6e4] sm:$0xf] }
 0x130   :  { %2881 = vmatpush.bf16.msrb.mxu0 %v3748_v38  ;;  %2850 = vmatmul.bf16.vlgmr.msra.gmra.mxu1 %v5598_v15  ;;  %v4273_v38 = vld [vmem:[#allocation2 + $0x710] sm:$0xf0] }
 0x131   :  { %2894 = vmatpush.bf16.msrb.mxu1 %v4132_v40  ;;  %2863 = vmatmul.bf16.vlgmr.msra.gmra.mxu2 %v5588_v1  ;;  %v4276_v46 = vor.u32 %v5257_v39, %v4273_v38  ;;  %v5679_v39 = vld [vmem:[#allocation4] sm:$0xff] }
 0x132   :  { %2907 = vmatpush.bf16.msrb.mxu2 %v4516_v41  ;;  %2876 = vmatmul.bf16.vlgmr.msra.gmra.mxu3 %v5593_v6  ;;  %v5353_v41 = vld [vmem:[#allocation2 + $0x9e4] sm:$0xf]  ;;  %v459_v38 = vperm.slane %v5679_v39, 4 }
 0x133   :  { %2920 = vmatpush.bf16.msrb.mxu3 %v4900_v45  ;;  %v3892_v45 = vor.u32 %v5161_v35, %v3889_v37  ;;  %v5312_v35 = vld [vmem:[#allocation2 + $0x894] sm:$0xf0] }
 0x134   :  { %2882 = vmatpush.bf16.msrb.mxu0 %v3700_v53  ;;  %v5675_v36 = vpop.f32.mrf.mxu2  ;;  %v2632_v44 = vpop.f32.mrf.mxu0  ;;  %v4660_v53 = vor.u32 %v5353_v41, %v4657_v42  ;;  %v5408_v37 = vld [vmem:[#allocation2 + $0xb94] sm:$0xf0] }
 0x135   :  { %2895 = vmatpush.bf16.msrb.mxu1 %v4084_v2  ;;  %v5677_v40 = vpop.f32.mrf.mxu3  ;;  %v2645_v50 = vpop.f32.mrf.mxu1  ;;  %v3841_v2 = vld [vmem:[#allocation2 + $0x3b0] sm:$0xf0]  ;;  %v3655_v44 = vld [vmem:[#allocation2 + $0x208] sm:$0xf] }
 0x136   :  { %2908 = vmatpush.bf16.msrb.mxu2 %v4468_v54  ;;  %v5245_v54 = vld [vmem:[#allocation2 + $0x684] sm:$0xf]  ;;  %v3844_v62 = vor.u32 %v5149_v49, %v3841_v2  ;;  %v4423_v49 = vld [vmem:[#allocation2 + $0x808] sm:$0xf]  ;;  %v5300_v50 = vld [vmem:[#allocation2 + $0x834] sm:$0xf0] }
 0x137   :  { %2921 = vmatpush.bf16.msrb.mxu3 %v4852_v58  ;;  %v3460_v58 = vor.u32 %v5053_v47, %v3457_v48  ;;  %v4228_v63 = vor.u32 %v5245_v54, %v4225_v55  ;;  %v5204_v48 = vld [vmem:[#allocation2 + $0x534] sm:$0xf0]  ;;  %v2631_v54 = vadd.f32 %v5671_v18, %v459_v38 }
 0x138   :  { %2883 = vmatpush.bf16.msrb.mxu0 %v3652_v3  ;;  %v3793_v3 = vld [vmem:[#allocation2 + $0x350] sm:$0xf0]  ;;  %v5396_v2 = vld [vmem:[#allocation2 + $0xb34] sm:$0xf0] }
 0x139   :  { %2896 = vmatpush.bf16.msrb.mxu1 %v4036_v4  ;;  %v5233_v4 = vld [vmem:[#allocation2 + $0x624] sm:$0xf]  ;;  %v3796_v21 = vor.u32 %v5137_v0, %v3793_v3  ;;  %v5192_v0 = vld [vmem:[#allocation2 + $0x4d4] sm:$0xf0]  ;;  %v4375_v3 = vld [vmem:[#allocation2 + $0x7a8] sm:$0xf] }
 0x13a   :  { %2909 = vmatpush.bf16.msrb.mxu2 %v4420_v5  ;;  %v4180_v22 = vor.u32 %v5233_v4, %v4177_v8  ;;  %v5288_v4 = vld [vmem:[#allocation2 + $0x7d4] sm:$0xf0]  ;;  %v3608_v8 = vor.u32 %v5096_v60, %v3607_v57  ;;  %v4231_v57 = vld [vmem:[#allocation2 + $0x688] sm:$0xf] }
 0x13b   :  { %2922 = vmatpush.bf16.msrb.mxu3 %v4804_v10  ;;  %v4561_v10 = vld [vmem:[#allocation2 + $0x950] sm:$0xf0]  ;;  %v5384_v18 = vld [vmem:[#allocation2 + $0xad4] sm:$0xf0] }
 0x13c   :  { %2884 = vmatpush.bf16.msrb.mxu0 %v3604_v17  ;;  %v2658_v5 = vpop.f32.mrf.mxu2  ;;  %v5228_v17 = vld [vmem:[#allocation2 + $0x5f4] sm:$0xf0]  ;;  %v4564_v26 = vor.u32 %v5329_v9, %v4561_v10  ;;  %v3992_v10 = vor.u32 %v5192_v0, %v3991_v61  ;;  %v3415_v61 = vld [vmem:[#allocation2 + $0x28] sm:$0xf] }
 0x13d   :  { %2897 = vmatpush.bf16.msrb.mxu1 %v3988_v19  ;;  %v2671_v11 = vpop.f32.mrf.mxu3  ;;  %v4519_v19 = vld [vmem:[#allocation2 + $0x8c8] sm:$0xf]  ;;  %v4136_v28 = vor.u32 %v5228_v17, %v4135_v13  ;;  %v5264_v38 = vld [vmem:[#allocation2 + $0x714] sm:$0xf0] }
 0x13e   :  { %2910 = vmatpush.bf16.msrb.mxu2 %v4372_v20  ;;  %v5324_v20 = vld [vmem:[#allocation2 + $0x8f4] sm:$0xf0]  ;;  %v4759_v5 = vld [vmem:[#allocation2 + $0xaa8] sm:$0xf]  ;;  %v4376_v11 = vor.u32 %v5288_v4, %v4375_v3 }
 0x13f   :  { %2923 = vmatpush.bf16.msrb.mxu3 %v4756_v25  ;;  %v5420_v25 = vld [vmem:[#allocation2 + $0xbf4] sm:$0xf0]  ;;  %v4520_v23 = vor.u32 %v5324_v20, %v4519_v19  ;;  %v3559_v13 = vld [vmem:[#allocation2 + $0x148] sm:$0xf]  ;;  %v4760_v19 = vor.u32 %v5384_v18, %v4759_v5 }
 0x140   :  { %2885 = vmatpush.bf16.msrb.mxu0 %v3556_v30  ;;  %v5120_v30 = vld [vmem:[#allocation2 + $0x294] sm:$0xf0]  ;;  %v3943_v17 = vld [vmem:[#allocation2 + $0x448] sm:$0xf] }
 0x141   :  { %2898 = vmatpush.bf16.msrb.mxu1 %v3940_v31  ;;  %v4087_v31 = vld [vmem:[#allocation2 + $0x568] sm:$0xf]  ;;  %v3704_v41 = vor.u32 %v5120_v30, %v3703_v29  ;;  %v5180_v20 = vld [vmem:[#allocation2 + $0x474] sm:$0xf0] }
 0x142   :  { %2911 = vmatpush.bf16.msrb.mxu2 %v4324_v52  ;;  %v4904_v52 = vor.u32 %v5420_v25, %v4903_v24  ;;  %v4088_v42 = vor.u32 %v5216_v32, %v4087_v31  ;;  %v4711_v25 = vld [vmem:[#allocation2 + $0xa48] sm:$0xf]  ;;  %v5072_v31 = vld [vmem:[#allocation2 + $0x114] sm:$0xf0] }
 0x143   :  { %2924 = vmatpush.bf16.msrb.mxu3 %v4708_v59  ;;  %v4855_v59 = vld [vmem:[#allocation2 + $0xb68] sm:$0xf]  ;;  %v5144_v4 = vld [vmem:[#allocation2 + $0x354] sm:$0xf0] }
 0x144   :  { %2886 = vmatpush.bf16.msrb.mxu0 %v3508_v43  ;;  %v4472_v43 = vor.u32 %v5312_v35, %v4471_v34  ;;  %v4856_v47 = vor.u32 %v5408_v37, %v4855_v59  ;;  %v3511_v30 = vld [vmem:[#allocation2 + $0xe8] sm:$0xf]  ;;  %v5168_v59 = vld [vmem:[#allocation2 + $0x414] sm:$0xf0] }
 0x145   :  { %2899 = vmatpush.bf16.msrb.mxu1 %v3892_v45  ;;  %v5108_v45 = vld [vmem:[#allocation2 + $0x234] sm:$0xf0]  ;;  %v4279_v37 = vld [vmem:[#allocation2 + $0x6e8] sm:$0xf] }
 0x146   :  { %2912 = vmatpush.bf16.msrb.mxu2 %v4276_v46  ;;  %v4039_v46 = vld [vmem:[#allocation2 + $0x508] sm:$0xf]  ;;  %v3656_v55 = vor.u32 %v5108_v45, %v3655_v44  ;;  %v3512_v44 = vor.u32 %v5072_v31, %v3511_v30  ;;  %v5210_v30 = vld [vmem:[#allocation2 + $0x56c] sm:$0xf] }
 0x147   :  { %2925 = vmatpush.bf16.msrb.mxu3 %v4660_v53  ;;  %v4807_v53 = vld [vmem:[#allocation2 + $0xb08] sm:$0xf]  ;;  %v4040_v51 = vor.u32 %v5204_v48, %v4039_v46 }
 0x148   :  { %2887 = vmatpush.bf16.msrb.mxu0 %v3460_v58  ;;  %v4424_v58 = vor.u32 %v5300_v50, %v4423_v49  ;;  %v3463_v48 = vld [vmem:[#allocation2 + $0x88] sm:$0xf]  ;;  %v5060_v49 = vld [vmem:[#allocation2 + $0xb4] sm:$0xf0] }
 0x149   :  { %2900 = vmatpush.bf16.msrb.mxu1 %v3844_v62  ;;  %v460_v62 = vperm.slane %v5679_v39, 5  ;;  %v3847_v50 = vld [vmem:[#allocation2 + $0x388] sm:$0xf]  ;;  %v3464_v60 = vor.u32 %v5060_v49, %v3463_v48  ;;  %v5390_v48 = vld [vmem:[#allocation2 + $0xb0c] sm:$0xf] }
 0x14a   :  { %2913 = vmatpush.bf16.msrb.mxu2 %v4228_v63  ;;  %v4808_v63 = vor.u32 %v5396_v2, %v4807_v53  ;;  %v3799_v3 = vld [vmem:[#allocation2 + $0x328] sm:$0xf]  ;;  %v4809_v49 = vld [vmem:[#allocation2 + $0xb38] sm:$0xf0] }
 0x14b   :  { %2926 = vmatpush.bf16.msrb.mxu3 %v4612_v7  ;;  %v2644_v7 = vadd.f32 %v5673_v33, %v2631_v54  ;;  %v5372_v33 = vld [vmem:[#allocation2 + $0xa74] sm:$0xf0]  ;;  %v4183_v5 = vld [vmem:[#allocation2 + $0x628] sm:$0xf] }
 0x14c   :  { %2888 = vmatpush.bf16.msrb.mxu0 %v3412_v16  ;;  %v2682_v9 = vpop.f32.mrf.mxu0  ;;  %v5084_v16 = vld [vmem:[#allocation2 + $0x174] sm:$0xf0]  ;;  %v4712_v32 = vor.u32 %v5372_v33, %v4711_v25  ;;  %v4905_v25 = vld [vmem:[#allocation2 + $0xbf8] sm:$0xf0] }
 0x14d   :  { %2901 = vmatpush.bf16.msrb.mxu1 %v3796_v21  ;;  %v2683_v12 = vadd.f32 %v2682_v9, %v460_v62  ;;  %v2695_v56 = vpop.f32.mrf.mxu1  ;;  %v4327_v21 = vld [vmem:[#allocation2 + $0x748] sm:$0xf]  ;;  %v5048_v62 = vld [vmem:[#allocation2 + $0x54] sm:$0xf0] }
 0x14e   :  { %2914 = vmatpush.bf16.msrb.mxu2 %v4180_v22  ;;  %v5276_v22 = vld [vmem:[#allocation2 + $0x774] sm:$0xf0]  ;;  %v4567_v9 = vld [vmem:[#allocation2 + $0x928] sm:$0xf] }
 0x14f   :  { %2927 = vmatpush.bf16.msrb.mxu3 %v4564_v26  ;;  %2889 = vmatmul.bf16.vlgmr.msrb.gmra.mxu0 %v5596_v14  ;;  %v2696_v24 = vadd.f32 %v2695_v56, %v2683_v12  ;;  %v2657_v26 = vadd.f32 %v5675_v36, %v2644_v7  ;;  %v5126_v12 = vld [vmem:[#allocation2 + $0x2cc] sm:$0xf]  ;;  %v3753_v56 = vld [vmem:[#allocation2 + $0x2f8] sm:$0xf0] }
 0x150   :  { %2933 = vmatpush.bf16.msra.mxu0 %v3752_v27  ;;  %2902 = vmatmul.bf16.vlgmr.msrb.gmra.mxu1 %v5598_v15  ;;  %v3560_v27 = vor.u32 %v5084_v16, %v3559_v13  ;;  %v5222_v13 = vld [vmem:[#allocation2 + $0x5cc] sm:$0xf]  ;;  %v3416_v16 = vor.u32 %v5048_v62, %v3415_v61  ;;  %v4761_v62 = vld [vmem:[#allocation2 + $0xad8] sm:$0xf0] }
 0x151   :  { %2946 = vmatpush.bf16.msra.mxu1 %v4136_v28  ;;  %2915 = vmatmul.bf16.vlgmr.msrb.gmra.mxu2 %v5588_v1  ;;  %v3944_v28 = vor.u32 %v5180_v20, %v3943_v17  ;;  %v2670_v36 = vadd.f32 %v5677_v40, %v2657_v26  ;;  %v5348_v40 = vld [vmem:[#allocation2 + $0x9b4] sm:$0xf0]  ;;  %v4137_v17 = vld [vmem:[#allocation2 + $0x5f8] sm:$0xf0]  ;;  %v3756_v26 = vor.u32 %v5126_v12, %v3753_v56  ;;  %v5378_v61 = vld [vmem:[#allocation2 + $0xaac] sm:$0xf] }
 0x152   :  { %2959 = vmatpush.bf16.msra.mxu2 %v4520_v23  ;;  %2928 = vmatmul.bf16.vlgmr.msrb.gmra.mxu3 %v5593_v6  ;;  %v4328_v23 = vor.u32 %v5276_v22, %v4327_v21  ;;  %v4521_v20 = vld [vmem:[#allocation2 + $0x8f8] sm:$0xf0]  ;;  %v3800_v21 = vor.u32 %v5144_v4, %v3799_v3  ;;  %v5366_v56 = vld [vmem:[#allocation2 + $0xa4c] sm:$0xf] }
 0x153   :  { %2972 = vmatpush.bf16.msra.mxu3 %v4904_v52  ;;  %v3895_v52 = vld [vmem:[#allocation2 + $0x3e8] sm:$0xf]  ;;  %v4329_v12 = vld [vmem:[#allocation2 + $0x778] sm:$0xf0] }
 0x154   :  { %2934 = vmatpush.bf16.msra.mxu0 %v3704_v41  ;;  %v2708_v29 = vpop.f32.mrf.mxu2  ;;  %v4663_v41 = vld [vmem:[#allocation2 + $0x9e8] sm:$0xf]  ;;  %v2684_v45 = vpop.f32.mrf.mxu0  ;;  %v3896_v46 = vor.u32 %v5168_v59, %v3895_v52  ;;  %v4089_v52 = vld [vmem:[#allocation2 + $0x598] sm:$0xf0] }
 0x155   :  { %2947 = vmatpush.bf16.msra.mxu1 %v4088_v42  ;;  %v2709_v34 = vadd.f32 %v2708_v29, %v2696_v24  ;;  %v2721_v35 = vpop.f32.mrf.mxu3  ;;  %v5360_v42 = vld [vmem:[#allocation2 + $0xa14] sm:$0xf0]  ;;  %v2697_v53 = vpop.f32.mrf.mxu1  ;;  %v5414_v24 = vld [vmem:[#allocation2 + $0xbcc] sm:$0xf]  ;;  %v3705_v29 = vld [vmem:[#allocation2 + $0x298] sm:$0xf0] }
 0x156   :  { %2960 = vmatpush.bf16.msra.mxu2 %v4472_v43  ;;  %v4664_v54 = vor.u32 %v5360_v42, %v4663_v41  ;;  %v4908_v31 = vor.u32 %v5414_v24, %v4905_v25  ;;  %v4857_v59 = vld [vmem:[#allocation2 + $0xb98] sm:$0xf0]  ;;  %v5102_v42 = vld [vmem:[#allocation2 + $0x20c] sm:$0xf] }
 0x157   :  { %2973 = vmatpush.bf16.msra.mxu3 %v4856_v47  ;;  %v2722_v43 = vadd.f32 %v2721_v35, %v2709_v34  ;;  %v4280_v47 = vor.u32 %v5264_v38, %v4279_v37  ;;  %v4473_v34 = vld [vmem:[#allocation2 + $0x898] sm:$0xf0]  ;;  %v5402_v35 = vld [vmem:[#allocation2 + $0xb6c] sm:$0xf]  ;;  %v4092_v38 = vor.u32 %v5210_v30, %v4089_v52 }
 0x158   :  { %2935 = vmatpush.bf16.msra.mxu0 %v3656_v55  ;;  %v5156_v55 = vld [vmem:[#allocation2 + $0x3b4] sm:$0xf0]  ;;  %v4041_v45 = vld [vmem:[#allocation2 + $0x538] sm:$0xf0] }
 0x159   :  { %2948 = vmatpush.bf16.msra.mxu1 %v4040_v51  ;;  %v3039_v2 = vpack.c.bf16 %v2722_v43, %v2670_v36  ;;  %v5252_v51 = vld [vmem:[#allocation2 + $0x6b4] sm:$0xf0]  ;;  %v3657_v36 = vld [vmem:[#allocation2 + $0x238] sm:$0xf0]  ;;  %v5198_v43 = vld [vmem:[#allocation2 + $0x50c] sm:$0xf] }
 0x15a   :  { %2961 = vmatpush.bf16.msra.mxu2 %v4424_v58  ;;  %v4615_v58 = vld [vmem:[#allocation2 + $0x988] sm:$0xf]  ;;  %v4232_v0 = vor.u32 %v5252_v51, %v4231_v57  ;;  %v4044_v53 = vor.u32 %v5198_v43, %v4041_v45  ;;  %v5186_v57 = vld [vmem:[#allocation2 + $0x4ac] sm:$0xf]  ;;  %v4812_v51 = vor.u32 %v5390_v48, %v4809_v49  ;;  %v3417_v49 = vld [vmem:[#allocation2 + $0x58] sm:$0xf0] }
 0x15b   :  { %2974 = vmatpush.bf16.msra.mxu3 %v4808_v63  ;;  %3045 = vst [vmem:[%s5833_s5 + $0x10] sm:$0xff] %v3039_v2  ;;  %v3848_v63 = vor.u32 %v5156_v55, %v3847_v50  ;;  %v4616_v7 = vor.u32 %v5348_v40, %v4615_v58  ;;  %v3660_v50 = vor.u32 %v5102_v42, %v3657_v36  ;;  %v3609_v55 = vld [vmem:[#allocation2 + $0x1d8] sm:$0xf0]  ;;  %v5282_v40 = vld [vmem:[#allocation2 + $0x7ac] sm:$0xf] }
 0x15c   :  { %2936 = vmatpush.bf16.msra.mxu0 %v3608_v8  ;;  %v2710_v18 = vpop.f32.mrf.mxu2  ;;  %v5240_v8 = vld [vmem:[#allocation2 + $0x654] sm:$0xf0]  ;;  %v3993_v58 = vld [vmem:[#allocation2 + $0x4d8] sm:$0xf0]  ;;  %v5246_v42 = vld [vmem:[#allocation2 + $0x68c] sm:$0xf] }
 0x15d   :  { %2949 = vmatpush.bf16.msra.mxu1 %v3992_v10  ;;  %v5336_v10 = vld [vmem:[#allocation2 + $0x954] sm:$0xf0]  ;;  %v4184_v22 = vor.u32 %v5240_v8, %v4183_v5  ;;  %v3996_v3 = vor.u32 %v5186_v57, %v3993_v58  ;;  %v5078_v5 = vld [vmem:[#allocation2 + $0x14c] sm:$0xf]  ;;  %v3561_v18 = vld [vmem:[#allocation2 + $0x178] sm:$0xf0] }
 0x15e   :  { %2962 = vmatpush.bf16.msra.mxu2 %v4376_v11  ;;  %v2723_v11 = vpop.f32.mrf.mxu3  ;;  %v4568_v33 = vor.u32 %v5336_v10, %v4567_v9  ;;  %v4764_v9 = vor.u32 %v5378_v61, %v4761_v62  ;;  %v3945_v10 = vld [vmem:[#allocation2 + $0x478] sm:$0xf0]  ;;  %v5342_v43 = vld [vmem:[#allocation2 + $0x98c] sm:$0xf] }
 0x15f   :  { %2975 = vmatpush.bf16.msra.mxu3 %v4760_v19  ;;  %v5318_v19 = vld [vmem:[#allocation2 + $0x8cc] sm:$0xf]  ;;  %v4233_v36 = vld [vmem:[#allocation2 + $0x6b8] sm:$0xf0] }
 0x160   :  { %2937 = vmatpush.bf16.msra.mxu0 %v3560_v27  ;;  %v4140_v27 = vor.u32 %v5222_v13, %v4137_v17  ;;  %v5270_v11 = vld [vmem:[#allocation2 + $0x74c] sm:$0xf]  ;;  %v4713_v13 = vld [vmem:[#allocation2 + $0xa78] sm:$0xf0] }
 0x161   :  { %2950 = vmatpush.bf16.msra.mxu1 %v3944_v28  ;;  %v4524_v28 = vor.u32 %v5318_v19, %v4521_v20  ;;  %v4332_v19 = vor.u32 %v5270_v11, %v4329_v12  ;;  %v5066_v20 = vld [vmem:[#allocation2 + $0xec] sm:$0xf]  ;;  %v4716_v25 = vor.u32 %v5366_v56, %v4713_v13  ;;  %v4185_v57 = vld [vmem:[#allocation2 + $0x658] sm:$0xf0]  ;;  %v5443_v11 = vld [vmem:[%s5831_s3 + $0xb0] sm:$0xff] }
 0x162   :  { %2963 = vmatpush.bf16.msra.mxu2 %v4328_v23  ;;  %v5114_v23 = vld [vmem:[#allocation2 + $0x26c] sm:$0xf]  ;;  %v5451_v12 = vld [vmem:[%s5831_s3 + $0xf0] sm:$0xff] }
 0x163   :  { %2976 = vmatpush.bf16.msra.mxu3 %v4712_v32  ;;  %v5306_v32 = vld [vmem:[#allocation2 + $0x86c] sm:$0xf]  ;;  %v3708_v37 = vor.u32 %v5114_v23, %v3705_v29  ;;  %v4665_v29 = vld [vmem:[#allocation2 + $0xa18] sm:$0xf0] }
 0x164   :  { %2938 = vmatpush.bf16.msra.mxu0 %v3512_v44  ;;  %v4476_v41 = vor.u32 %v5306_v32, %v4473_v34  ;;  %v4860_v44 = vor.u32 %v5402_v35, %v4857_v59  ;;  %v5354_v23 = vld [vmem:[#allocation2 + $0x9ec] sm:$0xf]  ;;  %v3465_v35 = vld [vmem:[#allocation2 + $0xb8] sm:$0xf0] }
 0x165   :  { %2951 = vmatpush.bf16.msra.mxu1 %v3896_v46  ;;  %v5294_v46 = vld [vmem:[#allocation2 + $0x80c] sm:$0xf] }
 0x166   :  { %2964 = vmatpush.bf16.msra.mxu2 %v4280_v47  ;;  %v4425_v47 = vld [vmem:[#allocation2 + $0x838] sm:$0xf0]  ;;  %v5054_v34 = vld [vmem:[#allocation2 + $0x8c] sm:$0xf] }
 0x167   :  { %2977 = vmatpush.bf16.msra.mxu3 %v4664_v54  ;;  %v4428_v2 = vor.u32 %v5294_v46, %v4425_v47  ;;  %v5090_v54 = vld [vmem:[#allocation2 + $0x1ac] sm:$0xf]  ;;  %v3468_v45 = vor.u32 %v5054_v34, %v3465_v35  ;;  %v4236_v47 = vor.u32 %v5246_v42, %v4233_v36  ;;  %v5439_v42 = vld [vmem:[%s5831_s3 + $0x90] sm:$0xff] }
 0x168   :  { %2939 = vmatpush.bf16.msra.mxu0 %v3464_v60  ;;  %v4377_v60 = vld [vmem:[#allocation2 + $0x7d8] sm:$0xf0]  ;;  %v5150_v59 = vld [vmem:[#allocation2 + $0x38c] sm:$0xf] }
 0x169   :  { %2952 = vmatpush.bf16.msra.mxu1 %v3848_v63  ;;  %v3612_v63 = vor.u32 %v5090_v54, %v3609_v55  ;;  %v4380_v4 = vor.u32 %v5282_v40, %v4377_v60  ;;  %v5042_v48 = vld [vmem:[#allocation2 + $0x2c] sm:$0xf]  ;;  %v3801_v54 = vld [vmem:[#allocation2 + $0x358] sm:$0xf0] }
 0x16a   :  { %2965 = vmatpush.bf16.msra.mxu2 %v4232_v0  ;;  %v5234_v55 = vld [vmem:[#allocation2 + $0x62c] sm:$0xf]  ;;  %v4569_v40 = vld [vmem:[#allocation2 + $0x958] sm:$0xf0]  ;;  %v3420_v60 = vor.u32 %v5042_v48, %v3417_v49 }
 0x16b   :  { %2978 = vmatpush.bf16.msra.mxu3 %v4616_v7  ;;  %v5174_v7 = vld [vmem:[#allocation2 + $0x44c] sm:$0xf]  ;;  %v4188_v62 = vor.u32 %v5234_v55, %v4185_v57 }
 0x16c   :  { %2940 = vmatpush.bf16.msra.mxu0 %v3416_v16  ;;  %v5698_v0 = vpop.f32.mrf.mxu0  ;;  %v3564_v16 = vor.u32 %v5078_v5, %v3561_v18  ;;  %v3948_v17 = vor.u32 %v5174_v7, %v3945_v10  ;;  %v5330_v58 = vld [vmem:[#allocation2 + $0x92c] sm:$0xf]  ;;  %v5444_v5 = vld [vmem:[%s5831_s3 + $0xb8] sm:$0xff]  ;;  %v461_v7 = vperm.slane %v5679_v39, 6  ;;  %v5435_v10 = vld [vmem:[%s5831_s3 + $0x70] sm:$0xff] }
 0x16d   :  { %2953 = vmatpush.bf16.msra.mxu1 %v3800_v21  ;;  %v5700_v8 = vpop.f32.mrf.mxu1  ;;  %v3513_v21 = vld [vmem:[#allocation2 + $0x118] sm:$0xf0]  ;;  %v5426_v13 = vld [vmem:[%s5831_s3 + $0x28] sm:$0xff] }
 0x16e   :  { %2966 = vmatpush.bf16.msra.mxu2 %v4184_v22  ;;  %v5162_v22 = vld [vmem:[#allocation2 + $0x3ec] sm:$0xf]  ;;  %v3516_v30 = vor.u32 %v5066_v20, %v3513_v21  ;;  %v5452_v18 = vld [vmem:[%s5831_s3 + $0xf8] sm:$0xff]  ;;  %v2735_v56 = vadd.f32 %v5698_v0, %v461_v7  ;;  %v5425_v21 = vld [vmem:[%s5831_s3 + $0x20] sm:$0xff] }
 0x16f   :  { %2979 = vmatpush.bf16.msra.mxu3 %v4568_v33  ;;  %2941 = vmatmul.bf16.vlgmr.msra.gmra.mxu0 %v5596_v14  ;;  %v3897_v33 = vld [vmem:[#allocation2 + $0x418] sm:$0xf0]  ;;  %v5450_v0 = vld [vmem:[%s5831_s3 + $0xe8] sm:$0xff] }
 0x170   :  { %2985 = vmatpush.bf16.msrb.mxu0 %v3756_v26  ;;  %2954 = vmatmul.bf16.vlgmr.msra.gmra.mxu1 %v5598_v15  ;;  %v5258_v26 = vld [vmem:[#allocation2 + $0x6ec] sm:$0xf]  ;;  %v3900_v52 = vor.u32 %v5162_v22, %v3897_v33  ;;  %v2748_v20 = vadd.f32 %v5700_v8, %v2735_v56  ;;  %v5449_v8 = vld [vmem:[%s5831_s3 + $0xe0] sm:$0xff] }
 0x171   :  { %2998 = vmatpush.bf16.msrb.mxu1 %v4140_v27  ;;  %2967 = vmatmul.bf16.vlgmr.msra.gmra.mxu2 %v5588_v1  ;;  %v4281_v27 = vld [vmem:[#allocation2 + $0x718] sm:$0xf0]  ;;  %v5446_v48 = vld [vmem:[%s5831_s3 + $0xc8] sm:$0xff] }
 0x172   :  { %3011 = vmatpush.bf16.msrb.mxu2 %v4524_v28  ;;  %2980 = vmatmul.bf16.vlgmr.msra.gmra.mxu3 %v5593_v6  ;;  %v4284_v32 = vor.u32 %v5258_v26, %v4281_v27 }
 0x173   :  { %3024 = vmatpush.bf16.msrb.mxu3 %v4908_v31 }
 0x174   :  { %2986 = vmatpush.bf16.msrb.mxu0 %v3708_v37  ;;  %v5702_v24 = vpop.f32.mrf.mxu2  ;;  %v2736_v31 = vpop.f32.mrf.mxu0 }
 0x175   :  { %2999 = vmatpush.bf16.msrb.mxu1 %v4092_v38  ;;  %v5704_v28 = vpop.f32.mrf.mxu3  ;;  %v2749_v37 = vpop.f32.mrf.mxu1  ;;  %v4668_v38 = vor.u32 %v5354_v23, %v4665_v29  ;;  %v2761_v23 = vadd.f32 %v5702_v24, %v2748_v20  ;;  %v5424_v29 = vld [vmem:[%s5831_s3 + $0x18] sm:$0xff] }
 0x176   :  { %3012 = vmatpush.bf16.msrb.mxu2 %v4476_v41  ;;  %v3849_v41 = vld [vmem:[#allocation2 + $0x3b8] sm:$0xf0]  ;;  %v5423_v37 = vld [vmem:[%s5831_s3 + $0x10] sm:$0xff] }
 0x177   :  { %3025 = vmatpush.bf16.msrb.mxu3 %v4860_v44  ;;  %v4617_v44 = vld [vmem:[#allocation2 + $0x9b8] sm:$0xf0]  ;;  %v3852_v46 = vor.u32 %v5150_v59, %v3849_v41  ;;  %v2774_v35 = vadd.f32 %v5704_v28, %v2761_v23  ;;  %v5431_v41 = vld [vmem:[%s5831_s3 + $0x50] sm:$0xff] }
 0x178   :  { %2987 = vmatpush.bf16.msrb.mxu0 %v3660_v50  ;;  %v5138_v50 = vld [vmem:[#allocation2 + $0x32c] sm:$0xf]  ;;  %v5440_v31 = vld [vmem:[%s5831_s3 + $0x98] sm:$0xff] }
 0x179   :  { %3000 = vmatpush.bf16.msrb.mxu1 %v4044_v53  ;;  %v3804_v61 = vor.u32 %v5138_v50, %v3801_v54  ;;  %v5448_v24 = vld [vmem:[%s5831_s3 + $0xd8] sm:$0xff]  ;;  %v5421_v50 = vld [vmem:[%s5831_s3] sm:$0xff] }
 0x17a   :  { %3013 = vmatpush.bf16.msrb.mxu2 %v4428_v2  ;;  %v4620_v2 = vor.u32 %v5342_v43, %v4617_v44  ;;  %v5447_v43 = vld [vmem:[%s5831_s3 + $0xd0] sm:$0xff]  ;;  %v5422_v44 = vld [vmem:[%s5831_s3 + $0x8] sm:$0xff]  ;;  %v5445_v54 = vld [vmem:[%s5831_s3 + $0xc0] sm:$0xff] }
 0x17b   :  { %3026 = vmatpush.bf16.msrb.mxu3 %v4812_v51 }
 0x17c   :  { %2988 = vmatpush.bf16.msrb.mxu0 %v3612_v63  ;;  %v2762_v53 = vpop.f32.mrf.mxu2  ;;  %v4572_v63 = vor.u32 %v5330_v58, %v4569_v40 }
 0x17d   :  { %3001 = vmatpush.bf16.msrb.mxu1 %v3996_v3  ;;  %v2775_v51 = vpop.f32.mrf.mxu3  ;;  %v5428_v3 = vld [vmem:[%s5831_s3 + $0x38] sm:$0xff]  ;;  %v5429_v53 = vld [vmem:[%s5831_s3 + $0x40] sm:$0xff] }
 0x17e   :  { %3014 = vmatpush.bf16.msrb.mxu2 %v4380_v4  ;;  %v5436_v4 = vld [vmem:[%s5831_s3 + $0x78] sm:$0xff] }
 0x17f   :  { %3027 = vmatpush.bf16.msrb.mxu3 %v4764_v9  ;;  %v5427_v9 = vld [vmem:[%s5831_s3 + $0x30] sm:$0xff] }
 0x180   :  { %2989 = vmatpush.bf16.msrb.mxu0 %v3564_v16  ;;  %v5434_v16 = vld [vmem:[%s5831_s3 + $0x68] sm:$0xff] }
 0x181   :  { %3002 = vmatpush.bf16.msrb.mxu1 %v3948_v17  ;;  %v5442_v17 = vld [vmem:[%s5831_s3 + $0xa8] sm:$0xff] }
 0x182   :  { %3015 = vmatpush.bf16.msrb.mxu2 %v4332_v19  ;;  %v462_v19 = vperm.slane %v5679_v39, 7  ;;  %v5441_v39 = vld [vmem:[%s5831_s3 + $0xa0] sm:$0xff] }
 0x183   :  { %3028 = vmatpush.bf16.msrb.mxu3 %v4716_v25  ;;  %v5433_v25 = vld [vmem:[%s5831_s3 + $0x60] sm:$0xff] }
 0x184   :  { %2990 = vmatpush.bf16.msrb.mxu0 %v3516_v30  ;;  %v5432_v30 = vld [vmem:[%s5831_s3 + $0x58] sm:$0xff] }
 0x185   :  { %3003 = vmatpush.bf16.msrb.mxu1 %v3900_v52 }
 0x186   :  { %3016 = vmatpush.bf16.msrb.mxu2 %v4284_v32 }
 0x187   :  { %3029 = vmatpush.bf16.msrb.mxu3 %v4668_v38 }
 0x188   :  { %2991 = vmatpush.bf16.msrb.mxu0 %v3468_v45  ;;  %v5430_v45 = vld [vmem:[%s5831_s3 + $0x48] sm:$0xff] }
 0x189   :  { %3004 = vmatpush.bf16.msrb.mxu1 %v3852_v46  ;;  %v5438_v46 = vld [vmem:[%s5831_s3 + $0x88] sm:$0xff] }
 0x18a   :  { %3017 = vmatpush.bf16.msrb.mxu2 %v4236_v47 }
 0x18b   :  { %3030 = vmatpush.bf16.msrb.mxu3 %v4620_v2  ;;  %v5437_v2 = vld [vmem:[%s5831_s3 + $0x80] sm:$0xff] }
 0x18c   :  { %2992 = vmatpush.bf16.msrb.mxu0 %v3420_v60  ;;  %v2786_v22 = vpop.f32.mrf.mxu0 }
 0x18d   :  { %3005 = vmatpush.bf16.msrb.mxu1 %v3804_v61  ;;  %v2787_v33 = vadd.f32 %v2786_v22, %v462_v19  ;;  %v2799_v26 = vpop.f32.mrf.mxu1 }
 0x18e   :  { %3018 = vmatpush.bf16.msrb.mxu2 %v4188_v62 }
 0x18f   :  { %3031 = vmatpush.bf16.msrb.mxu3 %v4572_v63  ;;  %2993 = vmatmul.bf16.vlgmr.msrb.gmra.mxu0 %v5596_v14  ;;  %v2800_v27 = vadd.f32 %v2799_v26, %v2787_v33  ;;  %v452_v63 = vld [vmem:[#allocation4 + $0x8] sm:$0xf] }
 0x190   :  { %3309 = vmatpush.bf16.msra.mxu0 %v5428_v3  ;;  %3006 = vmatmul.bf16.vlgmr.msrb.gmra.mxu1 %v5598_v15  ;;  %v463_v3 = vperm.slane %v452_v63, 0 }
 0x191   :  { %3322 = vmatpush.bf16.msra.mxu1 %v5436_v4  ;;  %3019 = vmatmul.bf16.vlgmr.msrb.gmra.mxu2 %v5588_v1 }
 0x192   :  { %3335 = vmatpush.bf16.msra.mxu2 %v5444_v5  ;;  %3032 = vmatmul.bf16.vlgmr.msrb.gmra.mxu3 %v5593_v6  ;;  %v464_v5 = vperm.slane %v452_v63, 1 }
 0x193   :  { %3348 = vmatpush.bf16.msra.mxu3 %v5452_v18 }
 0x194   :  { %3310 = vmatpush.bf16.msra.mxu0 %v5427_v9  ;;  %v2812_v52 = vpop.f32.mrf.mxu2  ;;  %v2788_v38 = vpop.f32.mrf.mxu0 }
 0x195   :  { %3323 = vmatpush.bf16.msra.mxu1 %v5435_v10  ;;  %v2813_v32 = vadd.f32 %v2812_v52, %v2800_v27  ;;  %v2825_v34 = vpop.f32.mrf.mxu3  ;;  %v2801_v36 = vpop.f32.mrf.mxu1  ;;  %v465_v27 = vperm.slane %v452_v63, 2 }
 0x196   :  { %3336 = vmatpush.bf16.msra.mxu2 %v5443_v11 }
 0x197   :  { %3349 = vmatpush.bf16.msra.mxu3 %v5451_v12  ;;  %v2826_v59 = vadd.f32 %v2825_v34, %v2813_v32 }
 0x198   :  { %3311 = vmatpush.bf16.msra.mxu0 %v5426_v13 }
 0x199   :  { %3324 = vmatpush.bf16.msra.mxu1 %v5434_v16  ;;  %v3040_v28 = vpack.c.bf16 %v2826_v59, %v2774_v35 }
 0x19a   :  { %3337 = vmatpush.bf16.msra.mxu2 %v5442_v17 }
 0x19b   :  { %3350 = vmatpush.bf16.msra.mxu3 %v5450_v0  ;;  %3046 = vst [vmem:[%s5833_s5 + $0x18] sm:$0xff] %v3040_v28 }
 0x19c   :  { %3312 = vmatpush.bf16.msra.mxu0 %v5425_v21  ;;  %v2814_v47 = vpop.f32.mrf.mxu2 }
 0x19d   :  { %3325 = vmatpush.bf16.msra.mxu1 %v5433_v25  ;;  %v2827_v49 = vpop.f32.mrf.mxu3 }
 0x19e   :  { %3338 = vmatpush.bf16.msra.mxu2 %v5441_v39 }
 0x19f   :  { %3351 = vmatpush.bf16.msra.mxu3 %v5449_v8 }
 0x1a0   :  { %3313 = vmatpush.bf16.msra.mxu0 %v5424_v29  ;;  %v466_v29 = vperm.slane %v452_v63, 3 }
 0x1a1   :  { %3326 = vmatpush.bf16.msra.mxu1 %v5432_v30 }
 0x1a2   :  { %3339 = vmatpush.bf16.msra.mxu2 %v5440_v31 }
 0x1a3   :  { %3352 = vmatpush.bf16.msra.mxu3 %v5448_v24 }
 0x1a4   :  { %3314 = vmatpush.bf16.msra.mxu0 %v5423_v37 }
 0x1a5   :  { %3327 = vmatpush.bf16.msra.mxu1 %v5431_v41 }
 0x1a6   :  { %3340 = vmatpush.bf16.msra.mxu2 %v5439_v42 }
 0x1a7   :  { %3353 = vmatpush.bf16.msra.mxu3 %v5447_v43 }
 0x1a8   :  { %3315 = vmatpush.bf16.msra.mxu0 %v5422_v44 }
 0x1a9   :  { %3328 = vmatpush.bf16.msra.mxu1 %v5430_v45  ;;  %v5458_v45 = vld [vmem:[#allocation6] ss:$0 sm:$0xff] }
 0x1aa   :  { %3341 = vmatpush.bf16.msra.mxu2 %v5438_v46 }
 0x1ab   :  { %3354 = vmatpush.bf16.msra.mxu3 %v5446_v48 }
 0x1ac   :  { %3316 = vmatpush.bf16.msra.mxu0 %v5421_v50  ;;  %v2838_v55 = vpop.f32.mrf.mxu0 }
 0x1ad   :  { %3329 = vmatpush.bf16.msra.mxu1 %v5429_v53  ;;  %v2851_v57 = vpop.f32.mrf.mxu1  ;;  %v2839_v4 = vadd.f32 %v2838_v55, %v463_v3 }
 0x1ae   :  { %3342 = vmatpush.bf16.msra.mxu2 %v5437_v2 }
 0x1af   :  { %3355 = vmatpush.bf16.msra.mxu3 %v5445_v54  ;;  %3317 = vmatmul.bf16.vlgmr.msra.gmra.mxu0 %v5596_v14  ;;  %v2852_v18 = vadd.f32 %v2851_v57, %v2839_v4 }
 0x1b0   :  { %3330 = vmatmul.bf16.vlgmr.msra.gmra.mxu1 %v5598_v15 }
 0x1b1   :  { %3343 = vmatmul.bf16.vlgmr.msra.gmra.mxu2 %v5588_v1 }
 0x1b2   :  { %3356 = vmatmul.bf16.vlgmr.msra.gmra.mxu3 %v5593_v6 }
 0x1b4   :  { %v2864_v51 = vpop.f32.mrf.mxu2  ;;  %v2840_v40 = vpop.f32.mrf.mxu0 }
 0x1b5   :  { %v2877_v58 = vpop.f32.mrf.mxu3  ;;  %v2853_v60 = vpop.f32.mrf.mxu1  ;;  %v2865_v1 = vadd.f32 %v2864_v51, %v2852_v18 }
 0x1b7   :  { %v2878_v12 = vadd.f32 %v2877_v58, %v2865_v1 }
 0x1bc   :  { %v2866_v61 = vpop.f32.mrf.mxu2 }
 0x1bd   :  { %v2879_v62 = vpop.f32.mrf.mxu3 }
 0x1cc   :  { %v2890_v14 = vpop.f32.mrf.mxu0 }
 0x1cd   :  { %v2891_v7 = vadd.f32 %v2890_v14, %v464_v5  ;;  %v2903_v15 = vpop.f32.mrf.mxu1 }
 0x1cf   :  { %v2904_v9 = vadd.f32 %v2903_v15, %v2891_v7 }
 0x1d4   :  { %v2916_v10 = vpop.f32.mrf.mxu2  ;;  %v2892_v13 = vpop.f32.mrf.mxu0 }
 0x1d5   :  { %v2917_v6 = vadd.f32 %v2916_v10, %v2904_v9  ;;  %v2929_v11 = vpop.f32.mrf.mxu3  ;;  %v2905_v16 = vpop.f32.mrf.mxu1 }
 0x1d7   :  { %v2930_v56 = vadd.f32 %v2929_v11, %v2917_v6 }
 0x1d9   :  { %v3041_v17 = vpack.c.bf16 %v2930_v56, %v2878_v12 }
 0x1db   :  { %3047 = vst [vmem:[%s5833_s5 + $0x20] sm:$0xff] %v3041_v17 }
 0x1dc   :  { %v2918_v19 = vpop.f32.mrf.mxu2 }
 0x1dd   :  { %v2931_v0 = vpop.f32.mrf.mxu3 }
 0x1ec   :  { %v2942_v20 = vpop.f32.mrf.mxu0 }
 0x1ed   :  { %v2955_v21 = vpop.f32.mrf.mxu1  ;;  %v2943_v23 = vadd.f32 %v2942_v20, %v465_v27 }
 0x1ef   :  { %v2956_v30 = vadd.f32 %v2955_v21, %v2943_v23 }
 0x1f4   :  { %v2968_v22 = vpop.f32.mrf.mxu2  ;;  %v2944_v39 = vpop.f32.mrf.mxu0 }
 0x1f5   :  { %v2981_v25 = vpop.f32.mrf.mxu3  ;;  %v2957_v33 = vpop.f32.mrf.mxu1  ;;  %v2969_v34 = vadd.f32 %v2968_v22, %v2956_v30 }
 0x1f7   :  { %v2982_v38 = vadd.f32 %v2981_v25, %v2969_v34 }
 0x1fc   :  { %v2970_v26 = vpop.f32.mrf.mxu2 }
 0x1fd   :  { %v2983_v8 = vpop.f32.mrf.mxu3 }
 0x20c   :  { %v2994_v31 = vpop.f32.mrf.mxu0 }
 0x20d   :  { %v2995_v52 = vadd.f32 %v2994_v31, %v466_v29  ;;  %v3007_v24 = vpop.f32.mrf.mxu1 }
 0x20f   :  { %v3008_v32 = vadd.f32 %v3007_v24, %v2995_v52 }
 0x214   :  { %v3020_v35 = vpop.f32.mrf.mxu2  ;;  %v2996_v42 = vpop.f32.mrf.mxu0 }
 0x215   :  { %v3021_v59 = vadd.f32 %v3020_v35, %v3008_v32  ;;  %v3033_v37 = vpop.f32.mrf.mxu3  ;;  %v3009_v36 = vpop.f32.mrf.mxu1 }
 0x217   :  { %v3034_v41 = vadd.f32 %v3033_v37, %v3021_v59 }
 0x219   :  { %v3042_v28 = vpack.c.bf16 %v3034_v41, %v2982_v38 }
 0x21b   :  { %3048 = vst [vmem:[%s5833_s5 + $0x28] sm:$0xff] %v3042_v28 }
 0x21c   :  { %v3022_v43 = vpop.f32.mrf.mxu2 }
 0x21d   :  { %v3035_v44 = vpop.f32.mrf.mxu3 }
 0x22c   :  { %v3318_v46 = vpop.f32.mrf.mxu0 }
 0x22d   :  { %v3319_v47 = vadd.f32 %v5458_v45, %v3318_v46  ;;  %v3331_v48 = vpop.f32.mrf.mxu1 }
 0x22f   :  { %v3332_v49 = vadd.f32 %v3331_v48, %v3319_v47 }
 0x234   :  { %v3344_v50 = vpop.f32.mrf.mxu2  ;;  %v3320_v54 = vpop.f32.mrf.mxu0 }
 0x235   :  { %v3345_v53 = vadd.f32 %v3344_v50, %v3332_v49  ;;  %v3357_v2 = vpop.f32.mrf.mxu3  ;;  %v3333_v55 = vpop.f32.mrf.mxu1 }
 0x237   :  { %v3358_v57 = vadd.f32 %v3357_v2, %v3345_v53 }
 0x239   :  { %3362 = vst.msk [vmem:[%s5834_s6] sm:$0xff] %vm3361_vm0, %v3358_v57 }
 0x23c   :  { %v3346_v51 = vpop.f32.mrf.mxu2 }
 0x23d   :  { %v3359_v58 = vpop.f32.mrf.mxu3 }
 0x23e   :  { %3371 = vsyncpa [#allocation3], 1 }
 0x23f   :  { %3372 = vsyncpa [#allocation5], 1 }

// kernel: discriminator_forward.5
= control target key start
LH: loop header
LB: loop body
LE: loop exit
PB: predicated region body
PF: predicated region fallthrough
CT: control target
= control target key end

     0   :  { %s2411_s0 = inlined_call_operand.hbm [shape: f32[2,1,32], index: 0, kind: input, shape index: {}]   ;;  %s2412_s1 = inlined_call_operand.vmem [shape: bf16[2,4,2,16,48], index: 1, kind: input, shape index: {}]   ;;  %s2413_s2 = inlined_call_operand.vmem [shape: f32[2,4,2,16,1], index: 2, kind: input, shape index: {}]   ;;  %s2414_s3 = inlined_call_operand.vmem [shape: f32[16,1], index: 3, kind: input, shape index: {}]   ;;  %s2415_s4 = inlined_call_operand.vmem [shape: f32[16,1], index: 4, kind: input, shape index: {}]   ;;  %s2416_s5 = inlined_call_operand.hbm [shape: bf16[2,3,16,16], index: 5, kind: input, shape index: {}]   ;;  %s2417_s6 = inlined_call_operand.vmem [shape: f32[2,16,1], index: 6, kind: input, shape index: {}]   ;;  %s2418_s7 = inlined_call_operand.vmem [shape: f32[16,1], index: 7, kind: input, shape index: {}]   ;;  %s2419_s8 = inlined_call_operand.<no memory space> [shape: f32[1,1], index: 8, kind: input, shape index: {}]   ;;  %s2420_s9 = inlined_call_operand.hbm [shape: f32[2,1,32], index: 9, kind: output, shape index: {}]  }
   0x1   :  { %2427 = sst [smem:[#allocation14_spill]] %s2416_s5  ;;  %v14_v0 = vstv %s2419_s8 }
   0x2   :  { %15 = vst [vmem:[#allocation4] sm:$0x1] %v14_v0 }
   0x3   :  { %16 = vsyncpa [#allocation6], 0 }
   0x4   :  { %18 = vsyncpa [#allocation6 + $0x1], 0 }
   0x5   :  { %19 = vsyncpa [#allocation9], 0 }
   0x6   :  { %20 = vsyncpa [#allocation7], 0 }
   0x7   :  { %22 = vsyncpa [#allocation7 + $0x1], 0  ;;  %s2104_s11 = smov 0   ;;  %s2106_s12 = smov 0  }
   0x8   :  { %s2108_s13 = smov 0   ;;  %s2110_s14 = smov 0  }
   0x9 LB: > { %s2428_s5 = sld [smem:[#allocation14_spill]]  ;;  %s2128_s17 = sadd.s32 4294967295, %s2033_s14   ;;  %s2033_s14 = sphi %s2110_s14, %s2441_s14   ;;  %s2029_s13 = sphi %s2108_s13, %s2440_s13   ;;  %s2025_s12 = sphi %s2106_s12, %s2439_s12   ;;  %s2021_s11 = sphi %s2104_s11, %s2438_s11  }
   0xa   : > { %p1580_p0 = scmp.ge.s32.totalorder %s2033_s14, 1  ;;  %p49_p1 = scmp.eq.s32.totalorder %s2128_s17, 0 }
   0xb   : > { %p263_p2 = scmp.lt.s32.totalorder %s2033_s14, 3  ;;  %s2035_s19 = smov [#allocation8]  }
   0xc   : > { %s282_s20 = sshll.u32 %s2035_s19, 4  ;;  %s2036_s21 = smov 64   ;;  %s283_s20 = int_to_ptr.vmem [resolvable:$true] %s282_s20 }
   0xd   : > { %p2133_p3 = pnand %p1580_p0, %p263_p2  ;;  %s2037_s22 = smov 4  }
   0xe   : > { %s1579_s23 = sadd.s32 4294967294, %s2033_s14   ;;  %s2144_s24 = sadd.s32 1, %s2033_s14  }
   0xf   : > { %s280_s16 = sshll.u32 %s2428_s5, 4  ;;  %p1835_p4 = pneg %p2133_p3  ;;  %s281_s16 = int_to_ptr.hbm [resolvable:$true] %s280_s16 }
  0x10   : > { %s35_s25 = sadd.s32 1, %s2029_s13  ;;  %s32_s26 = ssub.s32 %s2033_s14, %s2144_s24 }
  0x11   : > { %p1836_p6 = pnand %p1835_p4, %p49_p1  ;;  %p42_p7 = scmp.ne.s32.totalorder %s2029_s13, %s2025_s12 }
  0x12   : > { %p33_p8 = scmp.eq.s32.totalorder %s32_s26, 0  ;;  %p43_p9 = scmp.eq.s32.totalorder %s2033_s14, 0 }
  0x13   : > { %1838 = dma.hbm_to_vmem [thread:$0]  (!%p1836_p6), %s281_s16, 768, %s283_s20, [#allocation9], %s2036_s21, %s2036_s21, %s2037_s22  }
  0x14   : > { %p48_p10 = scmp.ne.s32.totalorder %s2025_s12, %s2021_s11  ;;  %p250_p11 = scmp.eq.s32.totalorder %s2128_s17, 1 }
  0x15   : > { %s2156_s27 = scalar_select %p33_p8, %s2029_s13, %s35_s25  }
  0x16   : > { %p2160_p12 = por %p49_p1, %p48_p10  ;;  %p2164_p13 = por %p250_p11, %p42_p7 }
  0x17   : > { %p256_p0 = scmp.eq.s32.totalorder %s1579_s23, 1  ;;  %p44_p2 = por %p43_p9, %p42_p7 }
  0x18   : > { %s305_s30 = sand.u32 1, %s2029_s13   ;;  %p1848_p6 = scmp.lt.s32.totalorder %s2033_s14, 2 }
  0x19   : > { %p2169_p4 = por %p256_p0, %p48_p10  ;;  %s311_s16 = scalar_lea.hbm %s2411_s0, %s2033_s14 }
  0x1a   : > { %s313_s19 = sshll.u32 %s311_s16, 4  ;;  %s308_s20 = scalar_lea.vmem [#allocation5], %s305_s30  ;;  %s314_s19 = int_to_ptr.hbm [resolvable:$true] %s313_s19 }
  0x1b   : > { %s315_s21 = sshll.u32 %s308_s20, 4  ;;  %p2178_p8 = pnand %p1848_p6, %p44_p2  ;;  %s316_s21 = int_to_ptr.vmem [resolvable:$true] %s315_s21 }
  0x1c   : > { %s306_s23 = scalar_lea.sflag [#allocation6], %s305_s30  ;;  %s1933_s25 = sshra.s32 %s314_s19, 4  ;;  %s1934_s25 = int_to_ptr.hbm [resolvable:$true] %s1933_s25 }
  0x1d   : > { %s1935_s26 = scalar_lea.hbm %s1934_s25, 1  ;;  %p1937_p9 = pneg %p2178_p8 }
  0x1e   : > { %p1936_p7 = scmp.ne.s32.totalorder %s1934_s25, %s1935_s26  ;;  %s1940_s16 = scalar_lea.hbm %s2411_s0, 2 }
  0x1f   : > { %p1941_p0 = scmp.lt.s32.totalorder %s1934_s25, %s2411_s0  ;;  %p1942_p2 = scmp.lt.s32.totalorder %s1940_s16, %s1935_s26 }
  0x20   : > { %p1938_p10 = pnand %p1937_p9, %p1936_p7 }
  0x21   : > { %p1943_p6 = por %p1942_p2, %p1941_p0 }
  0x22   : > { %p1939_p11 = pneg %p1938_p10 }
  0x24   : > { %p1944_p5 = pnand %p1943_p6, %p1939_p11 }
  0x26   : > { %1947 = shalt.err (!%p1944_p5)
}
  0x27   : > { %1842 = dma.hbm_to_vmem [thread:$0]  (!%p2178_p8), %s314_s19, 16, %s316_s21, %s306_s23  }
  0x28   : > { %340 = sbr.rel (%p2133_p3) target bundleno = 2020 (0x7e4), region = 56  ;;  %s2195_s30 = sand.u32 (!%p2133_p3), 1, %s2025_s12  }
  0x29   : > { %s343_s8 = scalar_lea.sflag (!%p2133_p3), [#allocation6], %s2195_s30  ;;  %s345_s15 = scalar_lea.vmem (!%p2133_p3), [#allocation5], %s2195_s30 }
  0x2d   : > { %2008 = dma.done.wait (%p2160_p12), %s343_s8, 16  }
  0x2e   : > { %2010 = vsyncadd (%p2160_p12), %s343_s8, 4294967280 }
  0x2f   : > { %2012 = dma.done.wait (%p49_p1), [#allocation9], 768  }
  0x30   : > { %2014 = vsyncadd (%p49_p1), [#allocation9], 4294966528  ;;  %v2038_v1 = vmov 0   ;;  %v429_v2 = vld [vmem:[%s2415_s4] sm:$0xff]  ;;  %v430_v4 = vld [vmem:[%s2415_s4 + $0x8] sm:$0xff]  ;;  %vm405_vm0 = vcmask 15360  }
  0x31   : > { %1900 = vset.pattern.permute.xlu1 %v2038_v1  ;;  %1899 = vset.pattern.permute.xlu0 %v2038_v1  ;;  %v411_v3 = vld [vmem:[%s2414_s3] sm:$0xff]  ;;  %v412_v5 = vld [vmem:[%s2414_s3 + $0x8] sm:$0xff]  ;;  %vm408_vm1 = vcmask 294160   ;;  %v2039_v6 = vmov 0.0   ;;  %s2040_s26 = smov 2   ;;  %vm457_vm4 = vcmask 277520  }
  0x32   : > { %1901 = vset.pattern.permute.xlu2 %v2038_v1  ;;  %433 = vperm.xlu1 %1900, %v429_v2   ;;  %406 = vst.msk [vmem:[#allocation2] sm:$0xff] %vm405_vm0, %v2039_v6  ;;  %v1902_v7 = vld [vmem:[%s345_s15] ss:$0 sm:$0xff]  ;;  %s2041_s16 = smov 125   ;;  %s2042_s20 = smov 126   ;;  %vm472_vm5 = vcmask 257024  }
  0x33   : > { %416 = vperm.xlu0 %1899, %v411_v3   ;;  %409 = vst.msk [vmem:[#allocation2] sm:$0xff] %vm408_vm1, %v2039_v6  ;;  %s2043_s8 = smov 127   ;;  %p394_p1 = scmp.lt.s32.totalorder %s2128_s17, 1  ;;  %vm546_vm6 = vcmask 392192   ;;  %vm578_vm9 = vcmask 80912  }
  0x34   : > { %407 = vst.msk [vmem:[#allocation2 + $0x8] sm:$0xff] %vm405_vm0, %v2039_v6  ;;  %s2044_s5 = smov 112   ;;  %s2045_s18 = smov 104   ;;  %vm663_vm0 = vcmask 146512  }
  0x35   : > { %410 = vst.msk [vmem:[#allocation2 + $0x8] sm:$0xff] %vm408_vm1, %v2039_v6  ;;  %s2236_s15 = scalar_select %p394_p1, %s2128_s17, 1  ;;  %vm748_vm1 = vcmask 212112  }
  0x36   : > { %s2046_s23 = smov 120  }
  0x37   : > { %s1787_s19 = sshll.u32 %s2236_s15, 6  ;;  %s1788_s25 = sshll.u32 %s2236_s15, 7 }
  0x38   : > { %s2246_s22 = scalar_lea.vmem %s2412_s1, %s1787_s19  ;;  %s2260_s28 = scalar_lea.vmem %s2413_s2, %s1788_s25 }
  0x39   : > { %v1789_v41 = vld [vmem:[%s2246_s22] sm:$0xff]  ;;  %v512_v46 = vld [vmem:[%s2260_s28 + $0x8] sm:$0xff]  ;;  %v1801_v62 = vld [vmem:[%s2246_s22 + $0x30] sm:$0xff]  ;;  %s2425_s15 = smov 18   ;;  %s2423_s25 = smov 10  }
  0x3a   : > { %438 = vperm.xlu1 %1900, %v430_v4   ;;  %v511_v45 = vld [vmem:[%s2260_s28] sm:$0xff]  ;;  %v1609_v47 = vld [vmem:[%s2260_s28 + $0x28] sm:$0xff]  ;;  %v1793_v0 = vld [vmem:[%s2246_s22 + $0x10] sm:$0xff]  ;;  %s2421_s19 = smov 26  }
  0x3b   : > { %421 = vperm.xlu0 %1899, %v412_v5   ;;  %v1629_v48 = vld [vmem:[%s2260_s28 + $0x40] sm:$0xff]  ;;  %v1651_v50 = vld [vmem:[%s2260_s28 + $0x68] sm:$0xff] }
  0x3c   : > { %v1650_v49 = vld [vmem:[%s2260_s28 + $0x60] sm:$0xff]  ;;  %v1630_v52 = vld [vmem:[%s2260_s28 + $0x48] sm:$0xff] }
  0x3d   : > { %v1608_v51 = vld [vmem:[%s2260_s28 + $0x20] sm:$0xff] }
  0x3e   : > { %v1797_v58 = vld [vmem:[%s2246_s22 + $0x20] sm:$0xff] }
  0xa4   : > { %v434_v8 = vpop.permute.xlu1 %433 }
  0xa5   : > { %v417_v9 = vpop.permute.xlu0 %416 }
  0xa6   : > { %v427_v10 = vmul.f32 %v1902_v7, %v417_v9 }
  0xa8   : > { %v441_v11 = vadd.f32 %v434_v8, %v427_v10 }
  0xaa   : > { %vm443_vm2 = vcmp.gt.f32.partialorder %v441_v11, 0.0  ;;  %v445_v12 = vmul.f32 0.2, %v441_v11 }
  0xac   : > { %v447_v13 = vsel %vm443_vm2, %v441_v11, %v445_v12  ;;  %v439_v16 = vpop.permute.xlu1 %438  ;;  %vm833_vm2 = vcmask 277712  }
  0xad   : > { %451 = vrot.lane.b32.xlu2 %v447_v13, %s2040_s26  ;;  %v422_v14 = vpop.permute.xlu0 %421 }
  0xae   : > { %v428_v15 = vmul.f32 %v1902_v7, %v422_v14 }
  0xb0   : > { %v442_v17 = vadd.f32 %v439_v16, %v428_v15 }
  0xb2   : > { %vm444_vm3 = vcmp.gt.f32.partialorder %v442_v17, 0.0  ;;  %v446_v18 = vmul.f32 0.2, %v442_v17 }
  0xb4   : > { %v448_v19 = vsel %vm444_vm3, %v442_v17, %v446_v18  ;;  %vm853_vm3 = vcmask 130048  }
  0xb5   : > { %453 = vrot.lane.b32.xlu2 %v448_v19, %s2040_s26 }
 0x107   : > { %v452_v20 = vpop.permute.xlu2 %451 }
 0x108   : > { %458 = vst.msk [vmem:[#allocation2] sm:$0xff] %vm457_vm4, %v452_v20 }
 0x10f   : > { %v454_v21 = vpop.permute.xlu2 %453  ;;  %v489_v22 = vld [vmem:[#allocation2] sm:$0xff] }
 0x110   : > { %459 = vst.msk [vmem:[#allocation2 + $0x8] sm:$0xff] %vm457_vm4, %v454_v21  ;;  %v491_v23 = vpack.c.bf16 %v489_v22, %v489_v22 }
 0x112   : > { %495 = vrot.lane.b32.xlu0 %v491_v23, %s2041_s16  ;;  %481 = vrot.lane.b32.xlu2 %v491_v23, %s2042_s20 }
 0x117   : > { %v490_v24 = vld [vmem:[#allocation2 + $0x8] sm:$0xff] }
 0x118   : > { %v492_v25 = vpack.c.bf16 %v490_v24, %v490_v24 }
 0x11a   : > { %497 = vrot.lane.b32.xlu1 %v492_v25, %s2041_s16  ;;  %483 = vrot.lane.b32.xlu0 %v492_v25, %s2042_s20 }
 0x11b   : > { %468 = vrot.lane.b32.xlu2 %v492_v25, %s2043_s8 }
 0x122   : > { %466 = vrot.lane.b32.xlu1 %v491_v23, %s2043_s8 }
 0x16c   : > { %v482_v26 = vpop.permute.xlu2 %481 }
 0x16d   : > { %487 = vst.msk [vmem:[#allocation3 + $0x8] sm:$0xf] %vm472_vm5, %v482_v26 }
 0x175   : > { %v469_v27 = vpop.permute.xlu2 %468 }
 0x176   : > { %474 = vst.msk [vmem:[#allocation3 + $0x4] sm:$0xf] %vm472_vm5, %v469_v27 }
 0x184   : > { %v496_v28 = vpop.permute.xlu0 %495 }
 0x185   : > { %501 = vst.msk [vmem:[#allocation3 + $0x10] sm:$0xf] %vm472_vm5, %v496_v28 }
 0x18c   : > { %v498_v29 = vpop.permute.xlu1 %497  ;;  %v484_v30 = vpop.permute.xlu0 %483 }
 0x18d   : > { %502 = vst.msk [vmem:[#allocation3 + $0x14] sm:$0xf] %vm472_vm5, %v498_v29 }
 0x18e   : > { %488 = vst.msk [vmem:[#allocation3 + $0xc] sm:$0xf] %vm472_vm5, %v484_v30 }
 0x194   : > { %v467_v31 = vpop.permute.xlu1 %466  ;;  %v1800_v32 = vld [vmem:[#allocation3 + $0x10] sm:$0xff] }
 0x195   : > { %v1792_v33 = vld [vmem:[#allocation3 + $0x10] sm:$0xff]  ;;  %473 = vst.msk [vmem:[#allocation3] sm:$0xf] %vm472_vm5, %v467_v31  ;;  %v1799_v35 = vld [vmem:[#allocation3 + $0x8] sm:$0xff]  ;;  %712 = vrot.lane.b32.xlu0 %v1800_v32, %s2044_s5 }
 0x196   : > { %v1804_v34 = vld [vmem:[#allocation3 + $0x10] sm:$0xff]  ;;  %555 = vmatpush.bf16.msra.mxu0 %v1792_v33  ;;  %710 = vrot.lane.b32.xlu2 %v1799_v35, %s2044_s5  ;;  %v1791_v36 = vld [vmem:[#allocation3 + $0x8] sm:$0xff] }
 0x197   : > { %797 = vrot.lane.b32.xlu1 %v1804_v34, %s2045_s18  ;;  %v1796_v37 = vld [vmem:[#allocation3 + $0x10] sm:$0xff]  ;;  %v1803_v40 = vld [vmem:[#allocation3 + $0x8] sm:$0xff] }
 0x198   : > { %v1795_v42 = vld [vmem:[#allocation3 + $0x8] sm:$0xff] }
 0x19a   : > { %556 = vmatpush.bf16.msra.mxu0 %v1791_v36 }
 0x19c   : > { %v1798_v38 = vld [vmem:[#allocation3] sm:$0xff] }
 0x19d   : > { %v1790_v39 = vld [vmem:[#allocation3] sm:$0xff]  ;;  %627 = vrot.lane.b32.xlu0 %v1796_v37, %s2046_s23 }
 0x19e   : > { %557 = vmatpush.bf16.msra.mxu0 %v1790_v39  ;;  %708 = vrot.lane.b32.xlu2 %v1798_v38, %s2044_s5  ;;  %v1802_v43 = vld [vmem:[#allocation3] sm:$0xff] }
 0x19f   : > { %795 = vrot.lane.b32.xlu1 %v1803_v40, %s2045_s18  ;;  %v1794_v44 = vld [vmem:[#allocation3] sm:$0xff] }
 0x1a1   : > { %1605 = vmatmul.msk.bf16.vlgmr.msra.gmra.mxu0 %vm546_vm6, %v1789_v41 }
 0x1a5   : > { %625 = vrot.lane.b32.xlu0 %v1795_v42, %s2046_s23 }
 0x1a6   : > { %623 = vrot.lane.b32.xlu2 %v1794_v44, %s2046_s23 }
 0x1a7   : > { %793 = vrot.lane.b32.xlu1 %v1802_v43, %s2045_s18 }
 0x1ad   : > { %515 = vperm.xlu0 %1899, %v511_v45  }
 0x1ae   : > { %595 = vperm.xlu2 %1901, %v1608_v51  }
 0x1af   : > { %520 = vperm.xlu1 %1900, %v512_v46  }
 0x1b5   : > { %600 = vperm.xlu0 %1899, %v1609_v47  }
 0x1b6   : > { %685 = vperm.xlu2 %1901, %v1630_v52   ;;  %v927_v52 = vld [vmem:[%s2417_s6 + $0x8] sm:$0xff] }
 0x1b7   : > { %680 = vperm.xlu1 %1900, %v1629_v48  }
 0x1bd   : > { %765 = vperm.xlu0 %1899, %v1650_v49  }
 0x1bf   : > { %770 = vperm.xlu1 %1900, %v1651_v50  }
 0x1f0   : > { %v711_v53 = vpop.permute.xlu2 %710 }
 0x1f8   : > { %v709_v56 = vpop.permute.xlu2 %708 }
 0x200   : > { %v624_v63 = vpop.permute.xlu2 %623 }
 0x207   : > { %v713_v54 = vpop.permute.xlu0 %712 }
 0x208   : > { %725 = vmatpush.bf16.msra.mxu2 %v713_v54  ;;  %v596_v11 = vpop.permute.xlu2 %595 }
 0x209   : > { %v798_v55 = vpop.permute.xlu1 %797 }
 0x20a   : > { %810 = vmatpush.bf16.msra.mxu3 %v798_v55  ;;  %v1806_v55 = vld [vmem:[#allocation8 + $0x8] sm:$0xff] }
 0x20c   : > { %726 = vmatpush.bf16.msra.mxu2 %v711_v53  ;;  %v926_v53 = vld [vmem:[%s2417_s6] sm:$0xff] }
 0x20f   : > { %v628_v57 = vpop.permute.xlu0 %627 }
 0x210   : > { %640 = vmatpush.bf16.msra.mxu1 %v628_v57  ;;  %727 = vmatpush.bf16.msra.mxu2 %v709_v56  ;;  %v686_v12 = vpop.permute.xlu2 %685  ;;  %v1805_v57 = vld [vmem:[#allocation8] sm:$0xff] }
 0x211   : > { %v796_v59 = vpop.permute.xlu1 %795 }
 0x212   : > { %811 = vmatpush.bf16.msra.mxu3 %v796_v59  ;;  %v1807_v59 = vld [vmem:[#allocation8 + $0x10] sm:$0xff] }
 0x213   : > { %1647 = vmatmul.msk.bf16.vlgmr.msra.gmra.mxu2 %vm546_vm6, %v1797_v58 }
 0x217   : > { %v626_v60 = vpop.permute.xlu0 %625 }
 0x218   : > { %641 = vmatpush.bf16.msra.mxu1 %v626_v60 }
 0x219   : > { %v794_v61 = vpop.permute.xlu1 %793 }
 0x21a   : > { %812 = vmatpush.bf16.msra.mxu3 %v794_v61 }
 0x21c   : > { %642 = vmatpush.bf16.msra.mxu1 %v624_v63 }
 0x21d   : > { %1668 = vmatmul.msk.bf16.vlgmr.msra.gmra.mxu3 %vm546_vm6, %v1801_v62 }
 0x21e   : > { %v559_v1 = vpop.f32.mrf.mxu0 }
 0x21f   : > { %v516_v2 = vpop.permute.xlu0 %515  ;;  %1626 = vmatmul.msk.bf16.vlgmr.msra.gmra.mxu1 %vm546_vm6, %v1793_v0 }
 0x220   : > { %v560_v3 = vadd.f32 %v559_v1, %v516_v2 }
 0x221   : > { %v521_v6 = vpop.permute.xlu1 %520 }
 0x222   : > { %v566_v4 = vmul.f32 3.0, %v560_v3  ;;  %vm564_vm7 = vcmp.gt.f32.partialorder %v560_v3, 0.0 }
 0x224   : > { %v568_v5 = vsel %vm564_vm7, %v560_v3, %v566_v4 }
 0x225   : > { %572 = vrot.lane.b32.xlu2 %v568_v5, %s2040_s26 }
 0x226   : > { %v561_v7 = vpop.f32.mrf.mxu0 }
 0x227   : > { %v562_v8 = vadd.f32 %v561_v7, %v521_v6  ;;  %v601_v14 = vpop.permute.xlu0 %600 }
 0x229   : > { %v567_v9 = vmul.f32 3.0, %v562_v8  ;;  %vm565_vm8 = vcmp.gt.f32.partialorder %v562_v8, 0.0  ;;  %v681_v16 = vpop.permute.xlu1 %680 }
 0x22b   : > { %v569_v10 = vsel %vm565_vm8, %v562_v8, %v567_v9 }
 0x22c   : > { %574 = vrot.lane.b32.xlu0 %v569_v10, %s2040_s26 }
 0x22f   : > { %v766_v15 = vpop.permute.xlu0 %765 }
 0x231   : > { %v771_v32 = vpop.permute.xlu1 %770 }
 0x27f   : > { %v573_v13 = vpop.permute.xlu2 %572 }
 0x280   : > { %579 = vst.msk [vmem:[#allocation2] sm:$0xff] %vm578_vm9, %v573_v13 }
 0x296   : > { %v729_v17 = vpop.f32.mrf.mxu2 }
 0x297   : > { %v730_v18 = vadd.f32 %v729_v17, %v681_v16 }
 0x299   : > { %v736_v19 = vmul.f32 3.0, %v730_v18  ;;  %vm734_vm10 = vcmp.gt.f32.partialorder %v730_v18, 0.0 }
 0x29b   : > { %v738_v20 = vsel %vm734_vm10, %v730_v18, %v736_v19 }
 0x29c   : > { %v644_v21 = vpop.f32.mrf.mxu1  ;;  %742 = vrot.lane.b32.xlu0 %v738_v20, %s2425_s15 }
 0x29d   : > { %v645_v22 = vadd.f32 %v644_v21, %v596_v11 }
 0x29e   : > { %v575_v23 = vpop.permute.xlu0 %574  ;;  %v731_v24 = vpop.f32.mrf.mxu2 }
 0x29f   : > { %580 = vst.msk [vmem:[#allocation2 + $0x8] sm:$0xff] %vm578_vm9, %v575_v23  ;;  %v651_v25 = vmul.f32 3.0, %v645_v22  ;;  %vm649_vm11 = vcmp.gt.f32.partialorder %v645_v22, 0.0  ;;  %v732_v27 = vadd.f32 %v731_v24, %v686_v12 }
 0x2a0   : > { %v814_v26 = vpop.f32.mrf.mxu3 }
 0x2a1   : > { %v653_v28 = vsel %vm649_vm11, %v645_v22, %v651_v25  ;;  %v737_v30 = vmul.f32 3.0, %v732_v27  ;;  %vm735_vm12 = vcmp.gt.f32.partialorder %v732_v27, 0.0  ;;  %v815_v36 = vadd.f32 %v814_v26, %v766_v15 }
 0x2a2   : > { %657 = vrot.lane.b32.xlu1 %v653_v28, %s2423_s25 }
 0x2a3   : > { %v739_v37 = vsel %vm735_vm12, %v732_v27, %v737_v30  ;;  %v821_v41 = vmul.f32 3.0, %v815_v36  ;;  %vm819_vm15 = vcmp.gt.f32.partialorder %v815_v36, 0.0 }
 0x2a4   : > { %v646_v29 = vpop.f32.mrf.mxu1 }
 0x2a5   : > { %v647_v31 = vadd.f32 %v646_v29, %v601_v14  ;;  %v823_v42 = vsel %vm819_vm15, %v815_v36, %v821_v41  ;;  %v1686_v41 = vld [vmem:[%s2260_s28 + $0x10] sm:$0xff] }
 0x2a7   : > { %v652_v33 = vmul.f32 3.0, %v647_v31  ;;  %vm650_vm13 = vcmp.gt.f32.partialorder %v647_v31, 0.0 }
 0x2a8   : > { %v816_v34 = vpop.f32.mrf.mxu3 }
 0x2a9   : > { %v817_v35 = vadd.f32 %v816_v34, %v771_v32  ;;  %v654_v38 = vsel %vm650_vm13, %v647_v31, %v652_v33 }
 0x2aa   : > { %744 = vrot.lane.b32.xlu1 %v739_v37, %s2425_s15  ;;  %659 = vrot.lane.b32.xlu2 %v654_v38, %s2423_s25  ;;  %s1983_s25 = scalar_lea.hbm %s2420_s9, 2 }
 0x2ab   : > { %v822_v39 = vmul.f32 3.0, %v817_v35  ;;  %vm820_vm14 = vcmp.gt.f32.partialorder %v817_v35, 0.0 }
 0x2ad   : > { %v824_v40 = vsel %vm820_vm14, %v817_v35, %v822_v39  ;;  %v1808_v35 = vld [vmem:[%s2246_s22 + $0x8] sm:$0xff]  ;;  %v1707_v39 = vld [vmem:[%s2260_s28 + $0x30] sm:$0xff] }
 0x2ae   : > { %829 = vrot.lane.b32.xlu0 %v824_v40, %s2421_s19  ;;  %v1687_v40 = vld [vmem:[%s2260_s28 + $0x18] sm:$0xff] }
 0x2b2   : > { %827 = vrot.lane.b32.xlu2 %v823_v42, %s2421_s19  ;;  %v1729_v42 = vld [vmem:[%s2260_s28 + $0x58] sm:$0xff] }
 0x304   : > { %v660_v43 = vpop.permute.xlu2 %659 }
 0x305   : > { %665 = vst.msk [vmem:[#allocation2 + $0x8] sm:$0xff] %vm663_vm0, %v660_v43  ;;  %v1728_v43 = vld [vmem:[%s2260_s28 + $0x50] sm:$0xff] }
 0x30c   : > { %v828_v46 = vpop.permute.xlu2 %827 }
 0x30e   : > { %v743_v45 = vpop.permute.xlu0 %742 }
 0x314   : > { %v658_v44 = vpop.permute.xlu1 %657 }
 0x315   : > { %664 = vst.msk [vmem:[#allocation2] sm:$0xff] %vm663_vm0, %v658_v44  ;;  %v1708_v44 = vld [vmem:[%s2260_s28 + $0x38] sm:$0xff] }
 0x316   : > { %749 = vst.msk [vmem:[#allocation2] sm:$0xff] %vm748_vm1, %v743_v45  ;;  %v1750_v45 = vld [vmem:[%s2260_s28 + $0x78] sm:$0xff] }
 0x317   : > { %834 = vst.msk [vmem:[#allocation2] sm:$0xff] %vm833_vm2, %v828_v46  ;;  %v1749_v46 = vld [vmem:[%s2260_s28 + $0x70] sm:$0xff]  ;;  %s2050_s28 = smov 124  }
 0x31c   : > { %v745_v47 = vpop.permute.xlu1 %744 }
 0x31d   : > { %750 = vst.msk [vmem:[#allocation2 + $0x8] sm:$0xff] %vm748_vm1, %v745_v47 }
 0x31e   : > { %v838_v49 = vld [vmem:[#allocation2] sm:$0xff] }
 0x320   : > { %v830_v48 = vpop.permute.xlu0 %829 }
 0x321   : > { %835 = vst.msk [vmem:[#allocation2 + $0x8] sm:$0xff] %vm833_vm2, %v830_v48 }
 0x328   : > { %v839_v50 = vld [vmem:[#allocation2 + $0x8] sm:$0xff] }
 0x329   : > { %v840_v51 = vpack.c.bf16 %v839_v50, %v838_v49 }
 0x32b   : > { %876 = vrot.lane.b32.xlu0 %v840_v51, %s2043_s8  ;;  %850 = vrot.lane.b32.xlu2 %v840_v51, %s2042_s20 }
 0x32c   : > { %904 = vrot.lane.b32.xlu1 %v840_v51, %s2041_s16 }
 0x333   : > { %935 = vperm.xlu2 %1901, %v927_v52  }
 0x334   : > { %930 = vperm.xlu1 %1900, %v926_v53  }
 0x385   : > { %v851_v54 = vpop.permute.xlu2 %850 }
 0x386   : > { %864 = vmatpush.bf16.msrb.mxu0 %v851_v54  ;;  %v1820_v54 = vld [vmem:[%s2246_s22 + $0x38] sm:$0xff] }
 0x389   : > { %1673 = vmatmul.msk.bf16.vlgmr.msrb.gmra.mxu0 %vm853_vm3, %v1806_v55 }
 0x38d   : > { %v936_v10 = vpop.permute.xlu2 %935 }
 0x39d   : > { %v877_v56 = vpop.permute.xlu0 %876 }
 0x39e   : > { %v905_v58 = vpop.permute.xlu1 %904  ;;  %889 = vmatpush.bf16.msrb.mxu1 %v877_v56 }
 0x39f   : > { %917 = vmatpush.bf16.msrb.mxu2 %v905_v58  ;;  %v1816_v58 = vld [vmem:[%s2246_s22 + $0x28] sm:$0xff] }
 0x3a1   : > { %1678 = vmatmul.msk.bf16.vlgmr.msrb.gmra.mxu1 %vm853_vm3, %v1805_v57  ;;  %v1812_v57 = vld [vmem:[%s2246_s22 + $0x18] sm:$0xff]  ;;  %s1471_s22 = scalar_lea.sflag [#allocation7], %s2195_s30 }
 0x3a2   : > { %1683 = vmatmul.msk.bf16.vlgmr.msrb.gmra.mxu2 %vm853_vm3, %v1807_v59 }
 0x3a6   : > { %v931_v1 = vpop.permute.xlu1 %930 }
 0x406   : > { %v866_v61 = vpop.f32.mrf.mxu0 }
 0x40e   : > { %v868_v5 = vpop.f32.mrf.mxu0 }
 0x41e   : > { %v891_v60 = vpop.f32.mrf.mxu1 }
 0x41f   : > { %v892_v62 = vadd.f32 %v891_v60, %v866_v61 }
 0x425   : > { %v919_v63 = vpop.f32.mrf.mxu2 }
 0x426   : > { %v924_v0 = vadd.f32 %v919_v63, %v892_v62  ;;  %v893_v3 = vpop.f32.mrf.mxu1 }
 0x427   : > { %v894_v6 = vadd.f32 %v893_v3, %v868_v5 }
 0x428   : > { %v938_v2 = vadd.f32 %v931_v1, %v924_v0 }
 0x42a   : > { %vm940_vm7 = vcmp.gt.f32.partialorder %v938_v2, 0.0  ;;  %v942_v4 = vmul.f32 3.0, %v938_v2 }
 0x42c   : > { %v944_v7 = vsel %vm940_vm7, %v938_v2, %v942_v4 }
 0x42d   : > { %v921_v8 = vpop.f32.mrf.mxu2  ;;  %948 = vrot.lane.b32.xlu0 %v944_v7, %s2040_s26 }
 0x42e   : > { %v925_v9 = vadd.f32 %v921_v8, %v894_v6 }
 0x430   : > { %v939_v11 = vadd.f32 %v936_v10, %v925_v9 }
 0x432   : > { %vm941_vm8 = vcmp.gt.f32.partialorder %v939_v11, 0.0  ;;  %v943_v12 = vmul.f32 3.0, %v939_v11 }
 0x434   : > { %v945_v13 = vsel %vm941_vm8, %v939_v11, %v943_v12 }
 0x435   : > { %950 = vrot.lane.b32.xlu1 %v945_v13, %s2040_s26 }
 0x49f   : > { %v949_v14 = vpop.permute.xlu0 %948 }
 0x4a0   : > { %954 = vst.msk [vmem:[#allocation2] sm:$0xff] %vm457_vm4, %v949_v14 }
 0x4a7   : > { %v951_v15 = vpop.permute.xlu1 %950  ;;  %v984_v16 = vld [vmem:[#allocation2] sm:$0xff] }
 0x4a8   : > { %955 = vst.msk [vmem:[#allocation2 + $0x8] sm:$0xff] %vm457_vm4, %v951_v15  ;;  %v986_v17 = vpack.c.bf16 %v984_v16, %v984_v16 }
 0x4aa   : > { %990 = vrot.lane.b32.xlu2 %v986_v17, %s2041_s16  ;;  %976 = vrot.lane.b32.xlu1 %v986_v17, %s2042_s20 }
 0x4af   : > { %v985_v18 = vld [vmem:[#allocation2 + $0x8] sm:$0xff] }
 0x4b0   : > { %v987_v19 = vpack.c.bf16 %v985_v18, %v985_v18 }
 0x4b2   : > { %992 = vrot.lane.b32.xlu0 %v987_v19, %s2041_s16  ;;  %978 = vrot.lane.b32.xlu2 %v987_v19, %s2042_s20  ;;  %s2435_s16 = smov 10  }
 0x4b3   : > { %964 = vrot.lane.b32.xlu1 %v987_v19, %s2043_s8 }
 0x4ba   : > { %962 = vrot.lane.b32.xlu0 %v986_v17, %s2043_s8  ;;  %s2436_s8 = smov 26  }
 0x504   : > { %v991_v20 = vpop.permute.xlu2 %990 }
 0x505   : > { %996 = vst.msk [vmem:[#allocation3 + $0x10] sm:$0xf] %vm472_vm5, %v991_v20 }
 0x50c   : > { %v979_v21 = vpop.permute.xlu2 %978 }
 0x50d   : > { %983 = vst.msk [vmem:[#allocation3 + $0xc] sm:$0xf] %vm472_vm5, %v979_v21 }
 0x51c   : > { %v977_v22 = vpop.permute.xlu1 %976 }
 0x51d   : > { %982 = vst.msk [vmem:[#allocation3 + $0x8] sm:$0xf] %vm472_vm5, %v977_v22 }
 0x524   : > { %v993_v23 = vpop.permute.xlu0 %992  ;;  %v1822_v24 = vld [vmem:[#allocation3 + $0x8] sm:$0xff] }
 0x525   : > { %997 = vst.msk [vmem:[#allocation3 + $0x14] sm:$0xf] %vm472_vm5, %v993_v23  ;;  %v965_v25 = vpop.permute.xlu1 %964  ;;  %1288 = vrot.lane.b32.xlu1 %v1822_v24, %s2045_s18  ;;  %v1810_v30 = vld [vmem:[#allocation3 + $0x8] sm:$0xff] }
 0x526   : > { %969 = vst.msk [vmem:[#allocation3 + $0x4] sm:$0xf] %vm472_vm5, %v965_v25  ;;  %v1814_v31 = vld [vmem:[#allocation3 + $0x8] sm:$0xff] }
 0x527   : > { %v1818_v38 = vld [vmem:[#allocation3 + $0x8] sm:$0xff] }
 0x52c   : > { %v963_v26 = vpop.permute.xlu0 %962  ;;  %v1815_v27 = vld [vmem:[#allocation3 + $0x10] sm:$0xff] }
 0x52d   : > { %v1811_v28 = vld [vmem:[#allocation3 + $0x10] sm:$0xff]  ;;  %968 = vst.msk [vmem:[#allocation3] sm:$0xf] %vm472_vm5, %v963_v26  ;;  %1122 = vrot.lane.b32.xlu0 %v1815_v27, %s2046_s23 }
 0x52e   : > { %v1823_v29 = vld [vmem:[#allocation3 + $0x10] sm:$0xff]  ;;  %1051 = vmatpush.bf16.msrb.mxu3 %v1811_v28 }
 0x52f   : > { %1290 = vrot.lane.b32.xlu2 %v1823_v29, %s2045_s18  ;;  %v1819_v34 = vld [vmem:[#allocation3 + $0x10] sm:$0xff] }
 0x532   : > { %1052 = vmatpush.bf16.msrb.mxu3 %v1810_v30 }
 0x534   : > { %v1821_v32 = vld [vmem:[#allocation3] sm:$0xff] }
 0x535   : > { %v1809_v33 = vld [vmem:[#allocation3] sm:$0xff]  ;;  %1120 = vrot.lane.b32.xlu0 %v1814_v31, %s2046_s23  ;;  %1286 = vrot.lane.b32.xlu1 %v1821_v32, %s2045_s18 }
 0x536   : > { %1053 = vmatpush.bf16.msrb.mxu3 %v1809_v33  ;;  %v1817_v36 = vld [vmem:[#allocation3] sm:$0xff] }
 0x537   : > { %1206 = vrot.lane.b32.xlu2 %v1819_v34, %s2044_s5  ;;  %v1813_v37 = vld [vmem:[#allocation3] sm:$0xff] }
 0x539   : > { %1704 = vmatmul.msk.bf16.vlgmr.msrb.gmra.mxu3 %vm546_vm6, %v1808_v35 }
 0x53d   : > { %1202 = vrot.lane.b32.xlu1 %v1817_v36, %s2044_s5  ;;  %1118 = vrot.lane.b32.xlu0 %v1813_v37, %s2046_s23  ;;  %v1783_v36 = vld [vmem:[%s2417_s6 + $0x10] sm:$0xff] }
 0x53f   : > { %1204 = vrot.lane.b32.xlu2 %v1818_v38, %s2044_s5  ;;  %v1437_v38 = vld [vmem:[%s2418_s7 + $0x8] sm:$0xff] }
 0x545   : > { %1090 = vperm.xlu1 %1900, %v1707_v39   ;;  %1017 = vperm.xlu0 %1899, %v1687_v40  }
 0x547   : > { %1012 = vperm.xlu2 %1901, %v1686_v41  }
 0x54d   : > { %1179 = vperm.xlu1 %1900, %v1729_v42   ;;  %1174 = vperm.xlu0 %1899, %v1728_v43  }
 0x54f   : > { %1095 = vperm.xlu2 %1901, %v1708_v44  }
 0x555   : > { %1263 = vperm.xlu0 %1899, %v1750_v45  }
 0x557   : > { %1258 = vperm.xlu2 %1901, %v1749_v46  }
 0x589   : > { %v1291_v47 = vpop.permute.xlu2 %1290 }
 0x58a   : > { %1303 = vmatpush.bf16.msra.mxu2 %v1291_v47 }
 0x591   : > { %v1207_v48 = vpop.permute.xlu2 %1206 }
 0x592   : > { %1219 = vmatpush.bf16.msra.mxu1 %v1207_v48  ;;  %v1436_v48 = vld [vmem:[%s2418_s7] sm:$0xff] }
 0x597   : > { %v1289_v49 = vpop.permute.xlu1 %1288 }
 0x598   : > { %1304 = vmatpush.bf16.msra.mxu2 %v1289_v49  ;;  %v1784_v49 = vld [vmem:[%s2417_s6 + $0x18] sm:$0xff] }
 0x599   : > { %v1205_v50 = vpop.permute.xlu2 %1204 }
 0x59a   : > { %1220 = vmatpush.bf16.msra.mxu1 %v1205_v50  ;;  %v1460_v50 = vld [vmem:[#allocation4] sm:$0x1] }
 0x59f   : > { %v1123_v51 = vpop.permute.xlu0 %1122 }
 0x5a0   : > { %1135 = vmatpush.bf16.msra.mxu0 %v1123_v51  ;;  %v1824_v51 = vld [vmem:[#allocation8 + $0x18] sm:$0xff] }
 0x5a1   : > { %v1013_v59 = vpop.permute.xlu2 %1012 }
 0x5a7   : > { %v1121_v52 = vpop.permute.xlu0 %1120  ;;  %v1287_v53 = vpop.permute.xlu1 %1286 }
 0x5a8   : > { %1136 = vmatpush.bf16.msra.mxu0 %v1121_v52  ;;  %1305 = vmatpush.bf16.msra.mxu2 %v1287_v53 }
 0x5a9   : > { %v1096_v5 = vpop.permute.xlu2 %1095 }
 0x5ab   : > { %1767 = vmatmul.msk.bf16.vlgmr.msra.gmra.mxu2 %vm546_vm6, %v1820_v54  ;;  %v1825_v54 = vld [vmem:[#allocation8 + $0x20] sm:$0xff] }
 0x5af   : > { %v1119_v55 = vpop.permute.xlu0 %1118  ;;  %v1203_v56 = vpop.permute.xlu1 %1202 }
 0x5b0   : > { %1137 = vmatpush.bf16.msra.mxu0 %v1119_v55  ;;  %1221 = vmatpush.bf16.msra.mxu1 %v1203_v56  ;;  %v1826_v55 = vld [vmem:[#allocation8 + $0x28] sm:$0xff] }
 0x5b1   : > { %v1259_v6 = vpop.permute.xlu2 %1258 }
 0x5b3   : > { %1725 = vmatmul.msk.bf16.vlgmr.msra.gmra.mxu0 %vm546_vm6, %v1812_v57  ;;  %1746 = vmatmul.msk.bf16.vlgmr.msra.gmra.mxu1 %vm546_vm6, %v1816_v58 }
 0x5b7   : > { %v1018_v0 = vpop.permute.xlu0 %1017  ;;  %v1091_v7 = vpop.permute.xlu1 %1090 }
 0x5bc   : > { %v1055_v60 = vpop.f32.mrf.mxu3 }
 0x5bd   : > { %v1056_v61 = vadd.f32 %v1055_v60, %v1013_v59 }
 0x5bf   : > { %v1062_v62 = vmul.f32 3.0, %v1056_v61  ;;  %vm1060_vm4 = vcmp.gt.f32.partialorder %v1056_v61, 0.0  ;;  %v1175_v9 = vpop.permute.xlu0 %1174  ;;  %v1180_v10 = vpop.permute.xlu1 %1179 }
 0x5c1   : > { %v1064_v63 = vsel %vm1060_vm4, %v1056_v61, %v1062_v62 }
 0x5c2   : > { %1068 = vrot.lane.b32.xlu1 %v1064_v63, %s2040_s26 }
 0x5c4   : > { %v1057_v1 = vpop.f32.mrf.mxu3 }
 0x5c5   : > { %v1058_v2 = vadd.f32 %v1057_v1, %v1018_v0 }
 0x5c7   : > { %v1063_v3 = vmul.f32 3.0, %v1058_v2  ;;  %vm1061_vm5 = vcmp.gt.f32.partialorder %v1058_v2, 0.0  ;;  %v1264_v21 = vpop.permute.xlu0 %1263 }
 0x5c9   : > { %v1065_v4 = vsel %vm1061_vm5, %v1058_v2, %v1063_v3 }
 0x5ca   : > { %1070 = vrot.lane.b32.xlu2 %v1065_v4, %s2040_s26  ;;  %s2434_s26 = smov 18  }
 0x624   : > { %v1071_v8 = vpop.permute.xlu2 %1070 }
 0x625   : > { %1075 = vst.msk [vmem:[#allocation2 + $0x8] sm:$0xff] %vm578_vm9, %v1071_v8 }
 0x62e   : > { %v1307_v11 = vpop.f32.mrf.mxu2 }
 0x62f   : > { %v1308_v31 = vadd.f32 %v1307_v11, %v1259_v6 }
 0x630   : > { %v1139_v12 = vpop.f32.mrf.mxu0  ;;  %v1223_v13 = vpop.f32.mrf.mxu1 }
 0x631   : > { %v1140_v14 = vadd.f32 %v1139_v12, %v1091_v7  ;;  %v1224_v15 = vadd.f32 %v1223_v13, %v1175_v9  ;;  %v1314_v35 = vmul.f32 3.0, %v1308_v31 }
 0x633   : > { %v1146_v16 = vmul.f32 3.0, %v1140_v14  ;;  %v1230_v17 = vmul.f32 3.0, %v1224_v15  ;;  %vm1228_vm6 = vcmp.gt.f32.partialorder %v1224_v15, 0.0  ;;  %vm1144_vm10 = vcmp.gt.f32.partialorder %v1140_v14, 0.0 }
 0x634   : > { %v1069_v18 = vpop.permute.xlu1 %1068 }
 0x635   : > { %1074 = vst.msk [vmem:[#allocation2] sm:$0xff] %vm578_vm9, %v1069_v18  ;;  %v1232_v19 = vsel %vm1228_vm6, %v1224_v15, %v1230_v17  ;;  %v1148_v20 = vsel %vm1144_vm10, %v1140_v14, %v1146_v16  ;;  %vm1312_vm9 = vcmp.gt.f32.partialorder %v1308_v31, 0.0 }
 0x636   : > { %v1309_v22 = vpop.f32.mrf.mxu2  ;;  %1236 = vrot.lane.b32.xlu2 %v1232_v19, %s2434_s26  ;;  %1152 = vrot.lane.b32.xlu0 %v1148_v20, %s2435_s16  ;;  %v1316_v37 = vsel %vm1312_vm9, %v1308_v31, %v1314_v35 }
 0x637   : > { %v1310_v23 = vadd.f32 %v1309_v22, %v1264_v21 }
 0x638   : > { %v1141_v24 = vpop.f32.mrf.mxu0  ;;  %v1225_v25 = vpop.f32.mrf.mxu1 }
 0x639   : > { %v1315_v26 = vmul.f32 3.0, %v1310_v23  ;;  %v1142_v27 = vadd.f32 %v1141_v24, %v1096_v5  ;;  %v1226_v28 = vadd.f32 %v1225_v25, %v1180_v10  ;;  %vm1313_vm11 = vcmp.gt.f32.partialorder %v1310_v23, 0.0 }
 0x63b   : > { %v1147_v29 = vmul.f32 3.0, %v1142_v27  ;;  %v1231_v30 = vmul.f32 3.0, %v1226_v28  ;;  %vm1145_vm12 = vcmp.gt.f32.partialorder %v1142_v27, 0.0  ;;  %vm1229_vm13 = vcmp.gt.f32.partialorder %v1226_v28, 0.0 }
 0x63c   : > { %v1317_v33 = vsel %vm1313_vm11, %v1310_v23, %v1315_v26 }
 0x63d   : > { %v1149_v32 = vsel %vm1145_vm12, %v1142_v27, %v1147_v29  ;;  %v1233_v34 = vsel %vm1229_vm13, %v1226_v28, %v1231_v30 }
 0x63e   : > { %1154 = vrot.lane.b32.xlu1 %v1149_v32, %s2435_s16  ;;  %1322 = vrot.lane.b32.xlu2 %v1317_v33, %s2436_s8  ;;  %s1479_s16 = scalar_lea.hbm %s2420_s9, %s2128_s17 }
 0x63f   : > { %1238 = vrot.lane.b32.xlu0 %v1233_v34, %s2434_s26  ;;  %s1483_s18 = sshll.u32 %s1479_s16, 4  ;;  %s1484_s18 = int_to_ptr.hbm [resolvable:$true] %s1483_s18 }
 0x640   : > { %s1977_s23 = sshra.s32 %s1484_s18, 4  ;;  %s1978_s23 = int_to_ptr.hbm [resolvable:$true] %s1977_s23 }
 0x641   : > { %p1984_p8 = scmp.lt.s32.totalorder %s1978_s23, %s2420_s9 }
 0x646   : > { %1320 = vrot.lane.b32.xlu1 %v1316_v37, %s2436_s8  ;;  %1420 = vperm.xlu2 %1901, %v1783_v36   ;;  %s393_s8 = scalar_lea.vmem [#allocation10], %s2195_s30 }
 0x647   : > { %s1481_s5 = sshll.u32 %s393_s8, 4  ;;  %s1482_s5 = int_to_ptr.vmem [resolvable:$true] %s1481_s5 }
 0x64e   : > { %1445 = vperm.xlu2 %1901, %v1437_v38  }
 0x690   : > { %v1237_v39 = vpop.permute.xlu2 %1236 }
 0x698   : > { %v1323_v43 = vpop.permute.xlu2 %1322 }
 0x6a0   : > { %v1421_v61 = vpop.permute.xlu2 %1420 }
 0x6a8   : > { %v1153_v40 = vpop.permute.xlu0 %1152  ;;  %v1446_v11 = vpop.permute.xlu2 %1445 }
 0x6a9   : > { %1158 = vst.msk [vmem:[#allocation2] sm:$0xff] %vm663_vm0, %v1153_v40 }
 0x6aa   : > { %1242 = vst.msk [vmem:[#allocation2] sm:$0xff] %vm748_vm1, %v1237_v39 }
 0x6b0   : > { %v1155_v41 = vpop.permute.xlu1 %1154 }
 0x6b1   : > { %v1239_v42 = vpop.permute.xlu0 %1238  ;;  %1159 = vst.msk [vmem:[#allocation2 + $0x8] sm:$0xff] %vm663_vm0, %v1155_v41  ;;  %vm1450_vm0 = vcmask 261120  }
 0x6b2   : > { %1243 = vst.msk [vmem:[#allocation2 + $0x8] sm:$0xff] %vm748_vm1, %v1239_v42  ;;  %vm1468_vm1 = vcmask 253952  }
 0x6b3   : > { %1327 = vst.msk [vmem:[#allocation2 + $0x8] sm:$0xff] %vm833_vm2, %v1323_v43 }
 0x6b8   : > { %v1321_v44 = vpop.permute.xlu1 %1320 }
 0x6b9   : > { %1326 = vst.msk [vmem:[#allocation2] sm:$0xff] %vm833_vm2, %v1321_v44 }
 0x6ba   : > { %v1332_v46 = vld [vmem:[#allocation2 + $0x8] sm:$0xff] }
 0x6c0   : > { %v1331_v45 = vld [vmem:[#allocation2] sm:$0xff] }
 0x6c1   : > { %v1333_v47 = vpack.c.bf16 %v1332_v46, %v1331_v45 }
 0x6c3   : > { %1393 = vrot.lane.b32.xlu1 %v1333_v47, %s2050_s28  ;;  %1343 = vrot.lane.b32.xlu0 %v1333_v47, %s2042_s20  ;;  %s1979_s28 = scalar_lea.hbm %s1978_s23, 1 }
 0x6c4   : > { %1378 = vmatpush.bf16.msrb.mxu0 %v1333_v47  ;;  %p1980_p3 = scmp.ne.s32.totalorder %s1978_s23, %s1979_s28  ;;  %p1985_p7 = scmp.lt.s32.totalorder %s1983_s25, %s1979_s28 }
 0x6c6   : > { %p1981_p5 = pnand %p1980_p3, %p2164_p13  ;;  %p1986_p9 = por %p1985_p7, %p1984_p8 }
 0x6c7   : > { %1777 = vmatmul.msk.bf16.vlgmr.msrb.gmra.mxu0 %vm853_vm3, %v1824_v51 }
 0x6c8   : > { %p1982_p12 = pneg %p1981_p5 }
 0x6ca   : > { %p1987_p10 = pnand %p1986_p9, %p1982_p12 }
 0x6cb   : > { %1440 = vperm.xlu1 %1900, %v1436_v48   ;;  %1425 = vperm.xlu0 %1899, %v1784_v49  }
 0x6d3   : > { %1463 = vperm.xlu0 %1899, %v1460_v50  }
 0x735   : > { %v1394_v52 = vpop.permute.xlu1 %1393  ;;  %v1344_v53 = vpop.permute.xlu0 %1343 }
 0x736   : > { %1356 = vmatpush.bf16.msra.mxu3 %v1344_v53  ;;  %1406 = vmatpush.bf16.msrb.mxu1 %v1394_v52 }
 0x739   : > { %1772 = vmatmul.msk.bf16.vlgmr.msra.gmra.mxu3 %vm853_vm3, %v1825_v54  ;;  %1782 = vmatmul.msk.bf16.vlgmr.msrb.gmra.mxu1 %vm853_vm3, %v1826_v55 }
 0x73d   : > { %v1426_v5 = vpop.permute.xlu0 %1425  ;;  %v1441_v8 = vpop.permute.xlu1 %1440 }
 0x744   : > { %v1380_v56 = vpop.f32.mrf.mxu0 }
 0x745   : > { %v1464_v21 = vpop.permute.xlu0 %1463 }
 0x746   : > { %v1466_v23 = vperm.slane %v1464_v21, 0 }
 0x74c   : > { %v1382_v0 = vpop.f32.mrf.mxu0 }
 0x7b6   : > { %v1408_v58 = vpop.f32.mrf.mxu1 }
 0x7bc   : > { %v1358_v57 = vpop.f32.mrf.mxu3 }
 0x7bd   : > { %v1381_v59 = vadd.f32 %v1380_v56, %v1358_v57 }
 0x7be   : > { %v1410_v3 = vpop.f32.mrf.mxu1 }
 0x7bf   : > { %v1413_v60 = vadd.f32 %v1408_v58, %v1381_v59 }
 0x7c1   : > { %v1428_v62 = vadd.f32 %v1421_v61, %v1413_v60 }
 0x7c3   : > { %v1432_v1 = vmul.f32 3.0, %v1428_v62  ;;  %vm1430_vm14 = vcmp.gt.f32.partialorder %v1428_v62, 0.0 }
 0x7c4   : > { %v1360_v63 = vpop.f32.mrf.mxu3 }
 0x7c5   : > { %v1383_v2 = vadd.f32 %v1382_v0, %v1360_v63  ;;  %v1434_v6 = vsel %vm1430_vm14, %v1428_v62, %v1432_v1 }
 0x7c6   : > { %v1448_v10 = vmul.f32 %v1441_v8, %v1434_v6 }
 0x7c7   : > { %v1414_v4 = vadd.f32 %v1410_v3, %v1383_v2 }
 0x7c8   : > { %v1451_v14 = vsel %vm1450_vm0, %v1448_v10, 0.0 }
 0x7c9   : > { %v1429_v7 = vadd.f32 %v1426_v5, %v1414_v4 }
 0x7cb   : > { %vm1431_vm15 = vcmp.gt.f32.partialorder %v1429_v7, 0.0  ;;  %v1433_v9 = vmul.f32 3.0, %v1429_v7 }
 0x7cd   : > { %v1435_v12 = vsel %vm1431_vm15, %v1429_v7, %v1433_v9 }
 0x7ce   : > { %v1449_v13 = vmul.f32 %v1446_v11, %v1435_v12 }
 0x7d0   : > { %v1452_v15 = vsel %vm1450_vm0, %v1449_v13, 0.0 }
 0x7d1   : > { %v1453_v16 = vadd.f32 %v1452_v15, %v1451_v14 }
 0x7d3   : > { %v1454_v17 = vrot.slane %v1453_v16, 4 }
 0x7d5   : > { %v1455_v18 = vadd.f32 %v1454_v17, %v1453_v16 }
 0x7d7   : > { %v1456_v19 = vrot.slane %v1455_v18, 2 }
 0x7d9   : > { %v1457_v20 = vadd.f32 %v1456_v19, %v1455_v18 }
 0x7db   : > { %v1458_v22 = vrot.slane %v1457_v20, 1 }
 0x7dd   : > { %v1459_v24 = vadd.f32 %v1458_v22, %v1457_v20 }
 0x7df   : > { %v1467_v25 = vadd.f32 %v1466_v23, %v1459_v24 }
 0x7e1   : > { %1469 = vst.msk [vmem:[%s393_s8] sm:$0x1] %vm1468_vm1, %v1467_v25 }
 0x7e2   : > { %1990 = shalt.err (!%p1987_p10)
}
 0x7e3   : > { %1833 = dma.vmem_to_hbm [thread:$0]  (%p2164_p13), %s1482_s5, 16, %s1484_s18, %s1471_s22  }
 0x7e4 PF: > { %s1495_s30 = sand.u32 1, %s2021_s11   ;;  %p2437_p11 = scmp.ge.s32.totalorder %s2033_s14, 2 }
 0x7e5   : > { %s1496_s20 = scalar_lea.sflag [#allocation7], %s1495_s30 }
 0x7e6   : > { %p1844_p0 = pnand %p2437_p11, %p2169_p4 }
 0x7e8   : > { %p1845_p2 = pneg %p1844_p0 }
 0x7ea   : > { %2016 = dma.done.wait (%p1845_p2), %s1496_s20, 16  }
 0x7eb   : > { %2018 = vsyncadd (%p1845_p2), %s1496_s20, 4294967280  ;;  %p25_p6 = scmp.ge.s32.totalorder %s2144_s24, 4   ;;  %s2438_s11 = smov %s2025_s12 }
 0x7ec   : > { %s2439_s12 = smov %s2029_s13  ;;  %s2440_s13 = smov %s2156_s27 }
 0x7ed   : > { %s2441_s14 = smov %s2144_s24  ;;  %27 = sbr.rel (!%p25_p6) target bundleno = 9 (0x9), region = 131 }
 0x7f2   :  { %1501 = vsyncpa [#allocation6], 1 }
 0x7f3   :  { %1503 = vsyncpa [#allocation6 + $0x1], 1 }
 0x7f4   :  { %1504 = vsyncpa [#allocation9], 1 }
 0x7f5   :  { %1505 = vsyncpa [#allocation7], 1 }
 0x7f6   :  { %1507 = vsyncpa [#allocation7 + $0x1], 1 }

</bundles_post_ra>
